<compile_context>
chip_gen: v6e
topology: v6e:2x2x1
jax: 0.10.0
libtpu: 0.0.40
codegen_flags: <defaults>
</compile_context>

<pallas_src>
from functools import partial

import numpy as np
import jax
import jax.numpy as jnp
from jax import lax
from jax.experimental import pallas as pl
from jax.experimental.pallas import tpu as pltpu

ANCHORS = [
    [0.0, 0.0, 0.8010479212, 0.8268978596],
    [0.0, 0.0, 0.6402753592, 0.4069810212],
    [0.0, 0.0, 0.3496080637, 0.6819785237],
    [0.0, 0.0, 0.0876114890, 0.1330402344],
    [0.0, 0.0, 0.2124535590, 0.3432995677],
]


def _default_num_cores():
    """2 only on generations with a second shardable TensorCore."""
    try:
        kind = jax.devices()[0].device_kind.lower()
    except Exception:
        return 1
    if any(tag in kind for tag in ("v7", "tpu7", "v4", "v5p")):
        return 2
    return 1


def _make_loss_kernel(S, B, C, TSUB, steps_per_core, n_cells):
    D = 5 + C
    inv_S = 1.0 / float(S)
    inv_B = 1.0 / float(B)
    n_sub = TSUB // 8
    cells_per_grid_step = TSUB * 128

    def kernel(p_ref, lab_ref, out_ref, logit_scr):
        # p_ref     : (B, D, TSUB, 128)
        # lab_ref   : (D, TSUB, 128)
        # out_ref   : (7, 8, 128)   resident per-core accumulator
        # logit_scr : (C, 8, 128)   VMEM scratch for selected class logits
        core = pl.program_id(0)
        step = pl.program_id(1)

        @pl.when(step == 0)
        def _():
            out_ref[...] = jnp.zeros_like(out_ref)

        shape = (8, 128)
        zeros = jnp.zeros(shape, jnp.float32)
        rows = lax.broadcasted_iota(jnp.int32, shape, 0)
        lanes = lax.broadcasted_iota(jnp.int32, shape, 1)

        # NOMINAL (unclamped) chunk index.  The index_map clamps the DMA to the
        # last real chunk; keeping the nominal index here makes `valid` False
        # for over-the-end grid steps, so re-read data contributes nothing.
        base_step = (core * steps_per_core + step) * cells_per_grid_step

        def chunk_body(j, carry):
            (acc_xy, acc_wh, acc_obj, acc_noobj,
             acc_cls, acc_nobj, acc_nnoobj) = carry
            r0 = pl.multiple_of(j * 8, 8)

            def ld_p(b, ch):
                return p_ref[b, ch, pl.ds(r0, 8), :].astype(jnp.float32)

            def ld_l(ch):
                return lab_ref[ch, pl.ds(r0, 8), :]

            # ---- global cell index / grid coordinates (no meta DMA) ----
            g = base_step + j * 1024 + rows * 128 + lanes
            gf = g.astype(jnp.float32)
            # floor((x + 0.5) * (1/S)) == x // S exactly while n_total < 2^22
            # (asserted in the wrapper).
            q1 = jnp.floor((gf + 0.5) * inv_S)          # g // S
            cy = gf - q1 * float(S)                     # g % S
            q2 = jnp.floor((q1 + 0.5) * inv_S)          # g // S^2
            cx = q1 - q2 * float(S)                     # (g // S) % S
            valid = g < n_cells

            # ---- labels ----
            l_x = ld_l(0)
            l_y = ld_l(1)
            l_w = ld_l(2)
            l_h = ld_l(3)
            l_conf = ld_l(4)
            obj = valid & (l_conf == 1.0)
            noobj = valid & jnp.logical_not(l_conf == 1.0)

            lcx = l_x - 1e-16
            lcy = l_y - 1e-16
            lw = l_w - 1e-16
            lh = l_h - 1e-16
            lx1 = lcx - lw * 0.5
            lx2 = lcx + lw * 0.5
            ly1 = lcy - lh * 0.5
            ly2 = lcy + lh * 0.5
            area_l = (lx2 - lx1) * (ly2 - ly1)

            # ---- anchor loop: box decode + IoU + best-anchor selection ----
            best_iou = jnp.full(shape, -jnp.inf, jnp.float32)
            best_x = zeros
            best_y = zeros
            best_w = zeros
            best_h = zeros
            best_conf = zeros
            best_b = zeros
            conf_sum = zeros

            for b in range(B):
                tx = jax.nn.sigmoid(ld_p(b, 0))
                ty = jax.nn.sigmoid(ld_p(b, 1))
                tc = jax.nn.sigmoid(ld_p(b, 4))
                w = ANCHORS[b][2] * jnp.exp(ld_p(b, 2))
                h = ANCHORS[b][3] * jnp.exp(ld_p(b, 3))
                bx = (tx + cx) * inv_S
                by = (ty + cy) * inv_S
                conf_sum = conf_sum + tc

                # iou() adds 1e-14 to every predicted coord
                pcx = bx + 1e-14
                pcy = by + 1e-14
                pw = w + 1e-14
                ph = h + 1e-14
                px1 = pcx - pw * 0.5
                px2 = pcx + pw * 0.5
                py1 = pcy - ph * 0.5
                py2 = pcy + ph * 0.5
                area_p = (px2 - px1) * (py2 - py1)

                iw = jnp.maximum(jnp.minimum(px2, lx2) - jnp.maximum(px1, lx1), 0.0)
                ih = jnp.maximum(jnp.minimum(py2, ly2) - jnp.maximum(py1, ly1), 0.0)
                inter = iw * ih
                # exact divide so the strict-'>' first-argmax tie-break matches
                # the reference bit-for-bit
                cur_iou = inter / (area_p + area_l - inter)

                better = cur_iou > best_iou
                best_iou = jnp.where(better, cur_iou, best_iou)
                best_x = jnp.where(better, bx, best_x)
                best_y = jnp.where(better, by, best_y)
                best_w = jnp.where(better, w, best_w)
                best_h = jnp.where(better, h, best_h)
                best_conf = jnp.where(better, tc, best_conf)
                best_b = jnp.where(better, float(b), best_b)

            # ---- per-cell squared errors ----
            d_xy = (best_x - l_x) ** 2 + (best_y - l_y) ** 2
            sqrt_lw = jnp.sqrt(jnp.maximum(l_w, 0.0))
            sqrt_lh = jnp.sqrt(jnp.maximum(l_h, 0.0))
            d_wh = (jnp.sqrt(best_w) - sqrt_lw) ** 2 + (jnp.sqrt(best_h) - sqrt_lh) ** 2
            d_obj = (l_conf - best_conf) ** 2
            d_noobj = (conf_sum * inv_B - l_conf) ** 2

            # ---- class cross-entropy (soft targets) for the selected anchor --
            # Selection masks hoisted out of the class loop (computed once),
            # logits streamed through a small VMEM scratch (2-pass softmax-CE)
            # so C=20 logit vregs are never simultaneously live.
            sel_masks = [best_b == float(b) for b in range(1, B)]

            m = jnp.full(shape, -jnp.inf, jnp.float32)
            for c in range(C):
                v = ld_p(0, 5 + c)
                for bi in range(B - 1):
                    v = jnp.where(sel_masks[bi], ld_p(bi + 1, 5 + c), v)
                logit_scr[c] = v
                m = jnp.maximum(m, v)

            s = zeros
            dot = zeros
            tsum = zeros
            for c in range(C):
                z = logit_scr[c] - m
                t = ld_l(5 + c)
                s = s + jnp.exp(z)
                dot = dot + t * z
                tsum = tsum + t
            # -sum_c t_c*log_softmax_c == sum(t)*log(sum exp(z)) - sum t*z
            cls_loss = tsum * jnp.log(s) - dot

            # ---- NaN/inf-safe masked accumulation into carry vregs ----
            acc_xy = acc_xy + jnp.where(obj, d_xy, zeros)
            acc_wh = acc_wh + jnp.where(obj, d_wh, zeros)
            acc_obj = acc_obj + jnp.where(obj, d_obj, zeros)
            acc_noobj = acc_noobj + jnp.where(noobj, d_noobj, zeros)
            acc_cls = acc_cls + jnp.where(obj, cls_loss, zeros)
            acc_nobj = acc_nobj + obj.astype(jnp.float32)
            acc_nnoobj = acc_nnoobj + noobj.astype(jnp.float32)
            return (acc_xy, acc_wh, acc_obj, acc_noobj,
                    acc_cls, acc_nobj, acc_nnoobj)

        accs = lax.fori_loop(0, n_sub, chunk_body, (zeros,) * 7)

        # per-row accumulation (no jnp.stack / whole-block RMW)
        for i in range(7):
            out_ref[i] = out_ref[i] + accs[i]

    return kernel


@partial(jax.jit, static_argnames=(
    "S", "B", "C", "lambda_coord", "lambda_noobj", "lambda_class",
    "cells_per_step", "num_cores", "preds_bf16"))
def _yolov2_loss_jit(predictions, labels, *, S, B, C,
                     lambda_coord, lambda_noobj, lambda_class,
                     cells_per_step, num_cores, preds_bf16):
    batch = predictions.shape[0]
    D = 5 + C
    assert predictions.shape == (batch, S, S, B, D)
    assert labels.shape == (batch, S, S, D)
    assert cells_per_step % 1024 == 0 and cells_per_step >= 1024, \
        "cells_per_step must be a positive multiple of 8*128"

    n_cells = batch * S * S
    # validity of the float32 floor((g+0.5)/S) integer-div trick
    assert n_cells < (1 << 22), "too many cells for the f32 grid-index trick"

    nblk_data = -(-n_cells // 128)
    # adaptive sublane-tile height: big blocks for big inputs, but pad at most
    # one block for small inputs
    TSUB = min(cells_per_step // 128, ((nblk_data + 7) // 8) * 8)
    cells_per_chunk = TSUB * 128
    n_chunks_data = -(-n_cells // cells_per_chunk)
    n_total = n_chunks_data * cells_per_chunk

    num_cores_eff = max(1, min(num_cores, n_chunks_data))
    steps_per_core = -(-n_chunks_data // num_cores_eff)

    # ---- layout change (pad fused into the transpose copy under this jit) ----
    preds_flat = predictions.reshape(n_cells, B, D)
    labels_flat = labels.reshape(n_cells, D)
    n_pad = n_total - n_cells
    if n_pad:
        preds_flat = jnp.pad(preds_flat, ((0, n_pad), (0, 0), (0, 0)))
        labels_flat = jnp.pad(labels_flat, ((0, n_pad), (0, 0)))
    nblk = n_total // 128
    p_dt = jnp.bfloat16 if preds_bf16 else jnp.float32
    preds_cm = jnp.transpose(preds_flat, (1, 2, 0)).reshape(B, D, nblk, 128).astype(p_dt)
    labels_cm = jnp.transpose(labels_flat, (1, 0)).reshape(D, nblk, 128).astype(jnp.float32)

    last_chunk = n_chunks_data - 1

    def p_map(c, i):
        return (0, 0, jnp.minimum(c * steps_per_core + i, last_chunk), 0)

    def l_map(c, i):
        return (0, jnp.minimum(c * steps_per_core + i, last_chunk), 0)

    out = pl.pallas_call(
        _make_loss_kernel(S, B, C, TSUB, steps_per_core, n_cells),
        out_shape=jax.ShapeDtypeStruct((num_cores_eff * 7, 8, 128), jnp.float32),
        grid_spec=pltpu.PrefetchScalarGridSpec(
            num_scalar_prefetch=0,
            grid=(num_cores_eff, steps_per_core),
            in_specs=[
                pl.BlockSpec((B, D, TSUB, 128), p_map),
                pl.BlockSpec((D, TSUB, 128), l_map),
            ],
            out_specs=pl.BlockSpec((7, 8, 128), lambda c, i: (c, 0, 0)),
            scratch_shapes=[pltpu.VMEM((C, 8, 128), jnp.float32)],
        ),
        compiler_params=pltpu.CompilerParams(
            dimension_semantics=("parallel", "arbitrary")),
    )(preds_cm, labels_cm)

    # final cross-lane / cross-core reduction (7 tiny sums)
    sums = jnp.sum(out.reshape(num_cores_eff, 7, 8, 128), axis=(0, 2, 3))
    sum_xy, sum_wh, sum_objc, sum_noobj, sum_cls, n_obj, n_noobj = (
        sums[0], sums[1], sums[2], sums[3], sums[4], sums[5], sums[6])

    loss_xy = sum_xy / (2.0 * n_obj)
    loss_wh = sum_wh / (2.0 * n_obj)
    loss_obj_conf = sum_objc / n_obj
    loss_noobj_conf = sum_noobj / n_noobj
    loss_class = sum_cls / n_obj

    return (lambda_coord * (loss_xy + loss_wh)
            + loss_obj_conf + lambda_noobj * loss_noobj_conf
            + lambda_class * loss_class)


def yolov2_loss(predictions, labels, S, B, C,
                lambda_coord=5.0, lambda_noobj=0.5, lambda_class=1.0,
                cells_per_step=8192, num_cores=None, preds_bf16=False):
    if num_cores is None:
        num_cores = _default_num_cores()
    return _yolov2_loss_jit(
        predictions, labels,
        S=int(S), B=int(B), C=int(C),
        lambda_coord=float(lambda_coord), lambda_noobj=float(lambda_noobj),
        lambda_class=float(lambda_class),
        cells_per_step=int(cells_per_step), num_cores=int(num_cores),
        preds_bf16=bool(preds_bf16))


def ref_loss_np(predictions, labels, S, B, C,
                lambda_coord=5.0, lambda_noobj=0.5, lambda_class=1.0):
    """Plain numpy reference mirroring the PyTorch forward (boolean gathers)."""
    anchors = np.asarray(ANCHORS, dtype=np.float64)
    preds = np.asarray(predictions, dtype=np.float64)
    labs = np.asarray(labels, dtype=np.float64)

    obj_mask = labs[..., 4] == 1
    _, cxi, cyi = np.nonzero(obj_mask)
    obj_preds = preds[obj_mask].copy()          # (N, B, D)
    obj_labels = labs[obj_mask]
    noobj_preds = preds[~obj_mask]
    noobj_labels = labs[~obj_mask]
    N = obj_labels.shape[0]

    def sigm(x):
        return 1.0 / (1.0 + np.exp(-x))

    obj_preds[:, :, 0] = sigm(obj_preds[:, :, 0])
    obj_preds[:, :, 1] = sigm(obj_preds[:, :, 1])
    obj_preds[:, :, 4] = sigm(obj_preds[:, :, 4])
    obj_preds[:, :, 2] = anchors[None, :, 2] * np.exp(obj_preds[:, :, 2])
    obj_preds[:, :, 3] = anchors[None, :, 3] * np.exp(obj_preds[:, :, 3])
    obj_preds[:, :, 0] = (obj_preds[:, :, 0] + cxi[:, None]) / S
    obj_preds[:, :, 1] = (obj_preds[:, :, 1] + cyi[:, None]) / S
    noobj_conf = sigm(noobj_preds[:, :, 4])

    pb = obj_preds[:, :, :4] + 1e-14
    lb = obj_labels[:, :4] - 1e-16
    px1 = pb[..., 0] - pb[..., 2] / 2
    px2 = pb[..., 0] + pb[..., 2] / 2
    py1 = pb[..., 1] - pb[..., 3] / 2
    py2 = pb[..., 1] + pb[..., 3] / 2
    lx1 = lb[:, 0] - lb[:, 2] / 2
    lx2 = lb[:, 0] + lb[:, 2] / 2
    ly1 = lb[:, 1] - lb[:, 3] / 2
    ly2 = lb[:, 1] + lb[:, 3] / 2
    area_p = (px2 - px1) * (py2 - py1)
    area_l = ((lx2 - lx1) * (ly2 - ly1))[:, None]
    iw = np.clip(np.minimum(px2, lx2[:, None]) - np.maximum(px1, lx1[:, None]), 0, None)
    ih = np.clip(np.minimum(py2, ly2[:, None]) - np.maximum(py1, ly1[:, None]), 0, None)
    inter = iw * ih
    ious = inter / (area_p + area_l - inter)    # (N, B) == generalized diagonal

    best = np.argmax(ious, axis=1)
    best_boxes = obj_preds[np.arange(N), best]

    loss_xy = np.mean((best_boxes[:, :2] - obj_labels[:, :2]) ** 2)
    loss_wh = np.mean((np.sqrt(best_boxes[:, 2:4]) - np.sqrt(obj_labels[:, 2:4])) ** 2)
    loss_obj_conf = np.mean((obj_labels[:, 4] - best_boxes[:, 4]) ** 2)
    loss_noobj_conf = np.mean((noobj_conf.mean(axis=1) - noobj_labels[:, 4]) ** 2)
    logits = best_boxes[:, 5:]
    m = logits.max(axis=1, keepdims=True)
    log_sm = logits - m - np.log(np.exp(logits - m).sum(axis=1, keepdims=True))
    loss_class = np.mean(-(obj_labels[:, 5:] * log_sm).sum(axis=1))

    return (lambda_coord * (loss_xy + loss_wh)
            + loss_obj_conf + lambda_noobj * loss_noobj_conf
            + lambda_class * loss_class)


if __name__ == "__main__":
    # Small shapes consistent with the module: batch=2, grid S=4, B=5 anchors, C=20 classes.
    S, B, C, batch = 4, 5, 20, 2
    D = 5 + C

    key = jax.random.PRNGKey(0)
    k1, k2, k3, k4, k5 = jax.random.split(key, 5)

    preds = jax.random.normal(k1, (batch, S, S, B, D), jnp.float32) * 0.5

    conf = (jax.random.uniform(k2, (batch, S, S)) < 0.3).astype(jnp.float32)
    conf = conf.at[0, 0, 0].set(1.0)   # ensure at least one object cell
    conf = conf.at[0, 0, 1].set(0.0)   # ensure at least one no-object cell
    xy = jax.random.uniform(k3, (batch, S, S, 2), minval=0.05, maxval=0.95)
    wh = jax.random.uniform(k4, (batch, S, S, 2), minval=0.05, maxval=0.6)
    cls_idx = jax.random.randint(k5, (batch, S, S), 0, C)
    cls = jax.nn.one_hot(cls_idx, C, dtype=jnp.float32)
    labels = jnp.concatenate([xy, wh, conf[..., None], cls], axis=-1).astype(jnp.float32)

    loss = yolov2_loss(preds, labels, S, B, C)
    loss = jax.block_until_ready(loss)

    ref = ref_loss_np(np.asarray(preds), np.asarray(labels), S, B, C)
    assert np.isfinite(float(loss)), "kernel produced non-finite loss"
    np.testing.assert_allclose(float(loss), float(ref), rtol=2e-2, atol=2e-3)
    print("KERNEL_OK")
</pallas_src>

<mosaic_0001>
module attributes {stable_mosaic.version = 11 : i64} {
  func.func @kernel(%arg0: i32, %arg1: i32, %arg2: memref<5x25x8x128xf32, #tpu.memory_space<vmem>>, %arg3: memref<25x8x128xf32, #tpu.memory_space<vmem>>, %arg4: memref<7x8x128xf32, #tpu.memory_space<vmem>>, %arg5: memref<20x8x128xf32, #tpu.memory_space<vmem>>) attributes {dimension_semantics = [#tpu.dimension_semantics<parallel>, #tpu.dimension_semantics<arbitrary>], iteration_bounds = array<i64: 1, 1>, scalar_prefetch = 0 : i64, scratch_operands = 1 : i64, tpu.core_type = #tpu.core_type<tc>, window_params = [{transform_indices = @transform_0, window_bounds = array<i64: 5, 25, 8, 128>}, {transform_indices = @transform_1, window_bounds = array<i64: 25, 8, 128>}, {transform_indices = @transform_2, window_bounds = array<i64: 7, 8, 128>}]} {
    %c0_i32 = arith.constant 0 : i32
    %0 = arith.cmpi eq, %arg1, %c0_i32 : i32
    %1 = arith.extui %0 : i1 to i32
    %c0_i32_0 = arith.constant 0 : i32
    %2 = arith.cmpi ne, %1, %c0_i32_0 : i32
    scf.if %2 {
      %cst_682 = arith.constant 0.000000e+00 : f32
      %1301 = vector.broadcast %cst_682 : f32 to vector<7x8x128xf32>
      %c0_683 = arith.constant 0 : index
      %c0_684 = arith.constant 0 : index
      %c0_685 = arith.constant 0 : index
      %1302 = vector.load %arg4[%c0_683, %c0_684, %c0_685] : memref<7x8x128xf32, #tpu.memory_space<vmem>>, vector<7x8x128xf32>
      tpu.vector_store %arg4[%c0_683, %c0_684, %c0_685], %1301 {strides = array<i32>} : memref<7x8x128xf32, #tpu.memory_space<vmem>>, vector<7x8x128xf32>,
    } else {
    }
    %cst = arith.constant 0.000000e+00 : f32
    %3 = vector.broadcast %cst : f32 to vector<8x128xf32>
    %4 = tpu.iota {dimensions = array<i32: 0>} : vector<8x128xi32>
    %5 = tpu.iota {dimensions = array<i32: 1>} : vector<8x128xi32>
    %c1_i32 = arith.constant 1 : i32
    %6 = arith.muli %arg0, %c1_i32 : i32
    %7 = arith.addi %6, %arg1 : i32
    %c1024_i32 = arith.constant 1024 : i32
    %8 = arith.muli %7, %c1024_i32 : i32
    %c0_i32_1 = arith.constant 0 : i32
    %c8_i32 = arith.constant 8 : i32
    %9 = arith.muli %c0_i32_1, %c8_i32 : i32
    %10 = tpu.assume_multiple %9, 8 : i32
    %c1024_i32_2 = arith.constant 1024 : i32
    %11 = arith.muli %c0_i32_1, %c1024_i32_2 : i32
    %12 = arith.addi %8, %11 : i32
    %c128_i32 = arith.constant 128 : i32
    %13 = vector.broadcast %c128_i32 : i32 to vector<8x128xi32>
    %14 = arith.muli %4, %13 : vector<8x128xi32>
    %15 = vector.broadcast %12 : i32 to vector<8x128xi32>
    %16 = arith.addi %15, %14 : vector<8x128xi32>
    %17 = arith.addi %16, %5 : vector<8x128xi32>
    %18 = arith.sitofp %17 : vector<8x128xi32> to vector<8x128xf32>
    %cst_3 = arith.constant 5.000000e-01 : f32
    %19 = vector.broadcast %cst_3 : f32 to vector<8x128xf32>
    %20 = arith.addf %18, %19 : vector<8x128xf32>
    %cst_4 = arith.constant 2.500000e-01 : f32
    %21 = vector.broadcast %cst_4 : f32 to vector<8x128xf32>
    %22 = arith.mulf %20, %21 : vector<8x128xf32>
    %23 = math.floor %22 : vector<8x128xf32>
    %cst_5 = arith.constant 4.000000e+00 : f32
    %24 = vector.broadcast %cst_5 : f32 to vector<8x128xf32>
    %25 = arith.mulf %23, %24 : vector<8x128xf32>
    %26 = arith.subf %18, %25 : vector<8x128xf32>
    %cst_6 = arith.constant 5.000000e-01 : f32
    %27 = vector.broadcast %cst_6 : f32 to vector<8x128xf32>
    %28 = arith.addf %23, %27 : vector<8x128xf32>
    %cst_7 = arith.constant 2.500000e-01 : f32
    %29 = vector.broadcast %cst_7 : f32 to vector<8x128xf32>
    %30 = arith.mulf %28, %29 : vector<8x128xf32>
    %31 = math.floor %30 : vector<8x128xf32>
    %cst_8 = arith.constant 4.000000e+00 : f32
    %32 = vector.broadcast %cst_8 : f32 to vector<8x128xf32>
    %33 = arith.mulf %31, %32 : vector<8x128xf32>
    %34 = arith.subf %23, %33 : vector<8x128xf32>
    %c32_i32 = arith.constant 32 : i32
    %35 = vector.broadcast %c32_i32 : i32 to vector<8x128xi32>
    %36 = arith.cmpi slt, %17, %35 : vector<8x128xi32>
    %c0 = arith.constant 0 : index
    %37 = arith.index_cast %10 : i32 to index
    %c0_9 = arith.constant 0 : index
    %38 = vector.load %arg3[%c0, %37, %c0_9] : memref<25x8x128xf32, #tpu.memory_space<vmem>>, vector<1x8x128xf32>
    %39 = vector.shape_cast %38 : vector<1x8x128xf32> to vector<8x128xf32>
    %c1 = arith.constant 1 : index
    %40 = arith.index_cast %10 : i32 to index
    %c0_10 = arith.constant 0 : index
    %41 = vector.load %arg3[%c1, %40, %c0_10] : memref<25x8x128xf32, #tpu.memory_space<vmem>>, vector<1x8x128xf32>
    %42 = vector.shape_cast %41 : vector<1x8x128xf32> to vector<8x128xf32>
    %c2 = arith.constant 2 : index
    %43 = arith.index_cast %10 : i32 to index
    %c0_11 = arith.constant 0 : index
    %44 = vector.load %arg3[%c2, %43, %c0_11] : memref<25x8x128xf32, #tpu.memory_space<vmem>>, vector<1x8x128xf32>
    %45 = vector.shape_cast %44 : vector<1x8x128xf32> to vector<8x128xf32>
    %c3 = arith.constant 3 : index
    %46 = arith.index_cast %10 : i32 to index
    %c0_12 = arith.constant 0 : index
    %47 = vector.load %arg3[%c3, %46, %c0_12] : memref<25x8x128xf32, #tpu.memory_space<vmem>>, vector<1x8x128xf32>
    %48 = vector.shape_cast %47 : vector<1x8x128xf32> to vector<8x128xf32>
    %c4 = arith.constant 4 : index
    %49 = arith.index_cast %10 : i32 to index
    %c0_13 = arith.constant 0 : index
    %50 = vector.load %arg3[%c4, %49, %c0_13] : memref<25x8x128xf32, #tpu.memory_space<vmem>>, vector<1x8x128xf32>
    %51 = vector.shape_cast %50 : vector<1x8x128xf32> to vector<8x128xf32>
    %cst_14 = arith.constant 1.000000e+00 : f32
    %52 = vector.broadcast %cst_14 : f32 to vector<8x128xf32>
    %53 = arith.cmpf oeq, %51, %52 : vector<8x128xf32>
    %54 = arith.andi %36, %53 : vector<8x128xi1>
    %cst_15 = arith.constant 1.000000e+00 : f32
    %55 = vector.broadcast %cst_15 : f32 to vector<8x128xf32>
    %56 = arith.cmpf oeq, %51, %55 : vector<8x128xf32>
    %cst_16 = arith.constant dense<true> : vector<8x128xi1>
    %57 = arith.xori %56, %cst_16 : vector<8x128xi1>
    %58 = arith.andi %36, %57 : vector<8x128xi1>
    %cst_17 = arith.constant 1.000000e-16 : f32
    %59 = vector.broadcast %cst_17 : f32 to vector<8x128xf32>
    %60 = arith.subf %39, %59 : vector<8x128xf32>
    %cst_18 = arith.constant 1.000000e-16 : f32
    %61 = vector.broadcast %cst_18 : f32 to vector<8x128xf32>
    %62 = arith.subf %42, %61 : vector<8x128xf32>
    %cst_19 = arith.constant 1.000000e-16 : f32
    %63 = vector.broadcast %cst_19 : f32 to vector<8x128xf32>
    %64 = arith.subf %45, %63 : vector<8x128xf32>
    %cst_20 = arith.constant 1.000000e-16 : f32
    %65 = vector.broadcast %cst_20 : f32 to vector<8x128xf32>
    %66 = arith.subf %48, %65 : vector<8x128xf32>
    %cst_21 = arith.constant 5.000000e-01 : f32
    %67 = vector.broadcast %cst_21 : f32 to vector<8x128xf32>
    %68 = arith.mulf %64, %67 : vector<8x128xf32>
    %69 = arith.subf %60, %68 : vector<8x128xf32>
    %cst_22 = arith.constant 5.000000e-01 : f32
    %70 = vector.broadcast %cst_22 : f32 to vector<8x128xf32>
    %71 = arith.mulf %64, %70 : vector<8x128xf32>
    %72 = arith.addf %60, %71 : vector<8x128xf32>
    %cst_23 = arith.constant 5.000000e-01 : f32
    %73 = vector.broadcast %cst_23 : f32 to vector<8x128xf32>
    %74 = arith.mulf %66, %73 : vector<8x128xf32>
    %75 = arith.subf %62, %74 : vector<8x128xf32>
    %cst_24 = arith.constant 5.000000e-01 : f32
    %76 = vector.broadcast %cst_24 : f32 to vector<8x128xf32>
    %77 = arith.mulf %66, %76 : vector<8x128xf32>
    %78 = arith.addf %62, %77 : vector<8x128xf32>
    %79 = arith.subf %72, %69 : vector<8x128xf32>
    %80 = arith.subf %78, %75 : vector<8x128xf32>
    %81 = arith.mulf %79, %80 : vector<8x128xf32>
    %cst_25 = arith.constant 0xFF800000 : f32
    %82 = vector.broadcast %cst_25 : f32 to vector<8x128xf32>
    %c0_26 = arith.constant 0 : index
    %c0_27 = arith.constant 0 : index
    %83 = arith.index_cast %10 : i32 to index
    %c0_28 = arith.constant 0 : index
    %84 = vector.load %arg2[%c0_26, %c0_27, %83, %c0_28] : memref<5x25x8x128xf32, #tpu.memory_space<vmem>>, vector<1x1x8x128xf32>
    %85 = vector.shape_cast %84 : vector<1x1x8x128xf32> to vector<8x128xf32>
    %86 = arith.negf %85 : vector<8x128xf32>
    %87 = math.exp %86 : vector<8x128xf32>
    %cst_29 = arith.constant 1.000000e+00 : f32
    %88 = vector.broadcast %cst_29 : f32 to vector<8x128xf32>
    %89 = arith.addf %88, %87 : vector<8x128xf32>
    %90 = arith.divf %88, %89 : vector<8x128xf32>
    %c0_30 = arith.constant 0 : index
    %c1_31 = arith.constant 1 : index
    %91 = arith.index_cast %10 : i32 to index
    %c0_32 = arith.constant 0 : index
    %92 = vector.load %arg2[%c0_30, %c1_31, %91, %c0_32] : memref<5x25x8x128xf32, #tpu.memory_space<vmem>>, vector<1x1x8x128xf32>
    %93 = vector.shape_cast %92 : vector<1x1x8x128xf32> to vector<8x128xf32>
    %94 = arith.negf %93 : vector<8x128xf32>
    %95 = math.exp %94 : vector<8x128xf32>
    %cst_33 = arith.constant 1.000000e+00 : f32
    %96 = vector.broadcast %cst_33 : f32 to vector<8x128xf32>
    %97 = arith.addf %96, %95 : vector<8x128xf32>
    %98 = arith.divf %96, %97 : vector<8x128xf32>
    %c0_34 = arith.constant 0 : index
    %c4_35 = arith.constant 4 : index
    %99 = arith.index_cast %10 : i32 to index
    %c0_36 = arith.constant 0 : index
    %100 = vector.load %arg2[%c0_34, %c4_35, %99, %c0_36] : memref<5x25x8x128xf32, #tpu.memory_space<vmem>>, vector<1x1x8x128xf32>
    %101 = vector.shape_cast %100 : vector<1x1x8x128xf32> to vector<8x128xf32>
    %102 = arith.negf %101 : vector<8x128xf32>
    %103 = math.exp %102 : vector<8x128xf32>
    %cst_37 = arith.constant 1.000000e+00 : f32
    %104 = vector.broadcast %cst_37 : f32 to vector<8x128xf32>
    %105 = arith.addf %104, %103 : vector<8x128xf32>
    %106 = arith.divf %104, %105 : vector<8x128xf32>
    %c0_38 = arith.constant 0 : index
    %c2_39 = arith.constant 2 : index
    %107 = arith.index_cast %10 : i32 to index
    %c0_40 = arith.constant 0 : index
    %108 = vector.load %arg2[%c0_38, %c2_39, %107, %c0_40] : memref<5x25x8x128xf32, #tpu.memory_space<vmem>>, vector<1x1x8x128xf32>
    %109 = vector.shape_cast %108 : vector<1x1x8x128xf32> to vector<8x128xf32>
    %110 = math.exp %109 : vector<8x128xf32>
    %cst_41 = arith.constant 0.801047921 : f32
    %111 = vector.broadcast %cst_41 : f32 to vector<8x128xf32>
    %112 = arith.mulf %111, %110 : vector<8x128xf32>
    %c0_42 = arith.constant 0 : index
    %c3_43 = arith.constant 3 : index
    %113 = arith.index_cast %10 : i32 to index
    %c0_44 = arith.constant 0 : index
    %114 = vector.load %arg2[%c0_42, %c3_43, %113, %c0_44] : memref<5x25x8x128xf32, #tpu.memory_space<vmem>>, vector<1x1x8x128xf32>
    %115 = vector.shape_cast %114 : vector<1x1x8x128xf32> to vector<8x128xf32>
    %116 = math.exp %115 : vector<8x128xf32>
    %cst_45 = arith.constant 0.82689786 : f32
    %117 = vector.broadcast %cst_45 : f32 to vector<8x128xf32>
    %118 = arith.mulf %117, %116 : vector<8x128xf32>
    %119 = arith.addf %90, %34 : vector<8x128xf32>
    %cst_46 = arith.constant 2.500000e-01 : f32
    %120 = vector.broadcast %cst_46 : f32 to vector<8x128xf32>
    %121 = arith.mulf %119, %120 : vector<8x128xf32>
    %122 = arith.addf %98, %26 : vector<8x128xf32>
    %cst_47 = arith.constant 2.500000e-01 : f32
    %123 = vector.broadcast %cst_47 : f32 to vector<8x128xf32>
    %124 = arith.mulf %122, %123 : vector<8x128xf32>
    %125 = arith.addf %3, %106 : vector<8x128xf32>
    %cst_48 = arith.constant 9.99999982E-15 : f32
    %126 = vector.broadcast %cst_48 : f32 to vector<8x128xf32>
    %127 = arith.addf %121, %126 : vector<8x128xf32>
    %cst_49 = arith.constant 9.99999982E-15 : f32
    %128 = vector.broadcast %cst_49 : f32 to vector<8x128xf32>
    %129 = arith.addf %124, %128 : vector<8x128xf32>
    %cst_50 = arith.constant 9.99999982E-15 : f32
    %130 = vector.broadcast %cst_50 : f32 to vector<8x128xf32>
    %131 = arith.addf %112, %130 : vector<8x128xf32>
    %cst_51 = arith.constant 9.99999982E-15 : f32
    %132 = vector.broadcast %cst_51 : f32 to vector<8x128xf32>
    %133 = arith.addf %118, %132 : vector<8x128xf32>
    %cst_52 = arith.constant 5.000000e-01 : f32
    %134 = vector.broadcast %cst_52 : f32 to vector<8x128xf32>
    %135 = arith.mulf %131, %134 : vector<8x128xf32>
    %136 = arith.subf %127, %135 : vector<8x128xf32>
    %cst_53 = arith.constant 5.000000e-01 : f32
    %137 = vector.broadcast %cst_53 : f32 to vector<8x128xf32>
    %138 = arith.mulf %131, %137 : vector<8x128xf32>
    %139 = arith.addf %127, %138 : vector<8x128xf32>
    %cst_54 = arith.constant 5.000000e-01 : f32
    %140 = vector.broadcast %cst_54 : f32 to vector<8x128xf32>
    %141 = arith.mulf %133, %140 : vector<8x128xf32>
    %142 = arith.subf %129, %141 : vector<8x128xf32>
    %cst_55 = arith.constant 5.000000e-01 : f32
    %143 = vector.broadcast %cst_55 : f32 to vector<8x128xf32>
    %144 = arith.mulf %133, %143 : vector<8x128xf32>
    %145 = arith.addf %129, %144 : vector<8x128xf32>
    %146 = arith.subf %139, %136 : vector<8x128xf32>
    %147 = arith.subf %145, %142 : vector<8x128xf32>
    %148 = arith.mulf %146, %147 : vector<8x128xf32>
    %149 = arith.minimumf %139, %72 : vector<8x128xf32>
    %150 = arith.maximumf %136, %69 : vector<8x128xf32>
    %151 = arith.subf %149, %150 : vector<8x128xf32>
    %cst_56 = arith.constant 0.000000e+00 : f32
    %152 = vector.broadcast %cst_56 : f32 to vector<8x128xf32>
    %153 = arith.maximumf %151, %152 : vector<8x128xf32>
    %154 = arith.minimumf %145, %78 : vector<8x128xf32>
    %155 = arith.maximumf %142, %75 : vector<8x128xf32>
    %156 = arith.subf %154, %155 : vector<8x128xf32>
    %cst_57 = arith.constant 0.000000e+00 : f32
    %157 = vector.broadcast %cst_57 : f32 to vector<8x128xf32>
    %158 = arith.maximumf %156, %157 : vector<8x128xf32>
    %159 = arith.mulf %153, %158 : vector<8x128xf32>
    %160 = arith.addf %148, %81 : vector<8x128xf32>
    %161 = arith.subf %160, %159 : vector<8x128xf32>
    %162 = arith.divf %159, %161 : vector<8x128xf32>
    %163 = arith.cmpf ogt, %162, %82 : vector<8x128xf32>
    %164 = arith.select %163, %162, %82 : vector<8x128xi1>, vector<8x128xf32>
    %165 = arith.select %163, %121, %3 : vector<8x128xi1>, vector<8x128xf32>
    %166 = arith.select %163, %124, %3 : vector<8x128xi1>, vector<8x128xf32>
    %167 = arith.select %163, %112, %3 : vector<8x128xi1>, vector<8x128xf32>
    %168 = arith.select %163, %118, %3 : vector<8x128xi1>, vector<8x128xf32>
    %169 = arith.select %163, %106, %3 : vector<8x128xi1>, vector<8x128xf32>
    %cst_58 = arith.constant 0.000000e+00 : f32
    %170 = vector.broadcast %cst_58 : f32 to vector<8x128xf32>
    %171 = arith.select %163, %170, %3 : vector<8x128xi1>, vector<8x128xf32>
    %c1_59 = arith.constant 1 : index
    %c0_60 = arith.constant 0 : index
    %172 = arith.index_cast %10 : i32 to index
    %c0_61 = arith.constant 0 : index
    %173 = vector.load %arg2[%c1_59, %c0_60, %172, %c0_61] : memref<5x25x8x128xf32, #tpu.memory_space<vmem>>, vector<1x1x8x128xf32>
    %174 = vector.shape_cast %173 : vector<1x1x8x128xf32> to vector<8x128xf32>
    %175 = arith.negf %174 : vector<8x128xf32>
    %176 = math.exp %175 : vector<8x128xf32>
    %cst_62 = arith.constant 1.000000e+00 : f32
    %177 = vector.broadcast %cst_62 : f32 to vector<8x128xf32>
    %178 = arith.addf %177, %176 : vector<8x128xf32>
    %179 = arith.divf %177, %178 : vector<8x128xf32>
    %c1_63 = arith.constant 1 : index
    %c1_64 = arith.constant 1 : index
    %180 = arith.index_cast %10 : i32 to index
    %c0_65 = arith.constant 0 : index
    %181 = vector.load %arg2[%c1_63, %c1_64, %180, %c0_65] : memref<5x25x8x128xf32, #tpu.memory_space<vmem>>, vector<1x1x8x128xf32>
    %182 = vector.shape_cast %181 : vector<1x1x8x128xf32> to vector<8x128xf32>
    %183 = arith.negf %182 : vector<8x128xf32>
    %184 = math.exp %183 : vector<8x128xf32>
    %cst_66 = arith.constant 1.000000e+00 : f32
    %185 = vector.broadcast %cst_66 : f32 to vector<8x128xf32>
    %186 = arith.addf %185, %184 : vector<8x128xf32>
    %187 = arith.divf %185, %186 : vector<8x128xf32>
    %c1_67 = arith.constant 1 : index
    %c4_68 = arith.constant 4 : index
    %188 = arith.index_cast %10 : i32 to index
    %c0_69 = arith.constant 0 : index
    %189 = vector.load %arg2[%c1_67, %c4_68, %188, %c0_69] : memref<5x25x8x128xf32, #tpu.memory_space<vmem>>, vector<1x1x8x128xf32>
    %190 = vector.shape_cast %189 : vector<1x1x8x128xf32> to vector<8x128xf32>
    %191 = arith.negf %190 : vector<8x128xf32>
    %192 = math.exp %191 : vector<8x128xf32>
    %cst_70 = arith.constant 1.000000e+00 : f32
    %193 = vector.broadcast %cst_70 : f32 to vector<8x128xf32>
    %194 = arith.addf %193, %192 : vector<8x128xf32>
    %195 = arith.divf %193, %194 : vector<8x128xf32>
    %c1_71 = arith.constant 1 : index
    %c2_72 = arith.constant 2 : index
    %196 = arith.index_cast %10 : i32 to index
    %c0_73 = arith.constant 0 : index
    %197 = vector.load %arg2[%c1_71, %c2_72, %196, %c0_73] : memref<5x25x8x128xf32, #tpu.memory_space<vmem>>, vector<1x1x8x128xf32>
    %198 = vector.shape_cast %197 : vector<1x1x8x128xf32> to vector<8x128xf32>
    %199 = math.exp %198 : vector<8x128xf32>
    %cst_74 = arith.constant 0.640275359 : f32
    %200 = vector.broadcast %cst_74 : f32 to vector<8x128xf32>
    %201 = arith.mulf %200, %199 : vector<8x128xf32>
    %c1_75 = arith.constant 1 : index
    %c3_76 = arith.constant 3 : index
    %202 = arith.index_cast %10 : i32 to index
    %c0_77 = arith.constant 0 : index
    %203 = vector.load %arg2[%c1_75, %c3_76, %202, %c0_77] : memref<5x25x8x128xf32, #tpu.memory_space<vmem>>, vector<1x1x8x128xf32>
    %204 = vector.shape_cast %203 : vector<1x1x8x128xf32> to vector<8x128xf32>
    %205 = math.exp %204 : vector<8x128xf32>
    %cst_78 = arith.constant 0.406981021 : f32
    %206 = vector.broadcast %cst_78 : f32 to vector<8x128xf32>
    %207 = arith.mulf %206, %205 : vector<8x128xf32>
    %208 = arith.addf %179, %34 : vector<8x128xf32>
    %cst_79 = arith.constant 2.500000e-01 : f32
    %209 = vector.broadcast %cst_79 : f32 to vector<8x128xf32>
    %210 = arith.mulf %208, %209 : vector<8x128xf32>
    %211 = arith.addf %187, %26 : vector<8x128xf32>
    %cst_80 = arith.constant 2.500000e-01 : f32
    %212 = vector.broadcast %cst_80 : f32 to vector<8x128xf32>
    %213 = arith.mulf %211, %212 : vector<8x128xf32>
    %214 = arith.addf %125, %195 : vector<8x128xf32>
    %cst_81 = arith.constant 9.99999982E-15 : f32
    %215 = vector.broadcast %cst_81 : f32 to vector<8x128xf32>
    %216 = arith.addf %210, %215 : vector<8x128xf32>
    %cst_82 = arith.constant 9.99999982E-15 : f32
    %217 = vector.broadcast %cst_82 : f32 to vector<8x128xf32>
    %218 = arith.addf %213, %217 : vector<8x128xf32>
    %cst_83 = arith.constant 9.99999982E-15 : f32
    %219 = vector.broadcast %cst_83 : f32 to vector<8x128xf32>
    %220 = arith.addf %201, %219 : vector<8x128xf32>
    %cst_84 = arith.constant 9.99999982E-15 : f32
    %221 = vector.broadcast %cst_84 : f32 to vector<8x128xf32>
    %222 = arith.addf %207, %221 : vector<8x128xf32>
    %cst_85 = arith.constant 5.000000e-01 : f32
    %223 = vector.broadcast %cst_85 : f32 to vector<8x128xf32>
    %224 = arith.mulf %220, %223 : vector<8x128xf32>
    %225 = arith.subf %216, %224 : vector<8x128xf32>
    %cst_86 = arith.constant 5.000000e-01 : f32
    %226 = vector.broadcast %cst_86 : f32 to vector<8x128xf32>
    %227 = arith.mulf %220, %226 : vector<8x128xf32>
    %228 = arith.addf %216, %227 : vector<8x128xf32>
    %cst_87 = arith.constant 5.000000e-01 : f32
    %229 = vector.broadcast %cst_87 : f32 to vector<8x128xf32>
    %230 = arith.mulf %222, %229 : vector<8x128xf32>
    %231 = arith.subf %218, %230 : vector<8x128xf32>
    %cst_88 = arith.constant 5.000000e-01 : f32
    %232 = vector.broadcast %cst_88 : f32 to vector<8x128xf32>
    %233 = arith.mulf %222, %232 : vector<8x128xf32>
    %234 = arith.addf %218, %233 : vector<8x128xf32>
    %235 = arith.subf %228, %225 : vector<8x128xf32>
    %236 = arith.subf %234, %231 : vector<8x128xf32>
    %237 = arith.mulf %235, %236 : vector<8x128xf32>
    %238 = arith.minimumf %228, %72 : vector<8x128xf32>
    %239 = arith.maximumf %225, %69 : vector<8x128xf32>
    %240 = arith.subf %238, %239 : vector<8x128xf32>
    %cst_89 = arith.constant 0.000000e+00 : f32
    %241 = vector.broadcast %cst_89 : f32 to vector<8x128xf32>
    %242 = arith.maximumf %240, %241 : vector<8x128xf32>
    %243 = arith.minimumf %234, %78 : vector<8x128xf32>
    %244 = arith.maximumf %231, %75 : vector<8x128xf32>
    %245 = arith.subf %243, %244 : vector<8x128xf32>
    %cst_90 = arith.constant 0.000000e+00 : f32
    %246 = vector.broadcast %cst_90 : f32 to vector<8x128xf32>
    %247 = arith.maximumf %245, %246 : vector<8x128xf32>
    %248 = arith.mulf %242, %247 : vector<8x128xf32>
    %249 = arith.addf %237, %81 : vector<8x128xf32>
    %250 = arith.subf %249, %248 : vector<8x128xf32>
    %251 = arith.divf %248, %250 : vector<8x128xf32>
    %252 = arith.cmpf ogt, %251, %164 : vector<8x128xf32>
    %253 = arith.select %252, %251, %164 : vector<8x128xi1>, vector<8x128xf32>
    %254 = arith.select %252, %210, %165 : vector<8x128xi1>, vector<8x128xf32>
    %255 = arith.select %252, %213, %166 : vector<8x128xi1>, vector<8x128xf32>
    %256 = arith.select %252, %201, %167 : vector<8x128xi1>, vector<8x128xf32>
    %257 = arith.select %252, %207, %168 : vector<8x128xi1>, vector<8x128xf32>
    %258 = arith.select %252, %195, %169 : vector<8x128xi1>, vector<8x128xf32>
    %cst_91 = arith.constant 1.000000e+00 : f32
    %259 = vector.broadcast %cst_91 : f32 to vector<8x128xf32>
    %260 = arith.select %252, %259, %171 : vector<8x128xi1>, vector<8x128xf32>
    %c2_92 = arith.constant 2 : index
    %c0_93 = arith.constant 0 : index
    %261 = arith.index_cast %10 : i32 to index
    %c0_94 = arith.constant 0 : index
    %262 = vector.load %arg2[%c2_92, %c0_93, %261, %c0_94] : memref<5x25x8x128xf32, #tpu.memory_space<vmem>>, vector<1x1x8x128xf32>
    %263 = vector.shape_cast %262 : vector<1x1x8x128xf32> to vector<8x128xf32>
    %264 = arith.negf %263 : vector<8x128xf32>
    %265 = math.exp %264 : vector<8x128xf32>
    %cst_95 = arith.constant 1.000000e+00 : f32
    %266 = vector.broadcast %cst_95 : f32 to vector<8x128xf32>
    %267 = arith.addf %266, %265 : vector<8x128xf32>
    %268 = arith.divf %266, %267 : vector<8x128xf32>
    %c2_96 = arith.constant 2 : index
    %c1_97 = arith.constant 1 : index
    %269 = arith.index_cast %10 : i32 to index
    %c0_98 = arith.constant 0 : index
    %270 = vector.load %arg2[%c2_96, %c1_97, %269, %c0_98] : memref<5x25x8x128xf32, #tpu.memory_space<vmem>>, vector<1x1x8x128xf32>
    %271 = vector.shape_cast %270 : vector<1x1x8x128xf32> to vector<8x128xf32>
    %272 = arith.negf %271 : vector<8x128xf32>
    %273 = math.exp %272 : vector<8x128xf32>
    %cst_99 = arith.constant 1.000000e+00 : f32
    %274 = vector.broadcast %cst_99 : f32 to vector<8x128xf32>
    %275 = arith.addf %274, %273 : vector<8x128xf32>
    %276 = arith.divf %274, %275 : vector<8x128xf32>
    %c2_100 = arith.constant 2 : index
    %c4_101 = arith.constant 4 : index
    %277 = arith.index_cast %10 : i32 to index
    %c0_102 = arith.constant 0 : index
    %278 = vector.load %arg2[%c2_100, %c4_101, %277, %c0_102] : memref<5x25x8x128xf32, #tpu.memory_space<vmem>>, vector<1x1x8x128xf32>
    %279 = vector.shape_cast %278 : vector<1x1x8x128xf32> to vector<8x128xf32>
    %280 = arith.negf %279 : vector<8x128xf32>
    %281 = math.exp %280 : vector<8x128xf32>
    %cst_103 = arith.constant 1.000000e+00 : f32
    %282 = vector.broadcast %cst_103 : f32 to vector<8x128xf32>
    %283 = arith.addf %282, %281 : vector<8x128xf32>
    %284 = arith.divf %282, %283 : vector<8x128xf32>
    %c2_104 = arith.constant 2 : index
    %c2_105 = arith.constant 2 : index
    %285 = arith.index_cast %10 : i32 to index
    %c0_106 = arith.constant 0 : index
    %286 = vector.load %arg2[%c2_104, %c2_105, %285, %c0_106] : memref<5x25x8x128xf32, #tpu.memory_space<vmem>>, vector<1x1x8x128xf32>
    %287 = vector.shape_cast %286 : vector<1x1x8x128xf32> to vector<8x128xf32>
    %288 = math.exp %287 : vector<8x128xf32>
    %cst_107 = arith.constant 0.349608064 : f32
    %289 = vector.broadcast %cst_107 : f32 to vector<8x128xf32>
    %290 = arith.mulf %289, %288 : vector<8x128xf32>
    %c2_108 = arith.constant 2 : index
    %c3_109 = arith.constant 3 : index
    %291 = arith.index_cast %10 : i32 to index
    %c0_110 = arith.constant 0 : index
    %292 = vector.load %arg2[%c2_108, %c3_109, %291, %c0_110] : memref<5x25x8x128xf32, #tpu.memory_space<vmem>>, vector<1x1x8x128xf32>
    %293 = vector.shape_cast %292 : vector<1x1x8x128xf32> to vector<8x128xf32>
    %294 = math.exp %293 : vector<8x128xf32>
    %cst_111 = arith.constant 0.681978523 : f32
    %295 = vector.broadcast %cst_111 : f32 to vector<8x128xf32>
    %296 = arith.mulf %295, %294 : vector<8x128xf32>
    %297 = arith.addf %268, %34 : vector<8x128xf32>
    %cst_112 = arith.constant 2.500000e-01 : f32
    %298 = vector.broadcast %cst_112 : f32 to vector<8x128xf32>
    %299 = arith.mulf %297, %298 : vector<8x128xf32>
    %300 = arith.addf %276, %26 : vector<8x128xf32>
    %cst_113 = arith.constant 2.500000e-01 : f32
    %301 = vector.broadcast %cst_113 : f32 to vector<8x128xf32>
    %302 = arith.mulf %300, %301 : vector<8x128xf32>
    %303 = arith.addf %214, %284 : vector<8x128xf32>
    %cst_114 = arith.constant 9.99999982E-15 : f32
    %304 = vector.broadcast %cst_114 : f32 to vector<8x128xf32>
    %305 = arith.addf %299, %304 : vector<8x128xf32>
    %cst_115 = arith.constant 9.99999982E-15 : f32
    %306 = vector.broadcast %cst_115 : f32 to vector<8x128xf32>
    %307 = arith.addf %302, %306 : vector<8x128xf32>
    %cst_116 = arith.constant 9.99999982E-15 : f32
    %308 = vector.broadcast %cst_116 : f32 to vector<8x128xf32>
    %309 = arith.addf %290, %308 : vector<8x128xf32>
    %cst_117 = arith.constant 9.99999982E-15 : f32
    %310 = vector.broadcast %cst_117 : f32 to vector<8x128xf32>
    %311 = arith.addf %296, %310 : vector<8x128xf32>
    %cst_118 = arith.constant 5.000000e-01 : f32
    %312 = vector.broadcast %cst_118 : f32 to vector<8x128xf32>
    %313 = arith.mulf %309, %312 : vector<8x128xf32>
    %314 = arith.subf %305, %313 : vector<8x128xf32>
    %cst_119 = arith.constant 5.000000e-01 : f32
    %315 = vector.broadcast %cst_119 : f32 to vector<8x128xf32>
    %316 = arith.mulf %309, %315 : vector<8x128xf32>
    %317 = arith.addf %305, %316 : vector<8x128xf32>
    %cst_120 = arith.constant 5.000000e-01 : f32
    %318 = vector.broadcast %cst_120 : f32 to vector<8x128xf32>
    %319 = arith.mulf %311, %318 : vector<8x128xf32>
    %320 = arith.subf %307, %319 : vector<8x128xf32>
    %cst_121 = arith.constant 5.000000e-01 : f32
    %321 = vector.broadcast %cst_121 : f32 to vector<8x128xf32>
    %322 = arith.mulf %311, %321 : vector<8x128xf32>
    %323 = arith.addf %307, %322 : vector<8x128xf32>
    %324 = arith.subf %317, %314 : vector<8x128xf32>
    %325 = arith.subf %323, %320 : vector<8x128xf32>
    %326 = arith.mulf %324, %325 : vector<8x128xf32>
    %327 = arith.minimumf %317, %72 : vector<8x128xf32>
    %328 = arith.maximumf %314, %69 : vector<8x128xf32>
    %329 = arith.subf %327, %328 : vector<8x128xf32>
    %cst_122 = arith.constant 0.000000e+00 : f32
    %330 = vector.broadcast %cst_122 : f32 to vector<8x128xf32>
    %331 = arith.maximumf %329, %330 : vector<8x128xf32>
    %332 = arith.minimumf %323, %78 : vector<8x128xf32>
    %333 = arith.maximumf %320, %75 : vector<8x128xf32>
    %334 = arith.subf %332, %333 : vector<8x128xf32>
    %cst_123 = arith.constant 0.000000e+00 : f32
    %335 = vector.broadcast %cst_123 : f32 to vector<8x128xf32>
    %336 = arith.maximumf %334, %335 : vector<8x128xf32>
    %337 = arith.mulf %331, %336 : vector<8x128xf32>
    %338 = arith.addf %326, %81 : vector<8x128xf32>
    %339 = arith.subf %338, %337 : vector<8x128xf32>
    %340 = arith.divf %337, %339 : vector<8x128xf32>
    %341 = arith.cmpf ogt, %340, %253 : vector<8x128xf32>
    %342 = arith.select %341, %340, %253 : vector<8x128xi1>, vector<8x128xf32>
    %343 = arith.select %341, %299, %254 : vector<8x128xi1>, vector<8x128xf32>
    %344 = arith.select %341, %302, %255 : vector<8x128xi1>, vector<8x128xf32>
    %345 = arith.select %341, %290, %256 : vector<8x128xi1>, vector<8x128xf32>
    %346 = arith.select %341, %296, %257 : vector<8x128xi1>, vector<8x128xf32>
    %347 = arith.select %341, %284, %258 : vector<8x128xi1>, vector<8x128xf32>
    %cst_124 = arith.constant 2.000000e+00 : f32
    %348 = vector.broadcast %cst_124 : f32 to vector<8x128xf32>
    %349 = arith.select %341, %348, %260 : vector<8x128xi1>, vector<8x128xf32>
    %c3_125 = arith.constant 3 : index
    %c0_126 = arith.constant 0 : index
    %350 = arith.index_cast %10 : i32 to index
    %c0_127 = arith.constant 0 : index
    %351 = vector.load %arg2[%c3_125, %c0_126, %350, %c0_127] : memref<5x25x8x128xf32, #tpu.memory_space<vmem>>, vector<1x1x8x128xf32>
    %352 = vector.shape_cast %351 : vector<1x1x8x128xf32> to vector<8x128xf32>
    %353 = arith.negf %352 : vector<8x128xf32>
    %354 = math.exp %353 : vector<8x128xf32>
    %cst_128 = arith.constant 1.000000e+00 : f32
    %355 = vector.broadcast %cst_128 : f32 to vector<8x128xf32>
    %356 = arith.addf %355, %354 : vector<8x128xf32>
    %357 = arith.divf %355, %356 : vector<8x128xf32>
    %c3_129 = arith.constant 3 : index
    %c1_130 = arith.constant 1 : index
    %358 = arith.index_cast %10 : i32 to index
    %c0_131 = arith.constant 0 : index
    %359 = vector.load %arg2[%c3_129, %c1_130, %358, %c0_131] : memref<5x25x8x128xf32, #tpu.memory_space<vmem>>, vector<1x1x8x128xf32>
    %360 = vector.shape_cast %359 : vector<1x1x8x128xf32> to vector<8x128xf32>
    %361 = arith.negf %360 : vector<8x128xf32>
    %362 = math.exp %361 : vector<8x128xf32>
    %cst_132 = arith.constant 1.000000e+00 : f32
    %363 = vector.broadcast %cst_132 : f32 to vector<8x128xf32>
    %364 = arith.addf %363, %362 : vector<8x128xf32>
    %365 = arith.divf %363, %364 : vector<8x128xf32>
    %c3_133 = arith.constant 3 : index
    %c4_134 = arith.constant 4 : index
    %366 = arith.index_cast %10 : i32 to index
    %c0_135 = arith.constant 0 : index
    %367 = vector.load %arg2[%c3_133, %c4_134, %366, %c0_135] : memref<5x25x8x128xf32, #tpu.memory_space<vmem>>, vector<1x1x8x128xf32>
    %368 = vector.shape_cast %367 : vector<1x1x8x128xf32> to vector<8x128xf32>
    %369 = arith.negf %368 : vector<8x128xf32>
    %370 = math.exp %369 : vector<8x128xf32>
    %cst_136 = arith.constant 1.000000e+00 : f32
    %371 = vector.broadcast %cst_136 : f32 to vector<8x128xf32>
    %372 = arith.addf %371, %370 : vector<8x128xf32>
    %373 = arith.divf %371, %372 : vector<8x128xf32>
    %c3_137 = arith.constant 3 : index
    %c2_138 = arith.constant 2 : index
    %374 = arith.index_cast %10 : i32 to index
    %c0_139 = arith.constant 0 : index
    %375 = vector.load %arg2[%c3_137, %c2_138, %374, %c0_139] : memref<5x25x8x128xf32, #tpu.memory_space<vmem>>, vector<1x1x8x128xf32>
    %376 = vector.shape_cast %375 : vector<1x1x8x128xf32> to vector<8x128xf32>
    %377 = math.exp %376 : vector<8x128xf32>
    %cst_140 = arith.constant 0.0876114889 : f32
    %378 = vector.broadcast %cst_140 : f32 to vector<8x128xf32>
    %379 = arith.mulf %378, %377 : vector<8x128xf32>
    %c3_141 = arith.constant 3 : index
    %c3_142 = arith.constant 3 : index
    %380 = arith.index_cast %10 : i32 to index
    %c0_143 = arith.constant 0 : index
    %381 = vector.load %arg2[%c3_141, %c3_142, %380, %c0_143] : memref<5x25x8x128xf32, #tpu.memory_space<vmem>>, vector<1x1x8x128xf32>
    %382 = vector.shape_cast %381 : vector<1x1x8x128xf32> to vector<8x128xf32>
    %383 = math.exp %382 : vector<8x128xf32>
    %cst_144 = arith.constant 0.133040234 : f32
    %384 = vector.broadcast %cst_144 : f32 to vector<8x128xf32>
    %385 = arith.mulf %384, %383 : vector<8x128xf32>
    %386 = arith.addf %357, %34 : vector<8x128xf32>
    %cst_145 = arith.constant 2.500000e-01 : f32
    %387 = vector.broadcast %cst_145 : f32 to vector<8x128xf32>
    %388 = arith.mulf %386, %387 : vector<8x128xf32>
    %389 = arith.addf %365, %26 : vector<8x128xf32>
    %cst_146 = arith.constant 2.500000e-01 : f32
    %390 = vector.broadcast %cst_146 : f32 to vector<8x128xf32>
    %391 = arith.mulf %389, %390 : vector<8x128xf32>
    %392 = arith.addf %303, %373 : vector<8x128xf32>
    %cst_147 = arith.constant 9.99999982E-15 : f32
    %393 = vector.broadcast %cst_147 : f32 to vector<8x128xf32>
    %394 = arith.addf %388, %393 : vector<8x128xf32>
    %cst_148 = arith.constant 9.99999982E-15 : f32
    %395 = vector.broadcast %cst_148 : f32 to vector<8x128xf32>
    %396 = arith.addf %391, %395 : vector<8x128xf32>
    %cst_149 = arith.constant 9.99999982E-15 : f32
    %397 = vector.broadcast %cst_149 : f32 to vector<8x128xf32>
    %398 = arith.addf %379, %397 : vector<8x128xf32>
    %cst_150 = arith.constant 9.99999982E-15 : f32
    %399 = vector.broadcast %cst_150 : f32 to vector<8x128xf32>
    %400 = arith.addf %385, %399 : vector<8x128xf32>
    %cst_151 = arith.constant 5.000000e-01 : f32
    %401 = vector.broadcast %cst_151 : f32 to vector<8x128xf32>
    %402 = arith.mulf %398, %401 : vector<8x128xf32>
    %403 = arith.subf %394, %402 : vector<8x128xf32>
    %cst_152 = arith.constant 5.000000e-01 : f32
    %404 = vector.broadcast %cst_152 : f32 to vector<8x128xf32>
    %405 = arith.mulf %398, %404 : vector<8x128xf32>
    %406 = arith.addf %394, %405 : vector<8x128xf32>
    %cst_153 = arith.constant 5.000000e-01 : f32
    %407 = vector.broadcast %cst_153 : f32 to vector<8x128xf32>
    %408 = arith.mulf %400, %407 : vector<8x128xf32>
    %409 = arith.subf %396, %408 : vector<8x128xf32>
    %cst_154 = arith.constant 5.000000e-01 : f32
    %410 = vector.broadcast %cst_154 : f32 to vector<8x128xf32>
    %411 = arith.mulf %400, %410 : vector<8x128xf32>
    %412 = arith.addf %396, %411 : vector<8x128xf32>
    %413 = arith.subf %406, %403 : vector<8x128xf32>
    %414 = arith.subf %412, %409 : vector<8x128xf32>
    %415 = arith.mulf %413, %414 : vector<8x128xf32>
    %416 = arith.minimumf %406, %72 : vector<8x128xf32>
    %417 = arith.maximumf %403, %69 : vector<8x128xf32>
    %418 = arith.subf %416, %417 : vector<8x128xf32>
    %cst_155 = arith.constant 0.000000e+00 : f32
    %419 = vector.broadcast %cst_155 : f32 to vector<8x128xf32>
    %420 = arith.maximumf %418, %419 : vector<8x128xf32>
    %421 = arith.minimumf %412, %78 : vector<8x128xf32>
    %422 = arith.maximumf %409, %75 : vector<8x128xf32>
    %423 = arith.subf %421, %422 : vector<8x128xf32>
    %cst_156 = arith.constant 0.000000e+00 : f32
    %424 = vector.broadcast %cst_156 : f32 to vector<8x128xf32>
    %425 = arith.maximumf %423, %424 : vector<8x128xf32>
    %426 = arith.mulf %420, %425 : vector<8x128xf32>
    %427 = arith.addf %415, %81 : vector<8x128xf32>
    %428 = arith.subf %427, %426 : vector<8x128xf32>
    %429 = arith.divf %426, %428 : vector<8x128xf32>
    %430 = arith.cmpf ogt, %429, %342 : vector<8x128xf32>
    %431 = arith.select %430, %429, %342 : vector<8x128xi1>, vector<8x128xf32>
    %432 = arith.select %430, %388, %343 : vector<8x128xi1>, vector<8x128xf32>
    %433 = arith.select %430, %391, %344 : vector<8x128xi1>, vector<8x128xf32>
    %434 = arith.select %430, %379, %345 : vector<8x128xi1>, vector<8x128xf32>
    %435 = arith.select %430, %385, %346 : vector<8x128xi1>, vector<8x128xf32>
    %436 = arith.select %430, %373, %347 : vector<8x128xi1>, vector<8x128xf32>
    %cst_157 = arith.constant 3.000000e+00 : f32
    %437 = vector.broadcast %cst_157 : f32 to vector<8x128xf32>
    %438 = arith.select %430, %437, %349 : vector<8x128xi1>, vector<8x128xf32>
    %c4_158 = arith.constant 4 : index
    %c0_159 = arith.constant 0 : index
    %439 = arith.index_cast %10 : i32 to index
    %c0_160 = arith.constant 0 : index
    %440 = vector.load %arg2[%c4_158, %c0_159, %439, %c0_160] : memref<5x25x8x128xf32, #tpu.memory_space<vmem>>, vector<1x1x8x128xf32>
    %441 = vector.shape_cast %440 : vector<1x1x8x128xf32> to vector<8x128xf32>
    %442 = arith.negf %441 : vector<8x128xf32>
    %443 = math.exp %442 : vector<8x128xf32>
    %cst_161 = arith.constant 1.000000e+00 : f32
    %444 = vector.broadcast %cst_161 : f32 to vector<8x128xf32>
    %445 = arith.addf %444, %443 : vector<8x128xf32>
    %446 = arith.divf %444, %445 : vector<8x128xf32>
    %c4_162 = arith.constant 4 : index
    %c1_163 = arith.constant 1 : index
    %447 = arith.index_cast %10 : i32 to index
    %c0_164 = arith.constant 0 : index
    %448 = vector.load %arg2[%c4_162, %c1_163, %447, %c0_164] : memref<5x25x8x128xf32, #tpu.memory_space<vmem>>, vector<1x1x8x128xf32>
    %449 = vector.shape_cast %448 : vector<1x1x8x128xf32> to vector<8x128xf32>
    %450 = arith.negf %449 : vector<8x128xf32>
    %451 = math.exp %450 : vector<8x128xf32>
    %cst_165 = arith.constant 1.000000e+00 : f32
    %452 = vector.broadcast %cst_165 : f32 to vector<8x128xf32>
    %453 = arith.addf %452, %451 : vector<8x128xf32>
    %454 = arith.divf %452, %453 : vector<8x128xf32>
    %c4_166 = arith.constant 4 : index
    %c4_167 = arith.constant 4 : index
    %455 = arith.index_cast %10 : i32 to index
    %c0_168 = arith.constant 0 : index
    %456 = vector.load %arg2[%c4_166, %c4_167, %455, %c0_168] : memref<5x25x8x128xf32, #tpu.memory_space<vmem>>, vector<1x1x8x128xf32>
    %457 = vector.shape_cast %456 : vector<1x1x8x128xf32> to vector<8x128xf32>
    %458 = arith.negf %457 : vector<8x128xf32>
    %459 = math.exp %458 : vector<8x128xf32>
    %cst_169 = arith.constant 1.000000e+00 : f32
    %460 = vector.broadcast %cst_169 : f32 to vector<8x128xf32>
    %461 = arith.addf %460, %459 : vector<8x128xf32>
    %462 = arith.divf %460, %461 : vector<8x128xf32>
    %c4_170 = arith.constant 4 : index
    %c2_171 = arith.constant 2 : index
    %463 = arith.index_cast %10 : i32 to index
    %c0_172 = arith.constant 0 : index
    %464 = vector.load %arg2[%c4_170, %c2_171, %463, %c0_172] : memref<5x25x8x128xf32, #tpu.memory_space<vmem>>, vector<1x1x8x128xf32>
    %465 = vector.shape_cast %464 : vector<1x1x8x128xf32> to vector<8x128xf32>
    %466 = math.exp %465 : vector<8x128xf32>
    %cst_173 = arith.constant 0.212453559 : f32
    %467 = vector.broadcast %cst_173 : f32 to vector<8x128xf32>
    %468 = arith.mulf %467, %466 : vector<8x128xf32>
    %c4_174 = arith.constant 4 : index
    %c3_175 = arith.constant 3 : index
    %469 = arith.index_cast %10 : i32 to index
    %c0_176 = arith.constant 0 : index
    %470 = vector.load %arg2[%c4_174, %c3_175, %469, %c0_176] : memref<5x25x8x128xf32, #tpu.memory_space<vmem>>, vector<1x1x8x128xf32>
    %471 = vector.shape_cast %470 : vector<1x1x8x128xf32> to vector<8x128xf32>
    %472 = math.exp %471 : vector<8x128xf32>
    %cst_177 = arith.constant 0.343299568 : f32
    %473 = vector.broadcast %cst_177 : f32 to vector<8x128xf32>
    %474 = arith.mulf %473, %472 : vector<8x128xf32>
    %475 = arith.addf %446, %34 : vector<8x128xf32>
    %cst_178 = arith.constant 2.500000e-01 : f32
    %476 = vector.broadcast %cst_178 : f32 to vector<8x128xf32>
    %477 = arith.mulf %475, %476 : vector<8x128xf32>
    %478 = arith.addf %454, %26 : vector<8x128xf32>
    %cst_179 = arith.constant 2.500000e-01 : f32
    %479 = vector.broadcast %cst_179 : f32 to vector<8x128xf32>
    %480 = arith.mulf %478, %479 : vector<8x128xf32>
    %481 = arith.addf %392, %462 : vector<8x128xf32>
    %cst_180 = arith.constant 9.99999982E-15 : f32
    %482 = vector.broadcast %cst_180 : f32 to vector<8x128xf32>
    %483 = arith.addf %477, %482 : vector<8x128xf32>
    %cst_181 = arith.constant 9.99999982E-15 : f32
    %484 = vector.broadcast %cst_181 : f32 to vector<8x128xf32>
    %485 = arith.addf %480, %484 : vector<8x128xf32>
    %cst_182 = arith.constant 9.99999982E-15 : f32
    %486 = vector.broadcast %cst_182 : f32 to vector<8x128xf32>
    %487 = arith.addf %468, %486 : vector<8x128xf32>
    %cst_183 = arith.constant 9.99999982E-15 : f32
    %488 = vector.broadcast %cst_183 : f32 to vector<8x128xf32>
    %489 = arith.addf %474, %488 : vector<8x128xf32>
    %cst_184 = arith.constant 5.000000e-01 : f32
    %490 = vector.broadcast %cst_184 : f32 to vector<8x128xf32>
    %491 = arith.mulf %487, %490 : vector<8x128xf32>
    %492 = arith.subf %483, %491 : vector<8x128xf32>
    %cst_185 = arith.constant 5.000000e-01 : f32
    %493 = vector.broadcast %cst_185 : f32 to vector<8x128xf32>
    %494 = arith.mulf %487, %493 : vector<8x128xf32>
    %495 = arith.addf %483, %494 : vector<8x128xf32>
    %cst_186 = arith.constant 5.000000e-01 : f32
    %496 = vector.broadcast %cst_186 : f32 to vector<8x128xf32>
    %497 = arith.mulf %489, %496 : vector<8x128xf32>
    %498 = arith.subf %485, %497 : vector<8x128xf32>
    %cst_187 = arith.constant 5.000000e-01 : f32
    %499 = vector.broadcast %cst_187 : f32 to vector<8x128xf32>
    %500 = arith.mulf %489, %499 : vector<8x128xf32>
    %501 = arith.addf %485, %500 : vector<8x128xf32>
    %502 = arith.subf %495, %492 : vector<8x128xf32>
    %503 = arith.subf %501, %498 : vector<8x128xf32>
    %504 = arith.mulf %502, %503 : vector<8x128xf32>
    %505 = arith.minimumf %495, %72 : vector<8x128xf32>
    %506 = arith.maximumf %492, %69 : vector<8x128xf32>
    %507 = arith.subf %505, %506 : vector<8x128xf32>
    %cst_188 = arith.constant 0.000000e+00 : f32
    %508 = vector.broadcast %cst_188 : f32 to vector<8x128xf32>
    %509 = arith.maximumf %507, %508 : vector<8x128xf32>
    %510 = arith.minimumf %501, %78 : vector<8x128xf32>
    %511 = arith.maximumf %498, %75 : vector<8x128xf32>
    %512 = arith.subf %510, %511 : vector<8x128xf32>
    %cst_189 = arith.constant 0.000000e+00 : f32
    %513 = vector.broadcast %cst_189 : f32 to vector<8x128xf32>
    %514 = arith.maximumf %512, %513 : vector<8x128xf32>
    %515 = arith.mulf %509, %514 : vector<8x128xf32>
    %516 = arith.addf %504, %81 : vector<8x128xf32>
    %517 = arith.subf %516, %515 : vector<8x128xf32>
    %518 = arith.divf %515, %517 : vector<8x128xf32>
    %519 = arith.cmpf ogt, %518, %431 : vector<8x128xf32>
    %520 = arith.select %519, %477, %432 : vector<8x128xi1>, vector<8x128xf32>
    %521 = arith.select %519, %480, %433 : vector<8x128xi1>, vector<8x128xf32>
    %522 = arith.select %519, %468, %434 : vector<8x128xi1>, vector<8x128xf32>
    %523 = arith.select %519, %474, %435 : vector<8x128xi1>, vector<8x128xf32>
    %524 = arith.select %519, %462, %436 : vector<8x128xi1>, vector<8x128xf32>
    %cst_190 = arith.constant 4.000000e+00 : f32
    %525 = vector.broadcast %cst_190 : f32 to vector<8x128xf32>
    %526 = arith.select %519, %525, %438 : vector<8x128xi1>, vector<8x128xf32>
    %527 = arith.subf %520, %39 : vector<8x128xf32>
    %528 = arith.mulf %527, %527 : vector<8x128xf32>
    %529 = arith.subf %521, %42 : vector<8x128xf32>
    %530 = arith.mulf %529, %529 : vector<8x128xf32>
    %531 = arith.addf %528, %530 : vector<8x128xf32>
    %cst_191 = arith.constant 0.000000e+00 : f32
    %532 = vector.broadcast %cst_191 : f32 to vector<8x128xf32>
    %533 = arith.maximumf %45, %532 : vector<8x128xf32>
    %534 = math.sqrt %533 : vector<8x128xf32>
    %cst_192 = arith.constant 0.000000e+00 : f32
    %535 = vector.broadcast %cst_192 : f32 to vector<8x128xf32>
    %536 = arith.maximumf %48, %535 : vector<8x128xf32>
    %537 = math.sqrt %536 : vector<8x128xf32>
    %538 = math.sqrt %522 : vector<8x128xf32>
    %539 = arith.subf %538, %534 : vector<8x128xf32>
    %540 = arith.mulf %539, %539 : vector<8x128xf32>
    %541 = math.sqrt %523 : vector<8x128xf32>
    %542 = arith.subf %541, %537 : vector<8x128xf32>
    %543 = arith.mulf %542, %542 : vector<8x128xf32>
    %544 = arith.addf %540, %543 : vector<8x128xf32>
    %545 = arith.subf %51, %524 : vector<8x128xf32>
    %546 = arith.mulf %545, %545 : vector<8x128xf32>
    %cst_193 = arith.constant 2.000000e-01 : f32
    %547 = vector.broadcast %cst_193 : f32 to vector<8x128xf32>
    %548 = arith.mulf %481, %547 : vector<8x128xf32>
    %549 = arith.subf %548, %51 : vector<8x128xf32>
    %550 = arith.mulf %549, %549 : vector<8x128xf32>
    %cst_194 = arith.constant 1.000000e+00 : f32
    %551 = vector.broadcast %cst_194 : f32 to vector<8x128xf32>
    %552 = arith.cmpf oeq, %526, %551 : vector<8x128xf32>
    %cst_195 = arith.constant 2.000000e+00 : f32
    %553 = vector.broadcast %cst_195 : f32 to vector<8x128xf32>
    %554 = arith.cmpf oeq, %526, %553 : vector<8x128xf32>
    %cst_196 = arith.constant 3.000000e+00 : f32
    %555 = vector.broadcast %cst_196 : f32 to vector<8x128xf32>
    %556 = arith.cmpf oeq, %526, %555 : vector<8x128xf32>
    %cst_197 = arith.constant 4.000000e+00 : f32
    %557 = vector.broadcast %cst_197 : f32 to vector<8x128xf32>
    %558 = arith.cmpf oeq, %526, %557 : vector<8x128xf32>
    %cst_198 = arith.constant 0xFF800000 : f32
    %559 = vector.broadcast %cst_198 : f32 to vector<8x128xf32>
    %c0_199 = arith.constant 0 : index
    %c5 = arith.constant 5 : index
    %560 = arith.index_cast %10 : i32 to index
    %c0_200 = arith.constant 0 : index
    %561 = vector.load %arg2[%c0_199, %c5, %560, %c0_200] : memref<5x25x8x128xf32, #tpu.memory_space<vmem>>, vector<1x1x8x128xf32>
    %562 = vector.shape_cast %561 : vector<1x1x8x128xf32> to vector<8x128xf32>
    %c1_201 = arith.constant 1 : index
    %c5_202 = arith.constant 5 : index
    %563 = arith.index_cast %10 : i32 to index
    %c0_203 = arith.constant 0 : index
    %564 = vector.load %arg2[%c1_201, %c5_202, %563, %c0_203] : memref<5x25x8x128xf32, #tpu.memory_space<vmem>>, vector<1x1x8x128xf32>
    %565 = vector.shape_cast %564 : vector<1x1x8x128xf32> to vector<8x128xf32>
    %566 = arith.select %552, %565, %562 : vector<8x128xi1>, vector<8x128xf32>
    %c2_204 = arith.constant 2 : index
    %c5_205 = arith.constant 5 : index
    %567 = arith.index_cast %10 : i32 to index
    %c0_206 = arith.constant 0 : index
    %568 = vector.load %arg2[%c2_204, %c5_205, %567, %c0_206] : memref<5x25x8x128xf32, #tpu.memory_space<vmem>>, vector<1x1x8x128xf32>
    %569 = vector.shape_cast %568 : vector<1x1x8x128xf32> to vector<8x128xf32>
    %570 = arith.select %554, %569, %566 : vector<8x128xi1>, vector<8x128xf32>
    %c3_207 = arith.constant 3 : index
    %c5_208 = arith.constant 5 : index
    %571 = arith.index_cast %10 : i32 to index
    %c0_209 = arith.constant 0 : index
    %572 = vector.load %arg2[%c3_207, %c5_208, %571, %c0_209] : memref<5x25x8x128xf32, #tpu.memory_space<vmem>>, vector<1x1x8x128xf32>
    %573 = vector.shape_cast %572 : vector<1x1x8x128xf32> to vector<8x128xf32>
    %574 = arith.select %556, %573, %570 : vector<8x128xi1>, vector<8x128xf32>
    %c4_210 = arith.constant 4 : index
    %c5_211 = arith.constant 5 : index
    %575 = arith.index_cast %10 : i32 to index
    %c0_212 = arith.constant 0 : index
    %576 = vector.load %arg2[%c4_210, %c5_211, %575, %c0_212] : memref<5x25x8x128xf32, #tpu.memory_space<vmem>>, vector<1x1x8x128xf32>
    %577 = vector.shape_cast %576 : vector<1x1x8x128xf32> to vector<8x128xf32>
    %578 = arith.select %558, %577, %574 : vector<8x128xi1>, vector<8x128xf32>
    %c0_213 = arith.constant 0 : index
    %c0_214 = arith.constant 0 : index
    %c0_215 = arith.constant 0 : index
    %579 = vector.load %arg5[%c0_213, %c0_214, %c0_215] : memref<20x8x128xf32, #tpu.memory_space<vmem>>, vector<1x8x128xf32>
    %580 = vector.shape_cast %579 : vector<1x8x128xf32> to vector<8x128xf32>
    %581 = vector.shape_cast %578 : vector<8x128xf32> to vector<1x8x128xf32>
    tpu.vector_store %arg5[%c0_213, %c0_214, %c0_215], %581 {strides = array<i32>} : memref<20x8x128xf32, #tpu.memory_space<vmem>>, vector<1x8x128xf32>,
    %582 = arith.maximumf %559, %578 : vector<8x128xf32>
    %c0_216 = arith.constant 0 : index
    %c6 = arith.constant 6 : index
    %583 = arith.index_cast %10 : i32 to index
    %c0_217 = arith.constant 0 : index
    %584 = vector.load %arg2[%c0_216, %c6, %583, %c0_217] : memref<5x25x8x128xf32, #tpu.memory_space<vmem>>, vector<1x1x8x128xf32>
    %585 = vector.shape_cast %584 : vector<1x1x8x128xf32> to vector<8x128xf32>
    %c1_218 = arith.constant 1 : index
    %c6_219 = arith.constant 6 : index
    %586 = arith.index_cast %10 : i32 to index
    %c0_220 = arith.constant 0 : index
    %587 = vector.load %arg2[%c1_218, %c6_219, %586, %c0_220] : memref<5x25x8x128xf32, #tpu.memory_space<vmem>>, vector<1x1x8x128xf32>
    %588 = vector.shape_cast %587 : vector<1x1x8x128xf32> to vector<8x128xf32>
    %589 = arith.select %552, %588, %585 : vector<8x128xi1>, vector<8x128xf32>
    %c2_221 = arith.constant 2 : index
    %c6_222 = arith.constant 6 : index
    %590 = arith.index_cast %10 : i32 to index
    %c0_223 = arith.constant 0 : index
    %591 = vector.load %arg2[%c2_221, %c6_222, %590, %c0_223] : memref<5x25x8x128xf32, #tpu.memory_space<vmem>>, vector<1x1x8x128xf32>
    %592 = vector.shape_cast %591 : vector<1x1x8x128xf32> to vector<8x128xf32>
    %593 = arith.select %554, %592, %589 : vector<8x128xi1>, vector<8x128xf32>
    %c3_224 = arith.constant 3 : index
    %c6_225 = arith.constant 6 : index
    %594 = arith.index_cast %10 : i32 to index
    %c0_226 = arith.constant 0 : index
    %595 = vector.load %arg2[%c3_224, %c6_225, %594, %c0_226] : memref<5x25x8x128xf32, #tpu.memory_space<vmem>>, vector<1x1x8x128xf32>
    %596 = vector.shape_cast %595 : vector<1x1x8x128xf32> to vector<8x128xf32>
    %597 = arith.select %556, %596, %593 : vector<8x128xi1>, vector<8x128xf32>
    %c4_227 = arith.constant 4 : index
    %c6_228 = arith.constant 6 : index
    %598 = arith.index_cast %10 : i32 to index
    %c0_229 = arith.constant 0 : index
    %599 = vector.load %arg2[%c4_227, %c6_228, %598, %c0_229] : memref<5x25x8x128xf32, #tpu.memory_space<vmem>>, vector<1x1x8x128xf32>
    %600 = vector.shape_cast %599 : vector<1x1x8x128xf32> to vector<8x128xf32>
    %601 = arith.select %558, %600, %597 : vector<8x128xi1>, vector<8x128xf32>
    %c1_230 = arith.constant 1 : index
    %c0_231 = arith.constant 0 : index
    %c0_232 = arith.constant 0 : index
    %602 = vector.load %arg5[%c1_230, %c0_231, %c0_232] : memref<20x8x128xf32, #tpu.memory_space<vmem>>, vector<1x8x128xf32>
    %603 = vector.shape_cast %602 : vector<1x8x128xf32> to vector<8x128xf32>
    %604 = vector.shape_cast %601 : vector<8x128xf32> to vector<1x8x128xf32>
    tpu.vector_store %arg5[%c1_230, %c0_231, %c0_232], %604 {strides = array<i32>} : memref<20x8x128xf32, #tpu.memory_space<vmem>>, vector<1x8x128xf32>,
    %605 = arith.maximumf %582, %601 : vector<8x128xf32>
    %c0_233 = arith.constant 0 : index
    %c7 = arith.constant 7 : index
    %606 = arith.index_cast %10 : i32 to index
    %c0_234 = arith.constant 0 : index
    %607 = vector.load %arg2[%c0_233, %c7, %606, %c0_234] : memref<5x25x8x128xf32, #tpu.memory_space<vmem>>, vector<1x1x8x128xf32>
    %608 = vector.shape_cast %607 : vector<1x1x8x128xf32> to vector<8x128xf32>
    %c1_235 = arith.constant 1 : index
    %c7_236 = arith.constant 7 : index
    %609 = arith.index_cast %10 : i32 to index
    %c0_237 = arith.constant 0 : index
    %610 = vector.load %arg2[%c1_235, %c7_236, %609, %c0_237] : memref<5x25x8x128xf32, #tpu.memory_space<vmem>>, vector<1x1x8x128xf32>
    %611 = vector.shape_cast %610 : vector<1x1x8x128xf32> to vector<8x128xf32>
    %612 = arith.select %552, %611, %608 : vector<8x128xi1>, vector<8x128xf32>
    %c2_238 = arith.constant 2 : index
    %c7_239 = arith.constant 7 : index
    %613 = arith.index_cast %10 : i32 to index
    %c0_240 = arith.constant 0 : index
    %614 = vector.load %arg2[%c2_238, %c7_239, %613, %c0_240] : memref<5x25x8x128xf32, #tpu.memory_space<vmem>>, vector<1x1x8x128xf32>
    %615 = vector.shape_cast %614 : vector<1x1x8x128xf32> to vector<8x128xf32>
    %616 = arith.select %554, %615, %612 : vector<8x128xi1>, vector<8x128xf32>
    %c3_241 = arith.constant 3 : index
    %c7_242 = arith.constant 7 : index
    %617 = arith.index_cast %10 : i32 to index
    %c0_243 = arith.constant 0 : index
    %618 = vector.load %arg2[%c3_241, %c7_242, %617, %c0_243] : memref<5x25x8x128xf32, #tpu.memory_space<vmem>>, vector<1x1x8x128xf32>
    %619 = vector.shape_cast %618 : vector<1x1x8x128xf32> to vector<8x128xf32>
    %620 = arith.select %556, %619, %616 : vector<8x128xi1>, vector<8x128xf32>
    %c4_244 = arith.constant 4 : index
    %c7_245 = arith.constant 7 : index
    %621 = arith.index_cast %10 : i32 to index
    %c0_246 = arith.constant 0 : index
    %622 = vector.load %arg2[%c4_244, %c7_245, %621, %c0_246] : memref<5x25x8x128xf32, #tpu.memory_space<vmem>>, vector<1x1x8x128xf32>
    %623 = vector.shape_cast %622 : vector<1x1x8x128xf32> to vector<8x128xf32>
    %624 = arith.select %558, %623, %620 : vector<8x128xi1>, vector<8x128xf32>
    %c2_247 = arith.constant 2 : index
    %c0_248 = arith.constant 0 : index
    %c0_249 = arith.constant 0 : index
    %625 = vector.load %arg5[%c2_247, %c0_248, %c0_249] : memref<20x8x128xf32, #tpu.memory_space<vmem>>, vector<1x8x128xf32>
    %626 = vector.shape_cast %625 : vector<1x8x128xf32> to vector<8x128xf32>
    %627 = vector.shape_cast %624 : vector<8x128xf32> to vector<1x8x128xf32>
    tpu.vector_store %arg5[%c2_247, %c0_248, %c0_249], %627 {strides = array<i32>} : memref<20x8x128xf32, #tpu.memory_space<vmem>>, vector<1x8x128xf32>,
    %628 = arith.maximumf %605, %624 : vector<8x128xf32>
    %c0_250 = arith.constant 0 : index
    %c8 = arith.constant 8 : index
    %629 = arith.index_cast %10 : i32 to index
    %c0_251 = arith.constant 0 : index
    %630 = vector.load %arg2[%c0_250, %c8, %629, %c0_251] : memref<5x25x8x128xf32, #tpu.memory_space<vmem>>, vector<1x1x8x128xf32>
    %631 = vector.shape_cast %630 : vector<1x1x8x128xf32> to vector<8x128xf32>
    %c1_252 = arith.constant 1 : index
    %c8_253 = arith.constant 8 : index
    %632 = arith.index_cast %10 : i32 to index
    %c0_254 = arith.constant 0 : index
    %633 = vector.load %arg2[%c1_252, %c8_253, %632, %c0_254] : memref<5x25x8x128xf32, #tpu.memory_space<vmem>>, vector<1x1x8x128xf32>
    %634 = vector.shape_cast %633 : vector<1x1x8x128xf32> to vector<8x128xf32>
    %635 = arith.select %552, %634, %631 : vector<8x128xi1>, vector<8x128xf32>
    %c2_255 = arith.constant 2 : index
    %c8_256 = arith.constant 8 : index
    %636 = arith.index_cast %10 : i32 to index
    %c0_257 = arith.constant 0 : index
    %637 = vector.load %arg2[%c2_255, %c8_256, %636, %c0_257] : memref<5x25x8x128xf32, #tpu.memory_space<vmem>>, vector<1x1x8x128xf32>
    %638 = vector.shape_cast %637 : vector<1x1x8x128xf32> to vector<8x128xf32>
    %639 = arith.select %554, %638, %635 : vector<8x128xi1>, vector<8x128xf32>
    %c3_258 = arith.constant 3 : index
    %c8_259 = arith.constant 8 : index
    %640 = arith.index_cast %10 : i32 to index
    %c0_260 = arith.constant 0 : index
    %641 = vector.load %arg2[%c3_258, %c8_259, %640, %c0_260] : memref<5x25x8x128xf32, #tpu.memory_space<vmem>>, vector<1x1x8x128xf32>
    %642 = vector.shape_cast %641 : vector<1x1x8x128xf32> to vector<8x128xf32>
    %643 = arith.select %556, %642, %639 : vector<8x128xi1>, vector<8x128xf32>
    %c4_261 = arith.constant 4 : index
    %c8_262 = arith.constant 8 : index
    %644 = arith.index_cast %10 : i32 to index
    %c0_263 = arith.constant 0 : index
    %645 = vector.load %arg2[%c4_261, %c8_262, %644, %c0_263] : memref<5x25x8x128xf32, #tpu.memory_space<vmem>>, vector<1x1x8x128xf32>
    %646 = vector.shape_cast %645 : vector<1x1x8x128xf32> to vector<8x128xf32>
    %647 = arith.select %558, %646, %643 : vector<8x128xi1>, vector<8x128xf32>
    %c3_264 = arith.constant 3 : index
    %c0_265 = arith.constant 0 : index
    %c0_266 = arith.constant 0 : index
    %648 = vector.load %arg5[%c3_264, %c0_265, %c0_266] : memref<20x8x128xf32, #tpu.memory_space<vmem>>, vector<1x8x128xf32>
    %649 = vector.shape_cast %648 : vector<1x8x128xf32> to vector<8x128xf32>
    %650 = vector.shape_cast %647 : vector<8x128xf32> to vector<1x8x128xf32>
    tpu.vector_store %arg5[%c3_264, %c0_265, %c0_266], %650 {strides = array<i32>} : memref<20x8x128xf32, #tpu.memory_space<vmem>>, vector<1x8x128xf32>,
    %651 = arith.maximumf %628, %647 : vector<8x128xf32>
    %c0_267 = arith.constant 0 : index
    %c9 = arith.constant 9 : index
    %652 = arith.index_cast %10 : i32 to index
    %c0_268 = arith.constant 0 : index
    %653 = vector.load %arg2[%c0_267, %c9, %652, %c0_268] : memref<5x25x8x128xf32, #tpu.memory_space<vmem>>, vector<1x1x8x128xf32>
    %654 = vector.shape_cast %653 : vector<1x1x8x128xf32> to vector<8x128xf32>
    %c1_269 = arith.constant 1 : index
    %c9_270 = arith.constant 9 : index
    %655 = arith.index_cast %10 : i32 to index
    %c0_271 = arith.constant 0 : index
    %656 = vector.load %arg2[%c1_269, %c9_270, %655, %c0_271] : memref<5x25x8x128xf32, #tpu.memory_space<vmem>>, vector<1x1x8x128xf32>
    %657 = vector.shape_cast %656 : vector<1x1x8x128xf32> to vector<8x128xf32>
    %658 = arith.select %552, %657, %654 : vector<8x128xi1>, vector<8x128xf32>
    %c2_272 = arith.constant 2 : index
    %c9_273 = arith.constant 9 : index
    %659 = arith.index_cast %10 : i32 to index
    %c0_274 = arith.constant 0 : index
    %660 = vector.load %arg2[%c2_272, %c9_273, %659, %c0_274] : memref<5x25x8x128xf32, #tpu.memory_space<vmem>>, vector<1x1x8x128xf32>
    %661 = vector.shape_cast %660 : vector<1x1x8x128xf32> to vector<8x128xf32>
    %662 = arith.select %554, %661, %658 : vector<8x128xi1>, vector<8x128xf32>
    %c3_275 = arith.constant 3 : index
    %c9_276 = arith.constant 9 : index
    %663 = arith.index_cast %10 : i32 to index
    %c0_277 = arith.constant 0 : index
    %664 = vector.load %arg2[%c3_275, %c9_276, %663, %c0_277] : memref<5x25x8x128xf32, #tpu.memory_space<vmem>>, vector<1x1x8x128xf32>
    %665 = vector.shape_cast %664 : vector<1x1x8x128xf32> to vector<8x128xf32>
    %666 = arith.select %556, %665, %662 : vector<8x128xi1>, vector<8x128xf32>
    %c4_278 = arith.constant 4 : index
    %c9_279 = arith.constant 9 : index
    %667 = arith.index_cast %10 : i32 to index
    %c0_280 = arith.constant 0 : index
    %668 = vector.load %arg2[%c4_278, %c9_279, %667, %c0_280] : memref<5x25x8x128xf32, #tpu.memory_space<vmem>>, vector<1x1x8x128xf32>
    %669 = vector.shape_cast %668 : vector<1x1x8x128xf32> to vector<8x128xf32>
    %670 = arith.select %558, %669, %666 : vector<8x128xi1>, vector<8x128xf32>
    %c4_281 = arith.constant 4 : index
    %c0_282 = arith.constant 0 : index
    %c0_283 = arith.constant 0 : index
    %671 = vector.load %arg5[%c4_281, %c0_282, %c0_283] : memref<20x8x128xf32, #tpu.memory_space<vmem>>, vector<1x8x128xf32>
    %672 = vector.shape_cast %671 : vector<1x8x128xf32> to vector<8x128xf32>
    %673 = vector.shape_cast %670 : vector<8x128xf32> to vector<1x8x128xf32>
    tpu.vector_store %arg5[%c4_281, %c0_282, %c0_283], %673 {strides = array<i32>} : memref<20x8x128xf32, #tpu.memory_space<vmem>>, vector<1x8x128xf32>,
    %674 = arith.maximumf %651, %670 : vector<8x128xf32>
    %c0_284 = arith.constant 0 : index
    %c10 = arith.constant 10 : index
    %675 = arith.index_cast %10 : i32 to index
    %c0_285 = arith.constant 0 : index
    %676 = vector.load %arg2[%c0_284, %c10, %675, %c0_285] : memref<5x25x8x128xf32, #tpu.memory_space<vmem>>, vector<1x1x8x128xf32>
    %677 = vector.shape_cast %676 : vector<1x1x8x128xf32> to vector<8x128xf32>
    %c1_286 = arith.constant 1 : index
    %c10_287 = arith.constant 10 : index
    %678 = arith.index_cast %10 : i32 to index
    %c0_288 = arith.constant 0 : index
    %679 = vector.load %arg2[%c1_286, %c10_287, %678, %c0_288] : memref<5x25x8x128xf32, #tpu.memory_space<vmem>>, vector<1x1x8x128xf32>
    %680 = vector.shape_cast %679 : vector<1x1x8x128xf32> to vector<8x128xf32>
    %681 = arith.select %552, %680, %677 : vector<8x128xi1>, vector<8x128xf32>
    %c2_289 = arith.constant 2 : index
    %c10_290 = arith.constant 10 : index
    %682 = arith.index_cast %10 : i32 to index
    %c0_291 = arith.constant 0 : index
    %683 = vector.load %arg2[%c2_289, %c10_290, %682, %c0_291] : memref<5x25x8x128xf32, #tpu.memory_space<vmem>>, vector<1x1x8x128xf32>
    %684 = vector.shape_cast %683 : vector<1x1x8x128xf32> to vector<8x128xf32>
    %685 = arith.select %554, %684, %681 : vector<8x128xi1>, vector<8x128xf32>
    %c3_292 = arith.constant 3 : index
    %c10_293 = arith.constant 10 : index
    %686 = arith.index_cast %10 : i32 to index
    %c0_294 = arith.constant 0 : index
    %687 = vector.load %arg2[%c3_292, %c10_293, %686, %c0_294] : memref<5x25x8x128xf32, #tpu.memory_space<vmem>>, vector<1x1x8x128xf32>
    %688 = vector.shape_cast %687 : vector<1x1x8x128xf32> to vector<8x128xf32>
    %689 = arith.select %556, %688, %685 : vector<8x128xi1>, vector<8x128xf32>
    %c4_295 = arith.constant 4 : index
    %c10_296 = arith.constant 10 : index
    %690 = arith.index_cast %10 : i32 to index
    %c0_297 = arith.constant 0 : index
    %691 = vector.load %arg2[%c4_295, %c10_296, %690, %c0_297] : memref<5x25x8x128xf32, #tpu.memory_space<vmem>>, vector<1x1x8x128xf32>
    %692 = vector.shape_cast %691 : vector<1x1x8x128xf32> to vector<8x128xf32>
    %693 = arith.select %558, %692, %689 : vector<8x128xi1>, vector<8x128xf32>
    %c5_298 = arith.constant 5 : index
    %c0_299 = arith.constant 0 : index
    %c0_300 = arith.constant 0 : index
    %694 = vector.load %arg5[%c5_298, %c0_299, %c0_300] : memref<20x8x128xf32, #tpu.memory_space<vmem>>, vector<1x8x128xf32>
    %695 = vector.shape_cast %694 : vector<1x8x128xf32> to vector<8x128xf32>
    %696 = vector.shape_cast %693 : vector<8x128xf32> to vector<1x8x128xf32>
    tpu.vector_store %arg5[%c5_298, %c0_299, %c0_300], %696 {strides = array<i32>} : memref<20x8x128xf32, #tpu.memory_space<vmem>>, vector<1x8x128xf32>,
    %697 = arith.maximumf %674, %693 : vector<8x128xf32>
    %c0_301 = arith.constant 0 : index
    %c11 = arith.constant 11 : index
    %698 = arith.index_cast %10 : i32 to index
    %c0_302 = arith.constant 0 : index
    %699 = vector.load %arg2[%c0_301, %c11, %698, %c0_302] : memref<5x25x8x128xf32, #tpu.memory_space<vmem>>, vector<1x1x8x128xf32>
    %700 = vector.shape_cast %699 : vector<1x1x8x128xf32> to vector<8x128xf32>
    %c1_303 = arith.constant 1 : index
    %c11_304 = arith.constant 11 : index
    %701 = arith.index_cast %10 : i32 to index
    %c0_305 = arith.constant 0 : index
    %702 = vector.load %arg2[%c1_303, %c11_304, %701, %c0_305] : memref<5x25x8x128xf32, #tpu.memory_space<vmem>>, vector<1x1x8x128xf32>
    %703 = vector.shape_cast %702 : vector<1x1x8x128xf32> to vector<8x128xf32>
    %704 = arith.select %552, %703, %700 : vector<8x128xi1>, vector<8x128xf32>
    %c2_306 = arith.constant 2 : index
    %c11_307 = arith.constant 11 : index
    %705 = arith.index_cast %10 : i32 to index
    %c0_308 = arith.constant 0 : index
    %706 = vector.load %arg2[%c2_306, %c11_307, %705, %c0_308] : memref<5x25x8x128xf32, #tpu.memory_space<vmem>>, vector<1x1x8x128xf32>
    %707 = vector.shape_cast %706 : vector<1x1x8x128xf32> to vector<8x128xf32>
    %708 = arith.select %554, %707, %704 : vector<8x128xi1>, vector<8x128xf32>
    %c3_309 = arith.constant 3 : index
    %c11_310 = arith.constant 11 : index
    %709 = arith.index_cast %10 : i32 to index
    %c0_311 = arith.constant 0 : index
    %710 = vector.load %arg2[%c3_309, %c11_310, %709, %c0_311] : memref<5x25x8x128xf32, #tpu.memory_space<vmem>>, vector<1x1x8x128xf32>
    %711 = vector.shape_cast %710 : vector<1x1x8x128xf32> to vector<8x128xf32>
    %712 = arith.select %556, %711, %708 : vector<8x128xi1>, vector<8x128xf32>
    %c4_312 = arith.constant 4 : index
    %c11_313 = arith.constant 11 : index
    %713 = arith.index_cast %10 : i32 to index
    %c0_314 = arith.constant 0 : index
    %714 = vector.load %arg2[%c4_312, %c11_313, %713, %c0_314] : memref<5x25x8x128xf32, #tpu.memory_space<vmem>>, vector<1x1x8x128xf32>
    %715 = vector.shape_cast %714 : vector<1x1x8x128xf32> to vector<8x128xf32>
    %716 = arith.select %558, %715, %712 : vector<8x128xi1>, vector<8x128xf32>
    %c6_315 = arith.constant 6 : index
    %c0_316 = arith.constant 0 : index
    %c0_317 = arith.constant 0 : index
    %717 = vector.load %arg5[%c6_315, %c0_316, %c0_317] : memref<20x8x128xf32, #tpu.memory_space<vmem>>, vector<1x8x128xf32>
    %718 = vector.shape_cast %717 : vector<1x8x128xf32> to vector<8x128xf32>
    %719 = vector.shape_cast %716 : vector<8x128xf32> to vector<1x8x128xf32>
    tpu.vector_store %arg5[%c6_315, %c0_316, %c0_317], %719 {strides = array<i32>} : memref<20x8x128xf32, #tpu.memory_space<vmem>>, vector<1x8x128xf32>,
    %720 = arith.maximumf %697, %716 : vector<8x128xf32>
    %c0_318 = arith.constant 0 : index
    %c12 = arith.constant 12 : index
    %721 = arith.index_cast %10 : i32 to index
    %c0_319 = arith.constant 0 : index
    %722 = vector.load %arg2[%c0_318, %c12, %721, %c0_319] : memref<5x25x8x128xf32, #tpu.memory_space<vmem>>, vector<1x1x8x128xf32>
    %723 = vector.shape_cast %722 : vector<1x1x8x128xf32> to vector<8x128xf32>
    %c1_320 = arith.constant 1 : index
    %c12_321 = arith.constant 12 : index
    %724 = arith.index_cast %10 : i32 to index
    %c0_322 = arith.constant 0 : index
    %725 = vector.load %arg2[%c1_320, %c12_321, %724, %c0_322] : memref<5x25x8x128xf32, #tpu.memory_space<vmem>>, vector<1x1x8x128xf32>
    %726 = vector.shape_cast %725 : vector<1x1x8x128xf32> to vector<8x128xf32>
    %727 = arith.select %552, %726, %723 : vector<8x128xi1>, vector<8x128xf32>
    %c2_323 = arith.constant 2 : index
    %c12_324 = arith.constant 12 : index
    %728 = arith.index_cast %10 : i32 to index
    %c0_325 = arith.constant 0 : index
    %729 = vector.load %arg2[%c2_323, %c12_324, %728, %c0_325] : memref<5x25x8x128xf32, #tpu.memory_space<vmem>>, vector<1x1x8x128xf32>
    %730 = vector.shape_cast %729 : vector<1x1x8x128xf32> to vector<8x128xf32>
    %731 = arith.select %554, %730, %727 : vector<8x128xi1>, vector<8x128xf32>
    %c3_326 = arith.constant 3 : index
    %c12_327 = arith.constant 12 : index
    %732 = arith.index_cast %10 : i32 to index
    %c0_328 = arith.constant 0 : index
    %733 = vector.load %arg2[%c3_326, %c12_327, %732, %c0_328] : memref<5x25x8x128xf32, #tpu.memory_space<vmem>>, vector<1x1x8x128xf32>
    %734 = vector.shape_cast %733 : vector<1x1x8x128xf32> to vector<8x128xf32>
    %735 = arith.select %556, %734, %731 : vector<8x128xi1>, vector<8x128xf32>
    %c4_329 = arith.constant 4 : index
    %c12_330 = arith.constant 12 : index
    %736 = arith.index_cast %10 : i32 to index
    %c0_331 = arith.constant 0 : index
    %737 = vector.load %arg2[%c4_329, %c12_330, %736, %c0_331] : memref<5x25x8x128xf32, #tpu.memory_space<vmem>>, vector<1x1x8x128xf32>
    %738 = vector.shape_cast %737 : vector<1x1x8x128xf32> to vector<8x128xf32>
    %739 = arith.select %558, %738, %735 : vector<8x128xi1>, vector<8x128xf32>
    %c7_332 = arith.constant 7 : index
    %c0_333 = arith.constant 0 : index
    %c0_334 = arith.constant 0 : index
    %740 = vector.load %arg5[%c7_332, %c0_333, %c0_334] : memref<20x8x128xf32, #tpu.memory_space<vmem>>, vector<1x8x128xf32>
    %741 = vector.shape_cast %740 : vector<1x8x128xf32> to vector<8x128xf32>
    %742 = vector.shape_cast %739 : vector<8x128xf32> to vector<1x8x128xf32>
    tpu.vector_store %arg5[%c7_332, %c0_333, %c0_334], %742 {strides = array<i32>} : memref<20x8x128xf32, #tpu.memory_space<vmem>>, vector<1x8x128xf32>,
    %743 = arith.maximumf %720, %739 : vector<8x128xf32>
    %c0_335 = arith.constant 0 : index
    %c13 = arith.constant 13 : index
    %744 = arith.index_cast %10 : i32 to index
    %c0_336 = arith.constant 0 : index
    %745 = vector.load %arg2[%c0_335, %c13, %744, %c0_336] : memref<5x25x8x128xf32, #tpu.memory_space<vmem>>, vector<1x1x8x128xf32>
    %746 = vector.shape_cast %745 : vector<1x1x8x128xf32> to vector<8x128xf32>
    %c1_337 = arith.constant 1 : index
    %c13_338 = arith.constant 13 : index
    %747 = arith.index_cast %10 : i32 to index
    %c0_339 = arith.constant 0 : index
    %748 = vector.load %arg2[%c1_337, %c13_338, %747, %c0_339] : memref<5x25x8x128xf32, #tpu.memory_space<vmem>>, vector<1x1x8x128xf32>
    %749 = vector.shape_cast %748 : vector<1x1x8x128xf32> to vector<8x128xf32>
    %750 = arith.select %552, %749, %746 : vector<8x128xi1>, vector<8x128xf32>
    %c2_340 = arith.constant 2 : index
    %c13_341 = arith.constant 13 : index
    %751 = arith.index_cast %10 : i32 to index
    %c0_342 = arith.constant 0 : index
    %752 = vector.load %arg2[%c2_340, %c13_341, %751, %c0_342] : memref<5x25x8x128xf32, #tpu.memory_space<vmem>>, vector<1x1x8x128xf32>
    %753 = vector.shape_cast %752 : vector<1x1x8x128xf32> to vector<8x128xf32>
    %754 = arith.select %554, %753, %750 : vector<8x128xi1>, vector<8x128xf32>
    %c3_343 = arith.constant 3 : index
    %c13_344 = arith.constant 13 : index
    %755 = arith.index_cast %10 : i32 to index
    %c0_345 = arith.constant 0 : index
    %756 = vector.load %arg2[%c3_343, %c13_344, %755, %c0_345] : memref<5x25x8x128xf32, #tpu.memory_space<vmem>>, vector<1x1x8x128xf32>
    %757 = vector.shape_cast %756 : vector<1x1x8x128xf32> to vector<8x128xf32>
    %758 = arith.select %556, %757, %754 : vector<8x128xi1>, vector<8x128xf32>
    %c4_346 = arith.constant 4 : index
    %c13_347 = arith.constant 13 : index
    %759 = arith.index_cast %10 : i32 to index
    %c0_348 = arith.constant 0 : index
    %760 = vector.load %arg2[%c4_346, %c13_347, %759, %c0_348] : memref<5x25x8x128xf32, #tpu.memory_space<vmem>>, vector<1x1x8x128xf32>
    %761 = vector.shape_cast %760 : vector<1x1x8x128xf32> to vector<8x128xf32>
    %762 = arith.select %558, %761, %758 : vector<8x128xi1>, vector<8x128xf32>
    %c8_349 = arith.constant 8 : index
    %c0_350 = arith.constant 0 : index
    %c0_351 = arith.constant 0 : index
    %763 = vector.load %arg5[%c8_349, %c0_350, %c0_351] : memref<20x8x128xf32, #tpu.memory_space<vmem>>, vector<1x8x128xf32>
    %764 = vector.shape_cast %763 : vector<1x8x128xf32> to vector<8x128xf32>
    %765 = vector.shape_cast %762 : vector<8x128xf32> to vector<1x8x128xf32>
    tpu.vector_store %arg5[%c8_349, %c0_350, %c0_351], %765 {strides = array<i32>} : memref<20x8x128xf32, #tpu.memory_space<vmem>>, vector<1x8x128xf32>,
    %766 = arith.maximumf %743, %762 : vector<8x128xf32>
    %c0_352 = arith.constant 0 : index
    %c14 = arith.constant 14 : index
    %767 = arith.index_cast %10 : i32 to index
    %c0_353 = arith.constant 0 : index
    %768 = vector.load %arg2[%c0_352, %c14, %767, %c0_353] : memref<5x25x8x128xf32, #tpu.memory_space<vmem>>, vector<1x1x8x128xf32>
    %769 = vector.shape_cast %768 : vector<1x1x8x128xf32> to vector<8x128xf32>
    %c1_354 = arith.constant 1 : index
    %c14_355 = arith.constant 14 : index
    %770 = arith.index_cast %10 : i32 to index
    %c0_356 = arith.constant 0 : index
    %771 = vector.load %arg2[%c1_354, %c14_355, %770, %c0_356] : memref<5x25x8x128xf32, #tpu.memory_space<vmem>>, vector<1x1x8x128xf32>
    %772 = vector.shape_cast %771 : vector<1x1x8x128xf32> to vector<8x128xf32>
    %773 = arith.select %552, %772, %769 : vector<8x128xi1>, vector<8x128xf32>
    %c2_357 = arith.constant 2 : index
    %c14_358 = arith.constant 14 : index
    %774 = arith.index_cast %10 : i32 to index
    %c0_359 = arith.constant 0 : index
    %775 = vector.load %arg2[%c2_357, %c14_358, %774, %c0_359] : memref<5x25x8x128xf32, #tpu.memory_space<vmem>>, vector<1x1x8x128xf32>
    %776 = vector.shape_cast %775 : vector<1x1x8x128xf32> to vector<8x128xf32>
    %777 = arith.select %554, %776, %773 : vector<8x128xi1>, vector<8x128xf32>
    %c3_360 = arith.constant 3 : index
    %c14_361 = arith.constant 14 : index
    %778 = arith.index_cast %10 : i32 to index
    %c0_362 = arith.constant 0 : index
    %779 = vector.load %arg2[%c3_360, %c14_361, %778, %c0_362] : memref<5x25x8x128xf32, #tpu.memory_space<vmem>>, vector<1x1x8x128xf32>
    %780 = vector.shape_cast %779 : vector<1x1x8x128xf32> to vector<8x128xf32>
    %781 = arith.select %556, %780, %777 : vector<8x128xi1>, vector<8x128xf32>
    %c4_363 = arith.constant 4 : index
    %c14_364 = arith.constant 14 : index
    %782 = arith.index_cast %10 : i32 to index
    %c0_365 = arith.constant 0 : index
    %783 = vector.load %arg2[%c4_363, %c14_364, %782, %c0_365] : memref<5x25x8x128xf32, #tpu.memory_space<vmem>>, vector<1x1x8x128xf32>
    %784 = vector.shape_cast %783 : vector<1x1x8x128xf32> to vector<8x128xf32>
    %785 = arith.select %558, %784, %781 : vector<8x128xi1>, vector<8x128xf32>
    %c9_366 = arith.constant 9 : index
    %c0_367 = arith.constant 0 : index
    %c0_368 = arith.constant 0 : index
    %786 = vector.load %arg5[%c9_366, %c0_367, %c0_368] : memref<20x8x128xf32, #tpu.memory_space<vmem>>, vector<1x8x128xf32>
    %787 = vector.shape_cast %786 : vector<1x8x128xf32> to vector<8x128xf32>
    %788 = vector.shape_cast %785 : vector<8x128xf32> to vector<1x8x128xf32>
    tpu.vector_store %arg5[%c9_366, %c0_367, %c0_368], %788 {strides = array<i32>} : memref<20x8x128xf32, #tpu.memory_space<vmem>>, vector<1x8x128xf32>,
    %789 = arith.maximumf %766, %785 : vector<8x128xf32>
    %c0_369 = arith.constant 0 : index
    %c15 = arith.constant 15 : index
    %790 = arith.index_cast %10 : i32 to index
    %c0_370 = arith.constant 0 : index
    %791 = vector.load %arg2[%c0_369, %c15, %790, %c0_370] : memref<5x25x8x128xf32, #tpu.memory_space<vmem>>, vector<1x1x8x128xf32>
    %792 = vector.shape_cast %791 : vector<1x1x8x128xf32> to vector<8x128xf32>
    %c1_371 = arith.constant 1 : index
    %c15_372 = arith.constant 15 : index
    %793 = arith.index_cast %10 : i32 to index
    %c0_373 = arith.constant 0 : index
    %794 = vector.load %arg2[%c1_371, %c15_372, %793, %c0_373] : memref<5x25x8x128xf32, #tpu.memory_space<vmem>>, vector<1x1x8x128xf32>
    %795 = vector.shape_cast %794 : vector<1x1x8x128xf32> to vector<8x128xf32>
    %796 = arith.select %552, %795, %792 : vector<8x128xi1>, vector<8x128xf32>
    %c2_374 = arith.constant 2 : index
    %c15_375 = arith.constant 15 : index
    %797 = arith.index_cast %10 : i32 to index
    %c0_376 = arith.constant 0 : index
    %798 = vector.load %arg2[%c2_374, %c15_375, %797, %c0_376] : memref<5x25x8x128xf32, #tpu.memory_space<vmem>>, vector<1x1x8x128xf32>
    %799 = vector.shape_cast %798 : vector<1x1x8x128xf32> to vector<8x128xf32>
    %800 = arith.select %554, %799, %796 : vector<8x128xi1>, vector<8x128xf32>
    %c3_377 = arith.constant 3 : index
    %c15_378 = arith.constant 15 : index
    %801 = arith.index_cast %10 : i32 to index
    %c0_379 = arith.constant 0 : index
    %802 = vector.load %arg2[%c3_377, %c15_378, %801, %c0_379] : memref<5x25x8x128xf32, #tpu.memory_space<vmem>>, vector<1x1x8x128xf32>
    %803 = vector.shape_cast %802 : vector<1x1x8x128xf32> to vector<8x128xf32>
    %804 = arith.select %556, %803, %800 : vector<8x128xi1>, vector<8x128xf32>
    %c4_380 = arith.constant 4 : index
    %c15_381 = arith.constant 15 : index
    %805 = arith.index_cast %10 : i32 to index
    %c0_382 = arith.constant 0 : index
    %806 = vector.load %arg2[%c4_380, %c15_381, %805, %c0_382] : memref<5x25x8x128xf32, #tpu.memory_space<vmem>>, vector<1x1x8x128xf32>
    %807 = vector.shape_cast %806 : vector<1x1x8x128xf32> to vector<8x128xf32>
    %808 = arith.select %558, %807, %804 : vector<8x128xi1>, vector<8x128xf32>
    %c10_383 = arith.constant 10 : index
    %c0_384 = arith.constant 0 : index
    %c0_385 = arith.constant 0 : index
    %809 = vector.load %arg5[%c10_383, %c0_384, %c0_385] : memref<20x8x128xf32, #tpu.memory_space<vmem>>, vector<1x8x128xf32>
    %810 = vector.shape_cast %809 : vector<1x8x128xf32> to vector<8x128xf32>
    %811 = vector.shape_cast %808 : vector<8x128xf32> to vector<1x8x128xf32>
    tpu.vector_store %arg5[%c10_383, %c0_384, %c0_385], %811 {strides = array<i32>} : memref<20x8x128xf32, #tpu.memory_space<vmem>>, vector<1x8x128xf32>,
    %812 = arith.maximumf %789, %808 : vector<8x128xf32>
    %c0_386 = arith.constant 0 : index
    %c16 = arith.constant 16 : index
    %813 = arith.index_cast %10 : i32 to index
    %c0_387 = arith.constant 0 : index
    %814 = vector.load %arg2[%c0_386, %c16, %813, %c0_387] : memref<5x25x8x128xf32, #tpu.memory_space<vmem>>, vector<1x1x8x128xf32>
    %815 = vector.shape_cast %814 : vector<1x1x8x128xf32> to vector<8x128xf32>
    %c1_388 = arith.constant 1 : index
    %c16_389 = arith.constant 16 : index
    %816 = arith.index_cast %10 : i32 to index
    %c0_390 = arith.constant 0 : index
    %817 = vector.load %arg2[%c1_388, %c16_389, %816, %c0_390] : memref<5x25x8x128xf32, #tpu.memory_space<vmem>>, vector<1x1x8x128xf32>
    %818 = vector.shape_cast %817 : vector<1x1x8x128xf32> to vector<8x128xf32>
    %819 = arith.select %552, %818, %815 : vector<8x128xi1>, vector<8x128xf32>
    %c2_391 = arith.constant 2 : index
    %c16_392 = arith.constant 16 : index
    %820 = arith.index_cast %10 : i32 to index
    %c0_393 = arith.constant 0 : index
    %821 = vector.load %arg2[%c2_391, %c16_392, %820, %c0_393] : memref<5x25x8x128xf32, #tpu.memory_space<vmem>>, vector<1x1x8x128xf32>
    %822 = vector.shape_cast %821 : vector<1x1x8x128xf32> to vector<8x128xf32>
    %823 = arith.select %554, %822, %819 : vector<8x128xi1>, vector<8x128xf32>
    %c3_394 = arith.constant 3 : index
    %c16_395 = arith.constant 16 : index
    %824 = arith.index_cast %10 : i32 to index
    %c0_396 = arith.constant 0 : index
    %825 = vector.load %arg2[%c3_394, %c16_395, %824, %c0_396] : memref<5x25x8x128xf32, #tpu.memory_space<vmem>>, vector<1x1x8x128xf32>
    %826 = vector.shape_cast %825 : vector<1x1x8x128xf32> to vector<8x128xf32>
    %827 = arith.select %556, %826, %823 : vector<8x128xi1>, vector<8x128xf32>
    %c4_397 = arith.constant 4 : index
    %c16_398 = arith.constant 16 : index
    %828 = arith.index_cast %10 : i32 to index
    %c0_399 = arith.constant 0 : index
    %829 = vector.load %arg2[%c4_397, %c16_398, %828, %c0_399] : memref<5x25x8x128xf32, #tpu.memory_space<vmem>>, vector<1x1x8x128xf32>
    %830 = vector.shape_cast %829 : vector<1x1x8x128xf32> to vector<8x128xf32>
    %831 = arith.select %558, %830, %827 : vector<8x128xi1>, vector<8x128xf32>
    %c11_400 = arith.constant 11 : index
    %c0_401 = arith.constant 0 : index
    %c0_402 = arith.constant 0 : index
    %832 = vector.load %arg5[%c11_400, %c0_401, %c0_402] : memref<20x8x128xf32, #tpu.memory_space<vmem>>, vector<1x8x128xf32>
    %833 = vector.shape_cast %832 : vector<1x8x128xf32> to vector<8x128xf32>
    %834 = vector.shape_cast %831 : vector<8x128xf32> to vector<1x8x128xf32>
    tpu.vector_store %arg5[%c11_400, %c0_401, %c0_402], %834 {strides = array<i32>} : memref<20x8x128xf32, #tpu.memory_space<vmem>>, vector<1x8x128xf32>,
    %835 = arith.maximumf %812, %831 : vector<8x128xf32>
    %c0_403 = arith.constant 0 : index
    %c17 = arith.constant 17 : index
    %836 = arith.index_cast %10 : i32 to index
    %c0_404 = arith.constant 0 : index
    %837 = vector.load %arg2[%c0_403, %c17, %836, %c0_404] : memref<5x25x8x128xf32, #tpu.memory_space<vmem>>, vector<1x1x8x128xf32>
    %838 = vector.shape_cast %837 : vector<1x1x8x128xf32> to vector<8x128xf32>
    %c1_405 = arith.constant 1 : index
    %c17_406 = arith.constant 17 : index
    %839 = arith.index_cast %10 : i32 to index
    %c0_407 = arith.constant 0 : index
    %840 = vector.load %arg2[%c1_405, %c17_406, %839, %c0_407] : memref<5x25x8x128xf32, #tpu.memory_space<vmem>>, vector<1x1x8x128xf32>
    %841 = vector.shape_cast %840 : vector<1x1x8x128xf32> to vector<8x128xf32>
    %842 = arith.select %552, %841, %838 : vector<8x128xi1>, vector<8x128xf32>
    %c2_408 = arith.constant 2 : index
    %c17_409 = arith.constant 17 : index
    %843 = arith.index_cast %10 : i32 to index
    %c0_410 = arith.constant 0 : index
    %844 = vector.load %arg2[%c2_408, %c17_409, %843, %c0_410] : memref<5x25x8x128xf32, #tpu.memory_space<vmem>>, vector<1x1x8x128xf32>
    %845 = vector.shape_cast %844 : vector<1x1x8x128xf32> to vector<8x128xf32>
    %846 = arith.select %554, %845, %842 : vector<8x128xi1>, vector<8x128xf32>
    %c3_411 = arith.constant 3 : index
    %c17_412 = arith.constant 17 : index
    %847 = arith.index_cast %10 : i32 to index
    %c0_413 = arith.constant 0 : index
    %848 = vector.load %arg2[%c3_411, %c17_412, %847, %c0_413] : memref<5x25x8x128xf32, #tpu.memory_space<vmem>>, vector<1x1x8x128xf32>
    %849 = vector.shape_cast %848 : vector<1x1x8x128xf32> to vector<8x128xf32>
    %850 = arith.select %556, %849, %846 : vector<8x128xi1>, vector<8x128xf32>
    %c4_414 = arith.constant 4 : index
    %c17_415 = arith.constant 17 : index
    %851 = arith.index_cast %10 : i32 to index
    %c0_416 = arith.constant 0 : index
    %852 = vector.load %arg2[%c4_414, %c17_415, %851, %c0_416] : memref<5x25x8x128xf32, #tpu.memory_space<vmem>>, vector<1x1x8x128xf32>
    %853 = vector.shape_cast %852 : vector<1x1x8x128xf32> to vector<8x128xf32>
    %854 = arith.select %558, %853, %850 : vector<8x128xi1>, vector<8x128xf32>
    %c12_417 = arith.constant 12 : index
    %c0_418 = arith.constant 0 : index
    %c0_419 = arith.constant 0 : index
    %855 = vector.load %arg5[%c12_417, %c0_418, %c0_419] : memref<20x8x128xf32, #tpu.memory_space<vmem>>, vector<1x8x128xf32>
    %856 = vector.shape_cast %855 : vector<1x8x128xf32> to vector<8x128xf32>
    %857 = vector.shape_cast %854 : vector<8x128xf32> to vector<1x8x128xf32>
    tpu.vector_store %arg5[%c12_417, %c0_418, %c0_419], %857 {strides = array<i32>} : memref<20x8x128xf32, #tpu.memory_space<vmem>>, vector<1x8x128xf32>,
    %858 = arith.maximumf %835, %854 : vector<8x128xf32>
    %c0_420 = arith.constant 0 : index
    %c18 = arith.constant 18 : index
    %859 = arith.index_cast %10 : i32 to index
    %c0_421 = arith.constant 0 : index
    %860 = vector.load %arg2[%c0_420, %c18, %859, %c0_421] : memref<5x25x8x128xf32, #tpu.memory_space<vmem>>, vector<1x1x8x128xf32>
    %861 = vector.shape_cast %860 : vector<1x1x8x128xf32> to vector<8x128xf32>
    %c1_422 = arith.constant 1 : index
    %c18_423 = arith.constant 18 : index
    %862 = arith.index_cast %10 : i32 to index
    %c0_424 = arith.constant 0 : index
    %863 = vector.load %arg2[%c1_422, %c18_423, %862, %c0_424] : memref<5x25x8x128xf32, #tpu.memory_space<vmem>>, vector<1x1x8x128xf32>
    %864 = vector.shape_cast %863 : vector<1x1x8x128xf32> to vector<8x128xf32>
    %865 = arith.select %552, %864, %861 : vector<8x128xi1>, vector<8x128xf32>
    %c2_425 = arith.constant 2 : index
    %c18_426 = arith.constant 18 : index
    %866 = arith.index_cast %10 : i32 to index
    %c0_427 = arith.constant 0 : index
    %867 = vector.load %arg2[%c2_425, %c18_426, %866, %c0_427] : memref<5x25x8x128xf32, #tpu.memory_space<vmem>>, vector<1x1x8x128xf32>
    %868 = vector.shape_cast %867 : vector<1x1x8x128xf32> to vector<8x128xf32>
    %869 = arith.select %554, %868, %865 : vector<8x128xi1>, vector<8x128xf32>
    %c3_428 = arith.constant 3 : index
    %c18_429 = arith.constant 18 : index
    %870 = arith.index_cast %10 : i32 to index
    %c0_430 = arith.constant 0 : index
    %871 = vector.load %arg2[%c3_428, %c18_429, %870, %c0_430] : memref<5x25x8x128xf32, #tpu.memory_space<vmem>>, vector<1x1x8x128xf32>
    %872 = vector.shape_cast %871 : vector<1x1x8x128xf32> to vector<8x128xf32>
    %873 = arith.select %556, %872, %869 : vector<8x128xi1>, vector<8x128xf32>
    %c4_431 = arith.constant 4 : index
    %c18_432 = arith.constant 18 : index
    %874 = arith.index_cast %10 : i32 to index
    %c0_433 = arith.constant 0 : index
    %875 = vector.load %arg2[%c4_431, %c18_432, %874, %c0_433] : memref<5x25x8x128xf32, #tpu.memory_space<vmem>>, vector<1x1x8x128xf32>
    %876 = vector.shape_cast %875 : vector<1x1x8x128xf32> to vector<8x128xf32>
    %877 = arith.select %558, %876, %873 : vector<8x128xi1>, vector<8x128xf32>
    %c13_434 = arith.constant 13 : index
    %c0_435 = arith.constant 0 : index
    %c0_436 = arith.constant 0 : index
    %878 = vector.load %arg5[%c13_434, %c0_435, %c0_436] : memref<20x8x128xf32, #tpu.memory_space<vmem>>, vector<1x8x128xf32>
    %879 = vector.shape_cast %878 : vector<1x8x128xf32> to vector<8x128xf32>
    %880 = vector.shape_cast %877 : vector<8x128xf32> to vector<1x8x128xf32>
    tpu.vector_store %arg5[%c13_434, %c0_435, %c0_436], %880 {strides = array<i32>} : memref<20x8x128xf32, #tpu.memory_space<vmem>>, vector<1x8x128xf32>,
    %881 = arith.maximumf %858, %877 : vector<8x128xf32>
    %c0_437 = arith.constant 0 : index
    %c19 = arith.constant 19 : index
    %882 = arith.index_cast %10 : i32 to index
    %c0_438 = arith.constant 0 : index
    %883 = vector.load %arg2[%c0_437, %c19, %882, %c0_438] : memref<5x25x8x128xf32, #tpu.memory_space<vmem>>, vector<1x1x8x128xf32>
    %884 = vector.shape_cast %883 : vector<1x1x8x128xf32> to vector<8x128xf32>
    %c1_439 = arith.constant 1 : index
    %c19_440 = arith.constant 19 : index
    %885 = arith.index_cast %10 : i32 to index
    %c0_441 = arith.constant 0 : index
    %886 = vector.load %arg2[%c1_439, %c19_440, %885, %c0_441] : memref<5x25x8x128xf32, #tpu.memory_space<vmem>>, vector<1x1x8x128xf32>
    %887 = vector.shape_cast %886 : vector<1x1x8x128xf32> to vector<8x128xf32>
    %888 = arith.select %552, %887, %884 : vector<8x128xi1>, vector<8x128xf32>
    %c2_442 = arith.constant 2 : index
    %c19_443 = arith.constant 19 : index
    %889 = arith.index_cast %10 : i32 to index
    %c0_444 = arith.constant 0 : index
    %890 = vector.load %arg2[%c2_442, %c19_443, %889, %c0_444] : memref<5x25x8x128xf32, #tpu.memory_space<vmem>>, vector<1x1x8x128xf32>
    %891 = vector.shape_cast %890 : vector<1x1x8x128xf32> to vector<8x128xf32>
    %892 = arith.select %554, %891, %888 : vector<8x128xi1>, vector<8x128xf32>
    %c3_445 = arith.constant 3 : index
    %c19_446 = arith.constant 19 : index
    %893 = arith.index_cast %10 : i32 to index
    %c0_447 = arith.constant 0 : index
    %894 = vector.load %arg2[%c3_445, %c19_446, %893, %c0_447] : memref<5x25x8x128xf32, #tpu.memory_space<vmem>>, vector<1x1x8x128xf32>
    %895 = vector.shape_cast %894 : vector<1x1x8x128xf32> to vector<8x128xf32>
    %896 = arith.select %556, %895, %892 : vector<8x128xi1>, vector<8x128xf32>
    %c4_448 = arith.constant 4 : index
    %c19_449 = arith.constant 19 : index
    %897 = arith.index_cast %10 : i32 to index
    %c0_450 = arith.constant 0 : index
    %898 = vector.load %arg2[%c4_448, %c19_449, %897, %c0_450] : memref<5x25x8x128xf32, #tpu.memory_space<vmem>>, vector<1x1x8x128xf32>
    %899 = vector.shape_cast %898 : vector<1x1x8x128xf32> to vector<8x128xf32>
    %900 = arith.select %558, %899, %896 : vector<8x128xi1>, vector<8x128xf32>
    %c14_451 = arith.constant 14 : index
    %c0_452 = arith.constant 0 : index
    %c0_453 = arith.constant 0 : index
    %901 = vector.load %arg5[%c14_451, %c0_452, %c0_453] : memref<20x8x128xf32, #tpu.memory_space<vmem>>, vector<1x8x128xf32>
    %902 = vector.shape_cast %901 : vector<1x8x128xf32> to vector<8x128xf32>
    %903 = vector.shape_cast %900 : vector<8x128xf32> to vector<1x8x128xf32>
    tpu.vector_store %arg5[%c14_451, %c0_452, %c0_453], %903 {strides = array<i32>} : memref<20x8x128xf32, #tpu.memory_space<vmem>>, vector<1x8x128xf32>,
    %904 = arith.maximumf %881, %900 : vector<8x128xf32>
    %c0_454 = arith.constant 0 : index
    %c20 = arith.constant 20 : index
    %905 = arith.index_cast %10 : i32 to index
    %c0_455 = arith.constant 0 : index
    %906 = vector.load %arg2[%c0_454, %c20, %905, %c0_455] : memref<5x25x8x128xf32, #tpu.memory_space<vmem>>, vector<1x1x8x128xf32>
    %907 = vector.shape_cast %906 : vector<1x1x8x128xf32> to vector<8x128xf32>
    %c1_456 = arith.constant 1 : index
    %c20_457 = arith.constant 20 : index
    %908 = arith.index_cast %10 : i32 to index
    %c0_458 = arith.constant 0 : index
    %909 = vector.load %arg2[%c1_456, %c20_457, %908, %c0_458] : memref<5x25x8x128xf32, #tpu.memory_space<vmem>>, vector<1x1x8x128xf32>
    %910 = vector.shape_cast %909 : vector<1x1x8x128xf32> to vector<8x128xf32>
    %911 = arith.select %552, %910, %907 : vector<8x128xi1>, vector<8x128xf32>
    %c2_459 = arith.constant 2 : index
    %c20_460 = arith.constant 20 : index
    %912 = arith.index_cast %10 : i32 to index
    %c0_461 = arith.constant 0 : index
    %913 = vector.load %arg2[%c2_459, %c20_460, %912, %c0_461] : memref<5x25x8x128xf32, #tpu.memory_space<vmem>>, vector<1x1x8x128xf32>
    %914 = vector.shape_cast %913 : vector<1x1x8x128xf32> to vector<8x128xf32>
    %915 = arith.select %554, %914, %911 : vector<8x128xi1>, vector<8x128xf32>
    %c3_462 = arith.constant 3 : index
    %c20_463 = arith.constant 20 : index
    %916 = arith.index_cast %10 : i32 to index
    %c0_464 = arith.constant 0 : index
    %917 = vector.load %arg2[%c3_462, %c20_463, %916, %c0_464] : memref<5x25x8x128xf32, #tpu.memory_space<vmem>>, vector<1x1x8x128xf32>
    %918 = vector.shape_cast %917 : vector<1x1x8x128xf32> to vector<8x128xf32>
    %919 = arith.select %556, %918, %915 : vector<8x128xi1>, vector<8x128xf32>
    %c4_465 = arith.constant 4 : index
    %c20_466 = arith.constant 20 : index
    %920 = arith.index_cast %10 : i32 to index
    %c0_467 = arith.constant 0 : index
    %921 = vector.load %arg2[%c4_465, %c20_466, %920, %c0_467] : memref<5x25x8x128xf32, #tpu.memory_space<vmem>>, vector<1x1x8x128xf32>
    %922 = vector.shape_cast %921 : vector<1x1x8x128xf32> to vector<8x128xf32>
    %923 = arith.select %558, %922, %919 : vector<8x128xi1>, vector<8x128xf32>
    %c15_468 = arith.constant 15 : index
    %c0_469 = arith.constant 0 : index
    %c0_470 = arith.constant 0 : index
    %924 = vector.load %arg5[%c15_468, %c0_469, %c0_470] : memref<20x8x128xf32, #tpu.memory_space<vmem>>, vector<1x8x128xf32>
    %925 = vector.shape_cast %924 : vector<1x8x128xf32> to vector<8x128xf32>
    %926 = vector.shape_cast %923 : vector<8x128xf32> to vector<1x8x128xf32>
    tpu.vector_store %arg5[%c15_468, %c0_469, %c0_470], %926 {strides = array<i32>} : memref<20x8x128xf32, #tpu.memory_space<vmem>>, vector<1x8x128xf32>,
    %927 = arith.maximumf %904, %923 : vector<8x128xf32>
    %c0_471 = arith.constant 0 : index
    %c21 = arith.constant 21 : index
    %928 = arith.index_cast %10 : i32 to index
    %c0_472 = arith.constant 0 : index
    %929 = vector.load %arg2[%c0_471, %c21, %928, %c0_472] : memref<5x25x8x128xf32, #tpu.memory_space<vmem>>, vector<1x1x8x128xf32>
    %930 = vector.shape_cast %929 : vector<1x1x8x128xf32> to vector<8x128xf32>
    %c1_473 = arith.constant 1 : index
    %c21_474 = arith.constant 21 : index
    %931 = arith.index_cast %10 : i32 to index
    %c0_475 = arith.constant 0 : index
    %932 = vector.load %arg2[%c1_473, %c21_474, %931, %c0_475] : memref<5x25x8x128xf32, #tpu.memory_space<vmem>>, vector<1x1x8x128xf32>
    %933 = vector.shape_cast %932 : vector<1x1x8x128xf32> to vector<8x128xf32>
    %934 = arith.select %552, %933, %930 : vector<8x128xi1>, vector<8x128xf32>
    %c2_476 = arith.constant 2 : index
    %c21_477 = arith.constant 21 : index
    %935 = arith.index_cast %10 : i32 to index
    %c0_478 = arith.constant 0 : index
    %936 = vector.load %arg2[%c2_476, %c21_477, %935, %c0_478] : memref<5x25x8x128xf32, #tpu.memory_space<vmem>>, vector<1x1x8x128xf32>
    %937 = vector.shape_cast %936 : vector<1x1x8x128xf32> to vector<8x128xf32>
    %938 = arith.select %554, %937, %934 : vector<8x128xi1>, vector<8x128xf32>
    %c3_479 = arith.constant 3 : index
    %c21_480 = arith.constant 21 : index
    %939 = arith.index_cast %10 : i32 to index
    %c0_481 = arith.constant 0 : index
    %940 = vector.load %arg2[%c3_479, %c21_480, %939, %c0_481] : memref<5x25x8x128xf32, #tpu.memory_space<vmem>>, vector<1x1x8x128xf32>
    %941 = vector.shape_cast %940 : vector<1x1x8x128xf32> to vector<8x128xf32>
    %942 = arith.select %556, %941, %938 : vector<8x128xi1>, vector<8x128xf32>
    %c4_482 = arith.constant 4 : index
    %c21_483 = arith.constant 21 : index
    %943 = arith.index_cast %10 : i32 to index
    %c0_484 = arith.constant 0 : index
    %944 = vector.load %arg2[%c4_482, %c21_483, %943, %c0_484] : memref<5x25x8x128xf32, #tpu.memory_space<vmem>>, vector<1x1x8x128xf32>
    %945 = vector.shape_cast %944 : vector<1x1x8x128xf32> to vector<8x128xf32>
    %946 = arith.select %558, %945, %942 : vector<8x128xi1>, vector<8x128xf32>
    %c16_485 = arith.constant 16 : index
    %c0_486 = arith.constant 0 : index
    %c0_487 = arith.constant 0 : index
    %947 = vector.load %arg5[%c16_485, %c0_486, %c0_487] : memref<20x8x128xf32, #tpu.memory_space<vmem>>, vector<1x8x128xf32>
    %948 = vector.shape_cast %947 : vector<1x8x128xf32> to vector<8x128xf32>
    %949 = vector.shape_cast %946 : vector<8x128xf32> to vector<1x8x128xf32>
    tpu.vector_store %arg5[%c16_485, %c0_486, %c0_487], %949 {strides = array<i32>} : memref<20x8x128xf32, #tpu.memory_space<vmem>>, vector<1x8x128xf32>,
    %950 = arith.maximumf %927, %946 : vector<8x128xf32>
    %c0_488 = arith.constant 0 : index
    %c22 = arith.constant 22 : index
    %951 = arith.index_cast %10 : i32 to index
    %c0_489 = arith.constant 0 : index
    %952 = vector.load %arg2[%c0_488, %c22, %951, %c0_489] : memref<5x25x8x128xf32, #tpu.memory_space<vmem>>, vector<1x1x8x128xf32>
    %953 = vector.shape_cast %952 : vector<1x1x8x128xf32> to vector<8x128xf32>
    %c1_490 = arith.constant 1 : index
    %c22_491 = arith.constant 22 : index
    %954 = arith.index_cast %10 : i32 to index
    %c0_492 = arith.constant 0 : index
    %955 = vector.load %arg2[%c1_490, %c22_491, %954, %c0_492] : memref<5x25x8x128xf32, #tpu.memory_space<vmem>>, vector<1x1x8x128xf32>
    %956 = vector.shape_cast %955 : vector<1x1x8x128xf32> to vector<8x128xf32>
    %957 = arith.select %552, %956, %953 : vector<8x128xi1>, vector<8x128xf32>
    %c2_493 = arith.constant 2 : index
    %c22_494 = arith.constant 22 : index
    %958 = arith.index_cast %10 : i32 to index
    %c0_495 = arith.constant 0 : index
    %959 = vector.load %arg2[%c2_493, %c22_494, %958, %c0_495] : memref<5x25x8x128xf32, #tpu.memory_space<vmem>>, vector<1x1x8x128xf32>
    %960 = vector.shape_cast %959 : vector<1x1x8x128xf32> to vector<8x128xf32>
    %961 = arith.select %554, %960, %957 : vector<8x128xi1>, vector<8x128xf32>
    %c3_496 = arith.constant 3 : index
    %c22_497 = arith.constant 22 : index
    %962 = arith.index_cast %10 : i32 to index
    %c0_498 = arith.constant 0 : index
    %963 = vector.load %arg2[%c3_496, %c22_497, %962, %c0_498] : memref<5x25x8x128xf32, #tpu.memory_space<vmem>>, vector<1x1x8x128xf32>
    %964 = vector.shape_cast %963 : vector<1x1x8x128xf32> to vector<8x128xf32>
    %965 = arith.select %556, %964, %961 : vector<8x128xi1>, vector<8x128xf32>
    %c4_499 = arith.constant 4 : index
    %c22_500 = arith.constant 22 : index
    %966 = arith.index_cast %10 : i32 to index
    %c0_501 = arith.constant 0 : index
    %967 = vector.load %arg2[%c4_499, %c22_500, %966, %c0_501] : memref<5x25x8x128xf32, #tpu.memory_space<vmem>>, vector<1x1x8x128xf32>
    %968 = vector.shape_cast %967 : vector<1x1x8x128xf32> to vector<8x128xf32>
    %969 = arith.select %558, %968, %965 : vector<8x128xi1>, vector<8x128xf32>
    %c17_502 = arith.constant 17 : index
    %c0_503 = arith.constant 0 : index
    %c0_504 = arith.constant 0 : index
    %970 = vector.load %arg5[%c17_502, %c0_503, %c0_504] : memref<20x8x128xf32, #tpu.memory_space<vmem>>, vector<1x8x128xf32>
    %971 = vector.shape_cast %970 : vector<1x8x128xf32> to vector<8x128xf32>
    %972 = vector.shape_cast %969 : vector<8x128xf32> to vector<1x8x128xf32>
    tpu.vector_store %arg5[%c17_502, %c0_503, %c0_504], %972 {strides = array<i32>} : memref<20x8x128xf32, #tpu.memory_space<vmem>>, vector<1x8x128xf32>,
    %973 = arith.maximumf %950, %969 : vector<8x128xf32>
    %c0_505 = arith.constant 0 : index
    %c23 = arith.constant 23 : index
    %974 = arith.index_cast %10 : i32 to index
    %c0_506 = arith.constant 0 : index
    %975 = vector.load %arg2[%c0_505, %c23, %974, %c0_506] : memref<5x25x8x128xf32, #tpu.memory_space<vmem>>, vector<1x1x8x128xf32>
    %976 = vector.shape_cast %975 : vector<1x1x8x128xf32> to vector<8x128xf32>
    %c1_507 = arith.constant 1 : index
    %c23_508 = arith.constant 23 : index
    %977 = arith.index_cast %10 : i32 to index
    %c0_509 = arith.constant 0 : index
    %978 = vector.load %arg2[%c1_507, %c23_508, %977, %c0_509] : memref<5x25x8x128xf32, #tpu.memory_space<vmem>>, vector<1x1x8x128xf32>
    %979 = vector.shape_cast %978 : vector<1x1x8x128xf32> to vector<8x128xf32>
    %980 = arith.select %552, %979, %976 : vector<8x128xi1>, vector<8x128xf32>
    %c2_510 = arith.constant 2 : index
    %c23_511 = arith.constant 23 : index
    %981 = arith.index_cast %10 : i32 to index
    %c0_512 = arith.constant 0 : index
    %982 = vector.load %arg2[%c2_510, %c23_511, %981, %c0_512] : memref<5x25x8x128xf32, #tpu.memory_space<vmem>>, vector<1x1x8x128xf32>
    %983 = vector.shape_cast %982 : vector<1x1x8x128xf32> to vector<8x128xf32>
    %984 = arith.select %554, %983, %980 : vector<8x128xi1>, vector<8x128xf32>
    %c3_513 = arith.constant 3 : index
    %c23_514 = arith.constant 23 : index
    %985 = arith.index_cast %10 : i32 to index
    %c0_515 = arith.constant 0 : index
    %986 = vector.load %arg2[%c3_513, %c23_514, %985, %c0_515] : memref<5x25x8x128xf32, #tpu.memory_space<vmem>>, vector<1x1x8x128xf32>
    %987 = vector.shape_cast %986 : vector<1x1x8x128xf32> to vector<8x128xf32>
    %988 = arith.select %556, %987, %984 : vector<8x128xi1>, vector<8x128xf32>
    %c4_516 = arith.constant 4 : index
    %c23_517 = arith.constant 23 : index
    %989 = arith.index_cast %10 : i32 to index
    %c0_518 = arith.constant 0 : index
    %990 = vector.load %arg2[%c4_516, %c23_517, %989, %c0_518] : memref<5x25x8x128xf32, #tpu.memory_space<vmem>>, vector<1x1x8x128xf32>
    %991 = vector.shape_cast %990 : vector<1x1x8x128xf32> to vector<8x128xf32>
    %992 = arith.select %558, %991, %988 : vector<8x128xi1>, vector<8x128xf32>
    %c18_519 = arith.constant 18 : index
    %c0_520 = arith.constant 0 : index
    %c0_521 = arith.constant 0 : index
    %993 = vector.load %arg5[%c18_519, %c0_520, %c0_521] : memref<20x8x128xf32, #tpu.memory_space<vmem>>, vector<1x8x128xf32>
    %994 = vector.shape_cast %993 : vector<1x8x128xf32> to vector<8x128xf32>
    %995 = vector.shape_cast %992 : vector<8x128xf32> to vector<1x8x128xf32>
    tpu.vector_store %arg5[%c18_519, %c0_520, %c0_521], %995 {strides = array<i32>} : memref<20x8x128xf32, #tpu.memory_space<vmem>>, vector<1x8x128xf32>,
    %996 = arith.maximumf %973, %992 : vector<8x128xf32>
    %c0_522 = arith.constant 0 : index
    %c24 = arith.constant 24 : index
    %997 = arith.index_cast %10 : i32 to index
    %c0_523 = arith.constant 0 : index
    %998 = vector.load %arg2[%c0_522, %c24, %997, %c0_523] : memref<5x25x8x128xf32, #tpu.memory_space<vmem>>, vector<1x1x8x128xf32>
    %999 = vector.shape_cast %998 : vector<1x1x8x128xf32> to vector<8x128xf32>
    %c1_524 = arith.constant 1 : index
    %c24_525 = arith.constant 24 : index
    %1000 = arith.index_cast %10 : i32 to index
    %c0_526 = arith.constant 0 : index
    %1001 = vector.load %arg2[%c1_524, %c24_525, %1000, %c0_526] : memref<5x25x8x128xf32, #tpu.memory_space<vmem>>, vector<1x1x8x128xf32>
    %1002 = vector.shape_cast %1001 : vector<1x1x8x128xf32> to vector<8x128xf32>
    %1003 = arith.select %552, %1002, %999 : vector<8x128xi1>, vector<8x128xf32>
    %c2_527 = arith.constant 2 : index
    %c24_528 = arith.constant 24 : index
    %1004 = arith.index_cast %10 : i32 to index
    %c0_529 = arith.constant 0 : index
    %1005 = vector.load %arg2[%c2_527, %c24_528, %1004, %c0_529] : memref<5x25x8x128xf32, #tpu.memory_space<vmem>>, vector<1x1x8x128xf32>
    %1006 = vector.shape_cast %1005 : vector<1x1x8x128xf32> to vector<8x128xf32>
    %1007 = arith.select %554, %1006, %1003 : vector<8x128xi1>, vector<8x128xf32>
    %c3_530 = arith.constant 3 : index
    %c24_531 = arith.constant 24 : index
    %1008 = arith.index_cast %10 : i32 to index
    %c0_532 = arith.constant 0 : index
    %1009 = vector.load %arg2[%c3_530, %c24_531, %1008, %c0_532] : memref<5x25x8x128xf32, #tpu.memory_space<vmem>>, vector<1x1x8x128xf32>
    %1010 = vector.shape_cast %1009 : vector<1x1x8x128xf32> to vector<8x128xf32>
    %1011 = arith.select %556, %1010, %1007 : vector<8x128xi1>, vector<8x128xf32>
    %c4_533 = arith.constant 4 : index
    %c24_534 = arith.constant 24 : index
    %1012 = arith.index_cast %10 : i32 to index
    %c0_535 = arith.constant 0 : index
    %1013 = vector.load %arg2[%c4_533, %c24_534, %1012, %c0_535] : memref<5x25x8x128xf32, #tpu.memory_space<vmem>>, vector<1x1x8x128xf32>
    %1014 = vector.shape_cast %1013 : vector<1x1x8x128xf32> to vector<8x128xf32>
    %1015 = arith.select %558, %1014, %1011 : vector<8x128xi1>, vector<8x128xf32>
    %c19_536 = arith.constant 19 : index
    %c0_537 = arith.constant 0 : index
    %c0_538 = arith.constant 0 : index
    %1016 = vector.load %arg5[%c19_536, %c0_537, %c0_538] : memref<20x8x128xf32, #tpu.memory_space<vmem>>, vector<1x8x128xf32>
    %1017 = vector.shape_cast %1016 : vector<1x8x128xf32> to vector<8x128xf32>
    %1018 = vector.shape_cast %1015 : vector<8x128xf32> to vector<1x8x128xf32>
    tpu.vector_store %arg5[%c19_536, %c0_537, %c0_538], %1018 {strides = array<i32>} : memref<20x8x128xf32, #tpu.memory_space<vmem>>, vector<1x8x128xf32>,
    %1019 = arith.maximumf %996, %1015 : vector<8x128xf32>
    %c0_539 = arith.constant 0 : index
    %c0_540 = arith.constant 0 : index
    %c0_541 = arith.constant 0 : index
    %1020 = vector.load %arg5[%c0_539, %c0_540, %c0_541] : memref<20x8x128xf32, #tpu.memory_space<vmem>>, vector<1x8x128xf32>
    %1021 = vector.shape_cast %1020 : vector<1x8x128xf32> to vector<8x128xf32>
    %1022 = arith.subf %1021, %1019 : vector<8x128xf32>
    %c5_542 = arith.constant 5 : index
    %1023 = arith.index_cast %10 : i32 to index
    %c0_543 = arith.constant 0 : index
    %1024 = vector.load %arg3[%c5_542, %1023, %c0_543] : memref<25x8x128xf32, #tpu.memory_space<vmem>>, vector<1x8x128xf32>
    %1025 = vector.shape_cast %1024 : vector<1x8x128xf32> to vector<8x128xf32>
    %1026 = math.exp %1022 : vector<8x128xf32>
    %1027 = arith.addf %3, %1026 : vector<8x128xf32>
    %1028 = arith.mulf %1025, %1022 : vector<8x128xf32>
    %1029 = arith.addf %3, %1028 : vector<8x128xf32>
    %1030 = arith.addf %3, %1025 : vector<8x128xf32>
    %c1_544 = arith.constant 1 : index
    %c0_545 = arith.constant 0 : index
    %c0_546 = arith.constant 0 : index
    %1031 = vector.load %arg5[%c1_544, %c0_545, %c0_546] : memref<20x8x128xf32, #tpu.memory_space<vmem>>, vector<1x8x128xf32>
    %1032 = vector.shape_cast %1031 : vector<1x8x128xf32> to vector<8x128xf32>
    %1033 = arith.subf %1032, %1019 : vector<8x128xf32>
    %c6_547 = arith.constant 6 : index
    %1034 = arith.index_cast %10 : i32 to index
    %c0_548 = arith.constant 0 : index
    %1035 = vector.load %arg3[%c6_547, %1034, %c0_548] : memref<25x8x128xf32, #tpu.memory_space<vmem>>, vector<1x8x128xf32>
    %1036 = vector.shape_cast %1035 : vector<1x8x128xf32> to vector<8x128xf32>
    %1037 = math.exp %1033 : vector<8x128xf32>
    %1038 = arith.addf %1027, %1037 : vector<8x128xf32>
    %1039 = arith.mulf %1036, %1033 : vector<8x128xf32>
    %1040 = arith.addf %1029, %1039 : vector<8x128xf32>
    %1041 = arith.addf %1030, %1036 : vector<8x128xf32>
    %c2_549 = arith.constant 2 : index
    %c0_550 = arith.constant 0 : index
    %c0_551 = arith.constant 0 : index
    %1042 = vector.load %arg5[%c2_549, %c0_550, %c0_551] : memref<20x8x128xf32, #tpu.memory_space<vmem>>, vector<1x8x128xf32>
    %1043 = vector.shape_cast %1042 : vector<1x8x128xf32> to vector<8x128xf32>
    %1044 = arith.subf %1043, %1019 : vector<8x128xf32>
    %c7_552 = arith.constant 7 : index
    %1045 = arith.index_cast %10 : i32 to index
    %c0_553 = arith.constant 0 : index
    %1046 = vector.load %arg3[%c7_552, %1045, %c0_553] : memref<25x8x128xf32, #tpu.memory_space<vmem>>, vector<1x8x128xf32>
    %1047 = vector.shape_cast %1046 : vector<1x8x128xf32> to vector<8x128xf32>
    %1048 = math.exp %1044 : vector<8x128xf32>
    %1049 = arith.addf %1038, %1048 : vector<8x128xf32>
    %1050 = arith.mulf %1047, %1044 : vector<8x128xf32>
    %1051 = arith.addf %1040, %1050 : vector<8x128xf32>
    %1052 = arith.addf %1041, %1047 : vector<8x128xf32>
    %c3_554 = arith.constant 3 : index
    %c0_555 = arith.constant 0 : index
    %c0_556 = arith.constant 0 : index
    %1053 = vector.load %arg5[%c3_554, %c0_555, %c0_556] : memref<20x8x128xf32, #tpu.memory_space<vmem>>, vector<1x8x128xf32>
    %1054 = vector.shape_cast %1053 : vector<1x8x128xf32> to vector<8x128xf32>
    %1055 = arith.subf %1054, %1019 : vector<8x128xf32>
    %c8_557 = arith.constant 8 : index
    %1056 = arith.index_cast %10 : i32 to index
    %c0_558 = arith.constant 0 : index
    %1057 = vector.load %arg3[%c8_557, %1056, %c0_558] : memref<25x8x128xf32, #tpu.memory_space<vmem>>, vector<1x8x128xf32>
    %1058 = vector.shape_cast %1057 : vector<1x8x128xf32> to vector<8x128xf32>
    %1059 = math.exp %1055 : vector<8x128xf32>
    %1060 = arith.addf %1049, %1059 : vector<8x128xf32>
    %1061 = arith.mulf %1058, %1055 : vector<8x128xf32>
    %1062 = arith.addf %1051, %1061 : vector<8x128xf32>
    %1063 = arith.addf %1052, %1058 : vector<8x128xf32>
    %c4_559 = arith.constant 4 : index
    %c0_560 = arith.constant 0 : index
    %c0_561 = arith.constant 0 : index
    %1064 = vector.load %arg5[%c4_559, %c0_560, %c0_561] : memref<20x8x128xf32, #tpu.memory_space<vmem>>, vector<1x8x128xf32>
    %1065 = vector.shape_cast %1064 : vector<1x8x128xf32> to vector<8x128xf32>
    %1066 = arith.subf %1065, %1019 : vector<8x128xf32>
    %c9_562 = arith.constant 9 : index
    %1067 = arith.index_cast %10 : i32 to index
    %c0_563 = arith.constant 0 : index
    %1068 = vector.load %arg3[%c9_562, %1067, %c0_563] : memref<25x8x128xf32, #tpu.memory_space<vmem>>, vector<1x8x128xf32>
    %1069 = vector.shape_cast %1068 : vector<1x8x128xf32> to vector<8x128xf32>
    %1070 = math.exp %1066 : vector<8x128xf32>
    %1071 = arith.addf %1060, %1070 : vector<8x128xf32>
    %1072 = arith.mulf %1069, %1066 : vector<8x128xf32>
    %1073 = arith.addf %1062, %1072 : vector<8x128xf32>
    %1074 = arith.addf %1063, %1069 : vector<8x128xf32>
    %c5_564 = arith.constant 5 : index
    %c0_565 = arith.constant 0 : index
    %c0_566 = arith.constant 0 : index
    %1075 = vector.load %arg5[%c5_564, %c0_565, %c0_566] : memref<20x8x128xf32, #tpu.memory_space<vmem>>, vector<1x8x128xf32>
    %1076 = vector.shape_cast %1075 : vector<1x8x128xf32> to vector<8x128xf32>
    %1077 = arith.subf %1076, %1019 : vector<8x128xf32>
    %c10_567 = arith.constant 10 : index
    %1078 = arith.index_cast %10 : i32 to index
    %c0_568 = arith.constant 0 : index
    %1079 = vector.load %arg3[%c10_567, %1078, %c0_568] : memref<25x8x128xf32, #tpu.memory_space<vmem>>, vector<1x8x128xf32>
    %1080 = vector.shape_cast %1079 : vector<1x8x128xf32> to vector<8x128xf32>
    %1081 = math.exp %1077 : vector<8x128xf32>
    %1082 = arith.addf %1071, %1081 : vector<8x128xf32>
    %1083 = arith.mulf %1080, %1077 : vector<8x128xf32>
    %1084 = arith.addf %1073, %1083 : vector<8x128xf32>
    %1085 = arith.addf %1074, %1080 : vector<8x128xf32>
    %c6_569 = arith.constant 6 : index
    %c0_570 = arith.constant 0 : index
    %c0_571 = arith.constant 0 : index
    %1086 = vector.load %arg5[%c6_569, %c0_570, %c0_571] : memref<20x8x128xf32, #tpu.memory_space<vmem>>, vector<1x8x128xf32>
    %1087 = vector.shape_cast %1086 : vector<1x8x128xf32> to vector<8x128xf32>
    %1088 = arith.subf %1087, %1019 : vector<8x128xf32>
    %c11_572 = arith.constant 11 : index
    %1089 = arith.index_cast %10 : i32 to index
    %c0_573 = arith.constant 0 : index
    %1090 = vector.load %arg3[%c11_572, %1089, %c0_573] : memref<25x8x128xf32, #tpu.memory_space<vmem>>, vector<1x8x128xf32>
    %1091 = vector.shape_cast %1090 : vector<1x8x128xf32> to vector<8x128xf32>
    %1092 = math.exp %1088 : vector<8x128xf32>
    %1093 = arith.addf %1082, %1092 : vector<8x128xf32>
    %1094 = arith.mulf %1091, %1088 : vector<8x128xf32>
    %1095 = arith.addf %1084, %1094 : vector<8x128xf32>
    %1096 = arith.addf %1085, %1091 : vector<8x128xf32>
    %c7_574 = arith.constant 7 : index
    %c0_575 = arith.constant 0 : index
    %c0_576 = arith.constant 0 : index
    %1097 = vector.load %arg5[%c7_574, %c0_575, %c0_576] : memref<20x8x128xf32, #tpu.memory_space<vmem>>, vector<1x8x128xf32>
    %1098 = vector.shape_cast %1097 : vector<1x8x128xf32> to vector<8x128xf32>
    %1099 = arith.subf %1098, %1019 : vector<8x128xf32>
    %c12_577 = arith.constant 12 : index
    %1100 = arith.index_cast %10 : i32 to index
    %c0_578 = arith.constant 0 : index
    %1101 = vector.load %arg3[%c12_577, %1100, %c0_578] : memref<25x8x128xf32, #tpu.memory_space<vmem>>, vector<1x8x128xf32>
    %1102 = vector.shape_cast %1101 : vector<1x8x128xf32> to vector<8x128xf32>
    %1103 = math.exp %1099 : vector<8x128xf32>
    %1104 = arith.addf %1093, %1103 : vector<8x128xf32>
    %1105 = arith.mulf %1102, %1099 : vector<8x128xf32>
    %1106 = arith.addf %1095, %1105 : vector<8x128xf32>
    %1107 = arith.addf %1096, %1102 : vector<8x128xf32>
    %c8_579 = arith.constant 8 : index
    %c0_580 = arith.constant 0 : index
    %c0_581 = arith.constant 0 : index
    %1108 = vector.load %arg5[%c8_579, %c0_580, %c0_581] : memref<20x8x128xf32, #tpu.memory_space<vmem>>, vector<1x8x128xf32>
    %1109 = vector.shape_cast %1108 : vector<1x8x128xf32> to vector<8x128xf32>
    %1110 = arith.subf %1109, %1019 : vector<8x128xf32>
    %c13_582 = arith.constant 13 : index
    %1111 = arith.index_cast %10 : i32 to index
    %c0_583 = arith.constant 0 : index
    %1112 = vector.load %arg3[%c13_582, %1111, %c0_583] : memref<25x8x128xf32, #tpu.memory_space<vmem>>, vector<1x8x128xf32>
    %1113 = vector.shape_cast %1112 : vector<1x8x128xf32> to vector<8x128xf32>
    %1114 = math.exp %1110 : vector<8x128xf32>
    %1115 = arith.addf %1104, %1114 : vector<8x128xf32>
    %1116 = arith.mulf %1113, %1110 : vector<8x128xf32>
    %1117 = arith.addf %1106, %1116 : vector<8x128xf32>
    %1118 = arith.addf %1107, %1113 : vector<8x128xf32>
    %c9_584 = arith.constant 9 : index
    %c0_585 = arith.constant 0 : index
    %c0_586 = arith.constant 0 : index
    %1119 = vector.load %arg5[%c9_584, %c0_585, %c0_586] : memref<20x8x128xf32, #tpu.memory_space<vmem>>, vector<1x8x128xf32>
    %1120 = vector.shape_cast %1119 : vector<1x8x128xf32> to vector<8x128xf32>
    %1121 = arith.subf %1120, %1019 : vector<8x128xf32>
    %c14_587 = arith.constant 14 : index
    %1122 = arith.index_cast %10 : i32 to index
    %c0_588 = arith.constant 0 : index
    %1123 = vector.load %arg3[%c14_587, %1122, %c0_588] : memref<25x8x128xf32, #tpu.memory_space<vmem>>, vector<1x8x128xf32>
    %1124 = vector.shape_cast %1123 : vector<1x8x128xf32> to vector<8x128xf32>
    %1125 = math.exp %1121 : vector<8x128xf32>
    %1126 = arith.addf %1115, %1125 : vector<8x128xf32>
    %1127 = arith.mulf %1124, %1121 : vector<8x128xf32>
    %1128 = arith.addf %1117, %1127 : vector<8x128xf32>
    %1129 = arith.addf %1118, %1124 : vector<8x128xf32>
    %c10_589 = arith.constant 10 : index
    %c0_590 = arith.constant 0 : index
    %c0_591 = arith.constant 0 : index
    %1130 = vector.load %arg5[%c10_589, %c0_590, %c0_591] : memref<20x8x128xf32, #tpu.memory_space<vmem>>, vector<1x8x128xf32>
    %1131 = vector.shape_cast %1130 : vector<1x8x128xf32> to vector<8x128xf32>
    %1132 = arith.subf %1131, %1019 : vector<8x128xf32>
    %c15_592 = arith.constant 15 : index
    %1133 = arith.index_cast %10 : i32 to index
    %c0_593 = arith.constant 0 : index
    %1134 = vector.load %arg3[%c15_592, %1133, %c0_593] : memref<25x8x128xf32, #tpu.memory_space<vmem>>, vector<1x8x128xf32>
    %1135 = vector.shape_cast %1134 : vector<1x8x128xf32> to vector<8x128xf32>
    %1136 = math.exp %1132 : vector<8x128xf32>
    %1137 = arith.addf %1126, %1136 : vector<8x128xf32>
    %1138 = arith.mulf %1135, %1132 : vector<8x128xf32>
    %1139 = arith.addf %1128, %1138 : vector<8x128xf32>
    %1140 = arith.addf %1129, %1135 : vector<8x128xf32>
    %c11_594 = arith.constant 11 : index
    %c0_595 = arith.constant 0 : index
    %c0_596 = arith.constant 0 : index
    %1141 = vector.load %arg5[%c11_594, %c0_595, %c0_596] : memref<20x8x128xf32, #tpu.memory_space<vmem>>, vector<1x8x128xf32>
    %1142 = vector.shape_cast %1141 : vector<1x8x128xf32> to vector<8x128xf32>
    %1143 = arith.subf %1142, %1019 : vector<8x128xf32>
    %c16_597 = arith.constant 16 : index
    %1144 = arith.index_cast %10 : i32 to index
    %c0_598 = arith.constant 0 : index
    %1145 = vector.load %arg3[%c16_597, %1144, %c0_598] : memref<25x8x128xf32, #tpu.memory_space<vmem>>, vector<1x8x128xf32>
    %1146 = vector.shape_cast %1145 : vector<1x8x128xf32> to vector<8x128xf32>
    %1147 = math.exp %1143 : vector<8x128xf32>
    %1148 = arith.addf %1137, %1147 : vector<8x128xf32>
    %1149 = arith.mulf %1146, %1143 : vector<8x128xf32>
    %1150 = arith.addf %1139, %1149 : vector<8x128xf32>
    %1151 = arith.addf %1140, %1146 : vector<8x128xf32>
    %c12_599 = arith.constant 12 : index
    %c0_600 = arith.constant 0 : index
    %c0_601 = arith.constant 0 : index
    %1152 = vector.load %arg5[%c12_599, %c0_600, %c0_601] : memref<20x8x128xf32, #tpu.memory_space<vmem>>, vector<1x8x128xf32>
    %1153 = vector.shape_cast %1152 : vector<1x8x128xf32> to vector<8x128xf32>
    %1154 = arith.subf %1153, %1019 : vector<8x128xf32>
    %c17_602 = arith.constant 17 : index
    %1155 = arith.index_cast %10 : i32 to index
    %c0_603 = arith.constant 0 : index
    %1156 = vector.load %arg3[%c17_602, %1155, %c0_603] : memref<25x8x128xf32, #tpu.memory_space<vmem>>, vector<1x8x128xf32>
    %1157 = vector.shape_cast %1156 : vector<1x8x128xf32> to vector<8x128xf32>
    %1158 = math.exp %1154 : vector<8x128xf32>
    %1159 = arith.addf %1148, %1158 : vector<8x128xf32>
    %1160 = arith.mulf %1157, %1154 : vector<8x128xf32>
    %1161 = arith.addf %1150, %1160 : vector<8x128xf32>
    %1162 = arith.addf %1151, %1157 : vector<8x128xf32>
    %c13_604 = arith.constant 13 : index
    %c0_605 = arith.constant 0 : index
    %c0_606 = arith.constant 0 : index
    %1163 = vector.load %arg5[%c13_604, %c0_605, %c0_606] : memref<20x8x128xf32, #tpu.memory_space<vmem>>, vector<1x8x128xf32>
    %1164 = vector.shape_cast %1163 : vector<1x8x128xf32> to vector<8x128xf32>
    %1165 = arith.subf %1164, %1019 : vector<8x128xf32>
    %c18_607 = arith.constant 18 : index
    %1166 = arith.index_cast %10 : i32 to index
    %c0_608 = arith.constant 0 : index
    %1167 = vector.load %arg3[%c18_607, %1166, %c0_608] : memref<25x8x128xf32, #tpu.memory_space<vmem>>, vector<1x8x128xf32>
    %1168 = vector.shape_cast %1167 : vector<1x8x128xf32> to vector<8x128xf32>
    %1169 = math.exp %1165 : vector<8x128xf32>
    %1170 = arith.addf %1159, %1169 : vector<8x128xf32>
    %1171 = arith.mulf %1168, %1165 : vector<8x128xf32>
    %1172 = arith.addf %1161, %1171 : vector<8x128xf32>
    %1173 = arith.addf %1162, %1168 : vector<8x128xf32>
    %c14_609 = arith.constant 14 : index
    %c0_610 = arith.constant 0 : index
    %c0_611 = arith.constant 0 : index
    %1174 = vector.load %arg5[%c14_609, %c0_610, %c0_611] : memref<20x8x128xf32, #tpu.memory_space<vmem>>, vector<1x8x128xf32>
    %1175 = vector.shape_cast %1174 : vector<1x8x128xf32> to vector<8x128xf32>
    %1176 = arith.subf %1175, %1019 : vector<8x128xf32>
    %c19_612 = arith.constant 19 : index
    %1177 = arith.index_cast %10 : i32 to index
    %c0_613 = arith.constant 0 : index
    %1178 = vector.load %arg3[%c19_612, %1177, %c0_613] : memref<25x8x128xf32, #tpu.memory_space<vmem>>, vector<1x8x128xf32>
    %1179 = vector.shape_cast %1178 : vector<1x8x128xf32> to vector<8x128xf32>
    %1180 = math.exp %1176 : vector<8x128xf32>
    %1181 = arith.addf %1170, %1180 : vector<8x128xf32>
    %1182 = arith.mulf %1179, %1176 : vector<8x128xf32>
    %1183 = arith.addf %1172, %1182 : vector<8x128xf32>
    %1184 = arith.addf %1173, %1179 : vector<8x128xf32>
    %c15_614 = arith.constant 15 : index
    %c0_615 = arith.constant 0 : index
    %c0_616 = arith.constant 0 : index
    %1185 = vector.load %arg5[%c15_614, %c0_615, %c0_616] : memref<20x8x128xf32, #tpu.memory_space<vmem>>, vector<1x8x128xf32>
    %1186 = vector.shape_cast %1185 : vector<1x8x128xf32> to vector<8x128xf32>
    %1187 = arith.subf %1186, %1019 : vector<8x128xf32>
    %c20_617 = arith.constant 20 : index
    %1188 = arith.index_cast %10 : i32 to index
    %c0_618 = arith.constant 0 : index
    %1189 = vector.load %arg3[%c20_617, %1188, %c0_618] : memref<25x8x128xf32, #tpu.memory_space<vmem>>, vector<1x8x128xf32>
    %1190 = vector.shape_cast %1189 : vector<1x8x128xf32> to vector<8x128xf32>
    %1191 = math.exp %1187 : vector<8x128xf32>
    %1192 = arith.addf %1181, %1191 : vector<8x128xf32>
    %1193 = arith.mulf %1190, %1187 : vector<8x128xf32>
    %1194 = arith.addf %1183, %1193 : vector<8x128xf32>
    %1195 = arith.addf %1184, %1190 : vector<8x128xf32>
    %c16_619 = arith.constant 16 : index
    %c0_620 = arith.constant 0 : index
    %c0_621 = arith.constant 0 : index
    %1196 = vector.load %arg5[%c16_619, %c0_620, %c0_621] : memref<20x8x128xf32, #tpu.memory_space<vmem>>, vector<1x8x128xf32>
    %1197 = vector.shape_cast %1196 : vector<1x8x128xf32> to vector<8x128xf32>
    %1198 = arith.subf %1197, %1019 : vector<8x128xf32>
    %c21_622 = arith.constant 21 : index
    %1199 = arith.index_cast %10 : i32 to index
    %c0_623 = arith.constant 0 : index
    %1200 = vector.load %arg3[%c21_622, %1199, %c0_623] : memref<25x8x128xf32, #tpu.memory_space<vmem>>, vector<1x8x128xf32>
    %1201 = vector.shape_cast %1200 : vector<1x8x128xf32> to vector<8x128xf32>
    %1202 = math.exp %1198 : vector<8x128xf32>
    %1203 = arith.addf %1192, %1202 : vector<8x128xf32>
    %1204 = arith.mulf %1201, %1198 : vector<8x128xf32>
    %1205 = arith.addf %1194, %1204 : vector<8x128xf32>
    %1206 = arith.addf %1195, %1201 : vector<8x128xf32>
    %c17_624 = arith.constant 17 : index
    %c0_625 = arith.constant 0 : index
    %c0_626 = arith.constant 0 : index
    %1207 = vector.load %arg5[%c17_624, %c0_625, %c0_626] : memref<20x8x128xf32, #tpu.memory_space<vmem>>, vector<1x8x128xf32>
    %1208 = vector.shape_cast %1207 : vector<1x8x128xf32> to vector<8x128xf32>
    %1209 = arith.subf %1208, %1019 : vector<8x128xf32>
    %c22_627 = arith.constant 22 : index
    %1210 = arith.index_cast %10 : i32 to index
    %c0_628 = arith.constant 0 : index
    %1211 = vector.load %arg3[%c22_627, %1210, %c0_628] : memref<25x8x128xf32, #tpu.memory_space<vmem>>, vector<1x8x128xf32>
    %1212 = vector.shape_cast %1211 : vector<1x8x128xf32> to vector<8x128xf32>
    %1213 = math.exp %1209 : vector<8x128xf32>
    %1214 = arith.addf %1203, %1213 : vector<8x128xf32>
    %1215 = arith.mulf %1212, %1209 : vector<8x128xf32>
    %1216 = arith.addf %1205, %1215 : vector<8x128xf32>
    %1217 = arith.addf %1206, %1212 : vector<8x128xf32>
    %c18_629 = arith.constant 18 : index
    %c0_630 = arith.constant 0 : index
    %c0_631 = arith.constant 0 : index
    %1218 = vector.load %arg5[%c18_629, %c0_630, %c0_631] : memref<20x8x128xf32, #tpu.memory_space<vmem>>, vector<1x8x128xf32>
    %1219 = vector.shape_cast %1218 : vector<1x8x128xf32> to vector<8x128xf32>
    %1220 = arith.subf %1219, %1019 : vector<8x128xf32>
    %c23_632 = arith.constant 23 : index
    %1221 = arith.index_cast %10 : i32 to index
    %c0_633 = arith.constant 0 : index
    %1222 = vector.load %arg3[%c23_632, %1221, %c0_633] : memref<25x8x128xf32, #tpu.memory_space<vmem>>, vector<1x8x128xf32>
    %1223 = vector.shape_cast %1222 : vector<1x8x128xf32> to vector<8x128xf32>
    %1224 = math.exp %1220 : vector<8x128xf32>
    %1225 = arith.addf %1214, %1224 : vector<8x128xf32>
    %1226 = arith.mulf %1223, %1220 : vector<8x128xf32>
    %1227 = arith.addf %1216, %1226 : vector<8x128xf32>
    %1228 = arith.addf %1217, %1223 : vector<8x128xf32>
    %c19_634 = arith.constant 19 : index
    %c0_635 = arith.constant 0 : index
    %c0_636 = arith.constant 0 : index
    %1229 = vector.load %arg5[%c19_634, %c0_635, %c0_636] : memref<20x8x128xf32, #tpu.memory_space<vmem>>, vector<1x8x128xf32>
    %1230 = vector.shape_cast %1229 : vector<1x8x128xf32> to vector<8x128xf32>
    %1231 = arith.subf %1230, %1019 : vector<8x128xf32>
    %c24_637 = arith.constant 24 : index
    %1232 = arith.index_cast %10 : i32 to index
    %c0_638 = arith.constant 0 : index
    %1233 = vector.load %arg3[%c24_637, %1232, %c0_638] : memref<25x8x128xf32, #tpu.memory_space<vmem>>, vector<1x8x128xf32>
    %1234 = vector.shape_cast %1233 : vector<1x8x128xf32> to vector<8x128xf32>
    %1235 = math.exp %1231 : vector<8x128xf32>
    %1236 = arith.addf %1225, %1235 : vector<8x128xf32>
    %1237 = arith.mulf %1234, %1231 : vector<8x128xf32>
    %1238 = arith.addf %1227, %1237 : vector<8x128xf32>
    %1239 = arith.addf %1228, %1234 : vector<8x128xf32>
    %1240 = math.log %1236 : vector<8x128xf32>
    %1241 = arith.mulf %1239, %1240 : vector<8x128xf32>
    %1242 = arith.subf %1241, %1238 : vector<8x128xf32>
    %1243 = arith.select %54, %531, %3 : vector<8x128xi1>, vector<8x128xf32>
    %1244 = arith.addf %3, %1243 : vector<8x128xf32>
    %1245 = arith.select %54, %544, %3 : vector<8x128xi1>, vector<8x128xf32>
    %1246 = arith.addf %3, %1245 : vector<8x128xf32>
    %1247 = arith.select %54, %546, %3 : vector<8x128xi1>, vector<8x128xf32>
    %1248 = arith.addf %3, %1247 : vector<8x128xf32>
    %1249 = arith.select %58, %550, %3 : vector<8x128xi1>, vector<8x128xf32>
    %1250 = arith.addf %3, %1249 : vector<8x128xf32>
    %1251 = arith.select %54, %1242, %3 : vector<8x128xi1>, vector<8x128xf32>
    %1252 = arith.addf %3, %1251 : vector<8x128xf32>
    %1253 = arith.extui %54 : vector<8x128xi1> to vector<8x128xi32>
    %1254 = arith.sitofp %1253 : vector<8x128xi32> to vector<8x128xf32>
    %1255 = arith.addf %3, %1254 : vector<8x128xf32>
    %1256 = arith.extui %58 : vector<8x128xi1> to vector<8x128xi32>
    %1257 = arith.sitofp %1256 : vector<8x128xi32> to vector<8x128xf32>
    %1258 = arith.addf %3, %1257 : vector<8x128xf32>
    %c1_i32_639 = arith.constant 1 : i32
    %c0_640 = arith.constant 0 : index
    %c0_641 = arith.constant 0 : index
    %c0_642 = arith.constant 0 : index
    %1259 = vector.load %arg4[%c0_640, %c0_641, %c0_642] : memref<7x8x128xf32, #tpu.memory_space<vmem>>, vector<1x8x128xf32>
    %1260 = vector.shape_cast %1259 : vector<1x8x128xf32> to vector<8x128xf32>
    %1261 = arith.addf %1260, %1244 : vector<8x128xf32>
    %c0_643 = arith.constant 0 : index
    %c0_644 = arith.constant 0 : index
    %c0_645 = arith.constant 0 : index
    %1262 = vector.load %arg4[%c0_643, %c0_644, %c0_645] : memref<7x8x128xf32, #tpu.memory_space<vmem>>, vector<1x8x128xf32>
    %1263 = vector.shape_cast %1262 : vector<1x8x128xf32> to vector<8x128xf32>
    %1264 = vector.shape_cast %1261 : vector<8x128xf32> to vector<1x8x128xf32>
    tpu.vector_store %arg4[%c0_643, %c0_644, %c0_645], %1264 {strides = array<i32>} : memref<7x8x128xf32, #tpu.memory_space<vmem>>, vector<1x8x128xf32>,
    %c1_646 = arith.constant 1 : index
    %c0_647 = arith.constant 0 : index
    %c0_648 = arith.constant 0 : index
    %1265 = vector.load %arg4[%c1_646, %c0_647, %c0_648] : memref<7x8x128xf32, #tpu.memory_space<vmem>>, vector<1x8x128xf32>
    %1266 = vector.shape_cast %1265 : vector<1x8x128xf32> to vector<8x128xf32>
    %1267 = arith.addf %1266, %1246 : vector<8x128xf32>
    %c1_649 = arith.constant 1 : index
    %c0_650 = arith.constant 0 : index
    %c0_651 = arith.constant 0 : index
    %1268 = vector.load %arg4[%c1_649, %c0_650, %c0_651] : memref<7x8x128xf32, #tpu.memory_space<vmem>>, vector<1x8x128xf32>
    %1269 = vector.shape_cast %1268 : vector<1x8x128xf32> to vector<8x128xf32>
    %1270 = vector.shape_cast %1267 : vector<8x128xf32> to vector<1x8x128xf32>
    tpu.vector_store %arg4[%c1_649, %c0_650, %c0_651], %1270 {strides = array<i32>} : memref<7x8x128xf32, #tpu.memory_space<vmem>>, vector<1x8x128xf32>,
    %c2_652 = arith.constant 2 : index
    %c0_653 = arith.constant 0 : index
    %c0_654 = arith.constant 0 : index
    %1271 = vector.load %arg4[%c2_652, %c0_653, %c0_654] : memref<7x8x128xf32, #tpu.memory_space<vmem>>, vector<1x8x128xf32>
    %1272 = vector.shape_cast %1271 : vector<1x8x128xf32> to vector<8x128xf32>
    %1273 = arith.addf %1272, %1248 : vector<8x128xf32>
    %c2_655 = arith.constant 2 : index
    %c0_656 = arith.constant 0 : index
    %c0_657 = arith.constant 0 : index
    %1274 = vector.load %arg4[%c2_655, %c0_656, %c0_657] : memref<7x8x128xf32, #tpu.memory_space<vmem>>, vector<1x8x128xf32>
    %1275 = vector.shape_cast %1274 : vector<1x8x128xf32> to vector<8x128xf32>
    %1276 = vector.shape_cast %1273 : vector<8x128xf32> to vector<1x8x128xf32>
    tpu.vector_store %arg4[%c2_655, %c0_656, %c0_657], %1276 {strides = array<i32>} : memref<7x8x128xf32, #tpu.memory_space<vmem>>, vector<1x8x128xf32>,
    %c3_658 = arith.constant 3 : index
    %c0_659 = arith.constant 0 : index
    %c0_660 = arith.constant 0 : index
    %1277 = vector.load %arg4[%c3_658, %c0_659, %c0_660] : memref<7x8x128xf32, #tpu.memory_space<vmem>>, vector<1x8x128xf32>
    %1278 = vector.shape_cast %1277 : vector<1x8x128xf32> to vector<8x128xf32>
    %1279 = arith.addf %1278, %1250 : vector<8x128xf32>
    %c3_661 = arith.constant 3 : index
    %c0_662 = arith.constant 0 : index
    %c0_663 = arith.constant 0 : index
    %1280 = vector.load %arg4[%c3_661, %c0_662, %c0_663] : memref<7x8x128xf32, #tpu.memory_space<vmem>>, vector<1x8x128xf32>
    %1281 = vector.shape_cast %1280 : vector<1x8x128xf32> to vector<8x128xf32>
    %1282 = vector.shape_cast %1279 : vector<8x128xf32> to vector<1x8x128xf32>
    tpu.vector_store %arg4[%c3_661, %c0_662, %c0_663], %1282 {strides = array<i32>} : memref<7x8x128xf32, #tpu.memory_space<vmem>>, vector<1x8x128xf32>,
    %c4_664 = arith.constant 4 : index
    %c0_665 = arith.constant 0 : index
    %c0_666 = arith.constant 0 : index
    %1283 = vector.load %arg4[%c4_664, %c0_665, %c0_666] : memref<7x8x128xf32, #tpu.memory_space<vmem>>, vector<1x8x128xf32>
    %1284 = vector.shape_cast %1283 : vector<1x8x128xf32> to vector<8x128xf32>
    %1285 = arith.addf %1284, %1252 : vector<8x128xf32>
    %c4_667 = arith.constant 4 : index
    %c0_668 = arith.constant 0 : index
    %c0_669 = arith.constant 0 : index
    %1286 = vector.load %arg4[%c4_667, %c0_668, %c0_669] : memref<7x8x128xf32, #tpu.memory_space<vmem>>, vector<1x8x128xf32>
    %1287 = vector.shape_cast %1286 : vector<1x8x128xf32> to vector<8x128xf32>
    %1288 = vector.shape_cast %1285 : vector<8x128xf32> to vector<1x8x128xf32>
    tpu.vector_store %arg4[%c4_667, %c0_668, %c0_669], %1288 {strides = array<i32>} : memref<7x8x128xf32, #tpu.memory_space<vmem>>, vector<1x8x128xf32>,
    %c5_670 = arith.constant 5 : index
    %c0_671 = arith.constant 0 : index
    %c0_672 = arith.constant 0 : index
    %1289 = vector.load %arg4[%c5_670, %c0_671, %c0_672] : memref<7x8x128xf32, #tpu.memory_space<vmem>>, vector<1x8x128xf32>
    %1290 = vector.shape_cast %1289 : vector<1x8x128xf32> to vector<8x128xf32>
    %1291 = arith.addf %1290, %1255 : vector<8x128xf32>
    %c5_673 = arith.constant 5 : index
    %c0_674 = arith.constant 0 : index
    %c0_675 = arith.constant 0 : index
    %1292 = vector.load %arg4[%c5_673, %c0_674, %c0_675] : memref<7x8x128xf32, #tpu.memory_space<vmem>>, vector<1x8x128xf32>
    %1293 = vector.shape_cast %1292 : vector<1x8x128xf32> to vector<8x128xf32>
    %1294 = vector.shape_cast %1291 : vector<8x128xf32> to vector<1x8x128xf32>
    tpu.vector_store %arg4[%c5_673, %c0_674, %c0_675], %1294 {strides = array<i32>} : memref<7x8x128xf32, #tpu.memory_space<vmem>>, vector<1x8x128xf32>,
    %c6_676 = arith.constant 6 : index
    %c0_677 = arith.constant 0 : index
    %c0_678 = arith.constant 0 : index
    %1295 = vector.load %arg4[%c6_676, %c0_677, %c0_678] : memref<7x8x128xf32, #tpu.memory_space<vmem>>, vector<1x8x128xf32>
    %1296 = vector.shape_cast %1295 : vector<1x8x128xf32> to vector<8x128xf32>
    %1297 = arith.addf %1296, %1258 : vector<8x128xf32>
    %c6_679 = arith.constant 6 : index
    %c0_680 = arith.constant 0 : index
    %c0_681 = arith.constant 0 : index
    %1298 = vector.load %arg4[%c6_679, %c0_680, %c0_681] : memref<7x8x128xf32, #tpu.memory_space<vmem>>, vector<1x8x128xf32>
    %1299 = vector.shape_cast %1298 : vector<1x8x128xf32> to vector<8x128xf32>
    %1300 = vector.shape_cast %1297 : vector<8x128xf32> to vector<1x8x128xf32>
    tpu.vector_store %arg4[%c6_679, %c0_680, %c0_681], %1300 {strides = array<i32>} : memref<7x8x128xf32, #tpu.memory_space<vmem>>, vector<1x8x128xf32>,
    return
  }
  func.func @transform_0(%arg0: i32, %arg1: i32) -> (i32, i32, i32, i32) {
    %c1_i32 = arith.constant 1 : i32
    %0 = arith.muli %arg0, %c1_i32 : i32
    %1 = arith.addi %0, %arg1 : i32
    %c0_i32 = arith.constant 0 : i32
    %2 = arith.minsi %1, %c0_i32 : i32
    %c0_i32_0 = arith.constant 0 : i32
    %c0_i32_1 = arith.constant 0 : i32
    %c0_i32_2 = arith.constant 0 : i32
    %c0_i32_3 = arith.constant 0 : i32
    return %c0_i32_0, %c0_i32_1, %2, %c0_i32_2 : i32, i32, i32, i32
  }
  func.func @transform_1(%arg0: i32, %arg1: i32) -> (i32, i32, i32) {
    %c1_i32 = arith.constant 1 : i32
    %0 = arith.muli %arg0, %c1_i32 : i32
    %1 = arith.addi %0, %arg1 : i32
    %c0_i32 = arith.constant 0 : i32
    %2 = arith.minsi %1, %c0_i32 : i32
    %c0_i32_0 = arith.constant 0 : i32
    %c0_i32_1 = arith.constant 0 : i32
    %c0_i32_2 = arith.constant 0 : i32
    return %c0_i32_0, %2, %c0_i32_1 : i32, i32, i32
  }
  func.func @transform_2(%arg0: i32, %arg1: i32) -> (i32, i32, i32) {
    %c0_i32 = arith.constant 0 : i32
    %c0_i32_0 = arith.constant 0 : i32
    %c0_i32_1 = arith.constant 0 : i32
    return %arg0, %c0_i32, %c0_i32_0 : i32, i32, i32
  }
}

</mosaic_0001>

<bundles_post_ra>
// kernel: _yolov2_loss_jit.1
= control target key start
LH: loop header
LB: loop body
LE: loop exit
PB: predicated region body
PF: predicated region fallthrough
CT: control target
= control target key end

     0   :  { %v76_v0 = vlaneseq  ;;  %vm1732_vm6 = vmmov 1   ;;  %s2924_s0 = inlined_call_operand.vmem [shape: f32[5,25,8,128], index: 0, kind: input, shape index: {}]   ;;  %s2925_s1 = inlined_call_operand.vmem [shape: f32[25,8,128], index: 1, kind: input, shape index: {}]   ;;  %s2926_s2 = inlined_call_operand.vmem [shape: f32[7,8,128], index: 2, kind: output, shape index: {}]  }
   0x1   :  { %v128_v3 = vld [vmem:[%s2924_s0] sm:$0xff]  ;;  %v1417_v6 = vld [vmem:[%s2924_s0 + $0x8] sm:$0xff]  ;;  %v1421_v8 = vld [vmem:[%s2924_s0 + $0x10] sm:$0xff] }
   0x2   :  { %v77_v1 = vshrl.u32 %v76_v0, 7  ;;  %v79_v2 = vand.u32 127, %v76_v0  ;;  %v1416_v5 = vmul.f32 -1.442695, %v128_v3  ;;  %v1418_v7 = vmul.f32 -1.442695, %v1417_v6 }
   0x3   :  { %v1422_v9 = vld [vmem:[%s2924_s0 + $0x18] sm:$0xff]  ;;  %v153_v11 = vmul.f32 1.442695, %v1421_v8  ;;  %v1423_v12 = vld [vmem:[%s2924_s0 + $0xc8] sm:$0xff]  ;;  %v1425_v13 = vld [vmem:[%s2924_s0 + $0xd0] sm:$0xff] }
   0x4   :  { %v82_v4 = vmul.u32 128, %v77_v1  ;;  %1591 = vpow2.f32 %v1416_v5  ;;  %v158_v14 = vmul.f32 1.442695, %v1422_v9  ;;  %v1429_v15 = vld [vmem:[%s2924_s0 + $0xd8] sm:$0xff]  ;;  %v1430_v17 = vld [vmem:[%s2924_s0 + $0xe0] sm:$0xff]  ;;  %v1431_v18 = vld [vmem:[%s2924_s0 + $0x190] sm:$0xff] }
   0x5   :  { %1593 = vpow2.f32 %v1418_v7  ;;  %v1424_v19 = vmul.f32 -1.442695, %v1423_v12  ;;  %v1426_v20 = vmul.f32 -1.442695, %v1425_v13  ;;  %v1433_v21 = vld [vmem:[%s2924_s0 + $0x198] sm:$0xff]  ;;  %v1437_v24 = vld [vmem:[%s2924_s0 + $0x1a0] sm:$0xff] }
   0x6   :  { %v1760_v10 = vadd.s32 %v82_v4, %v79_v2  ;;  %1595 = vpow2.f32 %v153_v11  ;;  %v229_v23 = vmul.f32 1.442695, %v1429_v15  ;;  %v1789_v25 = vld [vmem:[%s2925_s1 + $0x10] sm:$0xff]  ;;  %v235_v26 = vmul.f32 1.442695, %v1430_v17  ;;  %v1438_v28 = vld [vmem:[%s2924_s0 + $0x1a8] sm:$0xff] }
   0x7   :  { %1597 = vpow2.f32 %v158_v14  ;;  %v1432_v27 = vmul.f32 -1.442695, %v1431_v18  ;;  %v1797_v30 = vld [vmem:[%s2925_s1 + $0x18] sm:$0xff]  ;;  %v1434_v31 = vmul.f32 -1.442695, %v1433_v21  ;;  %v1441_v34 = vld [vmem:[%s2924_s0 + $0x260] sm:$0xff] }
   0x8   :  { %v86_v16 = vcvt.s32.f32 %v1760_v10  ;;  %1599 = vpow2.f32 %v1424_v19  ;;  %v1439_v32 = vld [vmem:[%s2924_s0 + $0x258] sm:$0xff]  ;;  %v307_v33 = vmul.f32 1.442695, %v1437_v24  ;;  %v1414_v36 = vadd.f32 -1e-16, %v1789_v25  ;;  %v1445_v38 = vld [vmem:[%s2924_s0 + $0x268] sm:$0xff] }
   0x9   :  { %1601 = vpow2.f32 %v1426_v20  ;;  %v313_v37 = vmul.f32 1.442695, %v1438_v28  ;;  %v1814_v39 = vld [vmem:[%s2925_s1] sm:$0xff]  ;;  %v1415_v40 = vadd.f32 -1e-16, %v1797_v30  ;;  %v1821_v43 = vld [vmem:[%s2925_s1 + $0x8] sm:$0xff] }
   0xa   :  { %v87_v22 = vadd.f32 0.5, %v86_v16  ;;  %1603 = vpow2.f32 %v229_v23  ;;  %v1440_v41 = vmul.f32 -1.442695, %v1439_v32  ;;  %v1442_v44 = vmul.f32 -1.442695, %v1441_v34  ;;  %v1446_v46 = vld [vmem:[%s2924_s0 + $0x270] sm:$0xff] }
   0xb   :  { %1605 = vpow2.f32 %v235_v26  ;;  %v385_v45 = vmul.f32 1.442695, %v1445_v38  ;;  %v1412_v47 = vadd.f32 -1e-16, %v1814_v39  ;;  %v119_v48 = vmul.f32 0.5, %v1414_v36  ;;  %v1447_v49 = vld [vmem:[%s2924_s0 + $0x320] sm:$0xff] }
   0xc   :  { %v88_v29 = vmul.f32 0.25, %v87_v22  ;;  %1607 = vpow2.f32 %v1432_v27  ;;  %v1413_v52 = vadd.f32 -1e-16, %v1821_v43  ;;  %v122_v53 = vmul.f32 0.5, %v1415_v40  ;;  %v1449_v54 = vld [vmem:[%s2924_s0 + $0x328] sm:$0xff]  ;;  %v1453_v9 = vld [vmem:[%s2924_s0 + $0x330] sm:$0xff] }
   0xd   :  { %1609 = vpow2.f32 %v1434_v31  ;;  %v391_v57 = vmul.f32 1.442695, %v1446_v46  ;;  %v1448_v59 = vmul.f32 -1.442695, %v1447_v49  ;;  %v1834_v61 = vsub.f32 %v1412_v47, %v119_v48  ;;  %v1454_v17 = vld [vmem:[%s2924_s0 + $0x338] sm:$0xff]  ;;  %v1419_v18 = vld [vmem:[%s2924_s0 + $0x20] sm:$0xff] }
   0xe   :  { %v1805_v35 = vfloor.f32 %v88_v29  ;;  %1611 = vpow2.f32 %v307_v33  ;;  %v1836_v62 = vadd.f32 %v1412_v47, %v119_v48  ;;  %v1450_v63 = vmul.f32 -1.442695, %v1449_v54  ;;  %v1427_v19 = vld [vmem:[%s2924_s0 + $0xe8] sm:$0xff] }
   0xf   :  { %1613 = vpow2.f32 %v313_v37  ;;  %v1838_v2 = vsub.f32 %v1413_v52, %v122_v53  ;;  %v1840_v3 = vadd.f32 %v1413_v52, %v122_v53  ;;  %v463_v23 = vmul.f32 1.442695, %v1453_v9 }
  0x10   :  { %v92_v42 = vadd.f32 0.5, %v1805_v35  ;;  %1615 = vpow2.f32 %v1440_v41  ;;  %v125_v6 = vsub.f32 %v1836_v62, %v1834_v61  ;;  %v90_v12 = vmul.f32 4.0, %v1805_v35 }
  0x11   :  { %v1592_v50 = vpop.eup %1591  ;;  %1617 = vpow2.f32 %v1442_v44  ;;  %v126_v7 = vsub.f32 %v1840_v3, %v1838_v2  ;;  %v469_v34 = vmul.f32 1.442695, %v1454_v17  ;;  %v1420_v36 = vmul.f32 -1.442695, %v1419_v18 }
  0x12   :  { %v93_v51 = vmul.f32 0.25, %v92_v42  ;;  %v1594_v55 = vpop.eup %1593  ;;  %v132_v56 = vadd.f32 1.0, %v1592_v50  ;;  %1619 = vpow2.f32 %v385_v45  ;;  %v1871_v32 = vsub.f32 %v86_v16, %v90_v12  ;;  %v1435_v42 = vld [vmem:[%s2924_s0 + $0x1b0] sm:$0xff]  ;;  %v1443_v16 = vld [vmem:[%s2924_s0 + $0x278] sm:$0xff] }
  0x13   :  { %v140_v58 = vadd.f32 1.0, %v1594_v55  ;;  %v1596_v60 = vpop.eup %1595  ;;  %v1863_v26 = vmul.f32 %v126_v7, %v125_v6  ;;  %v1428_v41 = vmul.f32 -1.442695, %v1427_v19  ;;  %v1436_v54 = vmul.f32 -1.442695, %v1435_v42 }
  0x14   :  { %1621 = vrcp.f32 %v132_v56  ;;  %v1598_v0 = vpop.eup %1597  ;;  %v94_v1 = vfloor.f32 %v93_v51  ;;  %v1859_v21 = vmul.f32 0.8010479, %v1596_v60  ;;  %vm97_vm4 = vcmp.lt.s32.totalorder %v1760_v10, 32 }
  0x15   :  { %1623 = vrcp.f32 %v140_v58  ;;  %v1600_v4 = vpop.eup %1599  ;;  %v1861_v22 = vmul.f32 0.82689786, %v1598_v0  ;;  %v1894_v58 = vmul.f32 -1.442695, %v1443_v16 }
  0x16   :  { %1625 = vpow2.f32 %v391_v57  ;;  %v1602_v5 = vpop.eup %1601  ;;  %v205_v8 = vadd.f32 1.0, %v1600_v4  ;;  %v95_v15 = vmul.f32 4.0, %v94_v1  ;;  %v168_v45 = vadd.f32 1e-14, %v1859_v21 }
  0x17   :  { %1627 = vpow2.f32 %v1448_v59  ;;  %v1604_v11 = vpop.eup %1603  ;;  %v214_v13 = vadd.f32 1.0, %v1602_v5  ;;  %v169_v46 = vadd.f32 1e-14, %v1861_v22 }
  0x18   :  { %1629 = vpow2.f32 %v1450_v63  ;;  %v1606_v14 = vpop.eup %1605  ;;  %v1865_v27 = vmul.f32 0.64027536, %v1604_v11  ;;  %v1874_v38 = vsub.f32 %v1805_v35, %v95_v15  ;;  %v170_v63 = vmul.f32 0.5, %v168_v45 }
  0x19   :  { %1631 = vrcp.f32 %v205_v8  ;;  %v1608_v20 = vpop.eup %1607  ;;  %v1867_v28 = vmul.f32 0.40698102, %v1606_v14  ;;  %v173_v0 = vmul.f32 0.5, %v169_v46 }
  0x1a   :  { %1633 = vrcp.f32 %v214_v13  ;;  %v1610_v24 = vpop.eup %1609  ;;  %v283_v29 = vadd.f32 1.0, %v1608_v20  ;;  %v245_v48 = vadd.f32 1e-14, %v1865_v27 }
  0x1b   :  { %v1612_v31 = vpop.eup %1611  ;;  %v292_v33 = vadd.f32 1.0, %v1610_v24  ;;  %v246_v49 = vadd.f32 1e-14, %v1867_v28 }
  0x1c   :  { %v1614_v37 = vpop.eup %1613  ;;  %1635 = vrcp.f32 %v283_v29  ;;  %v1876_v40 = vmul.f32 0.34960806, %v1612_v31  ;;  %v247_v5 = vmul.f32 0.5, %v245_v48 }
  0x1d   :  { %v1616_v44 = vpop.eup %1615  ;;  %1637 = vrcp.f32 %v292_v33  ;;  %v1886_v35 = vmul.f32 0.6819785, %v1614_v37  ;;  %v250_v6 = vmul.f32 0.5, %v246_v49 }
  0x1e   :  { %v1618_v47 = vpop.eup %1617  ;;  %v361_v50 = vadd.f32 1.0, %v1616_v44  ;;  %1639 = vpow2.f32 %v463_v23  ;;  %v323_v52 = vadd.f32 1e-14, %v1876_v40 }
  0x1f   :  { %v1620_v51 = vpop.eup %1619  ;;  %v370_v53 = vadd.f32 1.0, %v1618_v47  ;;  %1641 = vpow2.f32 %v469_v34  ;;  %v324_v56 = vadd.f32 1e-14, %v1886_v35 }
  0x20   :  { %1643 = vrcp.f32 %v361_v50  ;;  %v1892_v57 = vmul.f32 0.08761149, %v1620_v51  ;;  %v1901_v11 = vmul.f32 0.5, %v323_v52 }
  0x21   :  { %v1622_v55 = vpop.eup %1621  ;;  %1645 = vrcp.f32 %v370_v53  ;;  %v1907_v15 = vmul.f32 0.5, %v324_v56 }
  0x22   :  { %v1624_v59 = vpop.eup %1623  ;;  %v161_v60 = vadd.f32 %v1622_v55, %v1874_v38  ;;  %v401_v7 = vadd.f32 1e-14, %v1892_v57  ;;  %1647 = vpow2.f32 %v1420_v36 }
  0x23   :  { %v1626_v1 = vpop.eup %1625  ;;  %v163_v4 = vadd.f32 %v1624_v59, %v1871_v32  ;;  %1649 = vpow2.f32 %v1428_v41 }
  0x24   :  { %v1628_v8 = vpop.eup %1627  ;;  %v1899_v9 = vmul.f32 0.25, %v161_v60  ;;  %v1903_v12 = vmul.f32 0.13304023, %v1626_v1  ;;  %1651 = vpow2.f32 %v1436_v54  ;;  %v1913_v33 = vmul.f32 0.5, %v401_v7 }
  0x25   :  { %v1630_v13 = vpop.eup %1629  ;;  %v1905_v14 = vmul.f32 0.25, %v163_v4  ;;  %v439_v17 = vadd.f32 1.0, %v1628_v8 }
  0x26   :  { %v1632_v18 = vpop.eup %1631  ;;  %v166_v19 = vadd.f32 1e-14, %v1899_v9  ;;  %v402_v20 = vadd.f32 1e-14, %v1903_v12  ;;  %v448_v23 = vadd.f32 1.0, %v1630_v13 }
  0x27   :  { %v1634_v24 = vpop.eup %1633  ;;  %v167_v29 = vadd.f32 1e-14, %v1905_v14  ;;  %v238_v31 = vadd.f32 %v1632_v18, %v1874_v38  ;;  %1653 = vrcp.f32 %v439_v17 }
  0x28   :  { %v171_v34 = vsub.f32 %v166_v19, %v170_v63  ;;  %v172_v36 = vadd.f32 %v170_v63, %v166_v19  ;;  %v240_v37 = vadd.f32 %v1634_v24, %v1871_v32  ;;  %v1916_v41 = vmul.f32 0.5, %v402_v20 }
  0x29   :  { %v174_v42 = vsub.f32 %v167_v29, %v173_v0  ;;  %v175_v16 = vadd.f32 %v173_v0, %v167_v29  ;;  %v1918_v44 = vmul.f32 0.25, %v238_v31  ;;  %1655 = vrcp.f32 %v448_v23  ;;  %v1636_v45 = vpop.eup %1635 }
  0x2a   :  { %v176_v46 = vsub.f32 %v172_v36, %v171_v34  ;;  %v179_v47 = vmin.f32 %v172_v36, %v1836_v62  ;;  %v180_v48 = vmax.f32 %v171_v34, %v1834_v61  ;;  %v1922_v49 = vmul.f32 0.25, %v240_v37  ;;  %v1638_v50 = vpop.eup %1637 }
  0x2b   :  { %v177_v51 = vsub.f32 %v175_v16, %v174_v42  ;;  %v183_v52 = vmin.f32 %v175_v16, %v1840_v3  ;;  %v184_v53 = vmax.f32 %v174_v42, %v1838_v2  ;;  %v243_v54 = vadd.f32 1e-14, %v1918_v44  ;;  %v1640_v55 = vpop.eup %1639 }
  0x2c   :  { %v181_v56 = vsub.f32 %v179_v47, %v180_v48  ;;  %v244_v59 = vadd.f32 1e-14, %v1922_v49  ;;  %v316_v60 = vadd.f32 %v1636_v45, %v1874_v38  ;;  %v318_v63 = vadd.f32 %v1638_v50, %v1871_v32  ;;  %v1930_v0 = vpop.eup %1641 }
  0x2d   :  { %v178_v1 = vmul.f32 %v177_v51, %v176_v46  ;;  %v185_v4 = vsub.f32 %v183_v52, %v184_v53  ;;  %v248_v7 = vsub.f32 %v243_v54, %v247_v5  ;;  %v249_v8 = vadd.f32 %v247_v5, %v243_v54  ;;  %v1644_v13 = vpop.eup %1643 }
  0x2e   :  { %v182_v17 = vmax.f32 %v181_v56, 0.0  ;;  %v251_v18 = vsub.f32 %v244_v59, %v250_v6  ;;  %v252_v19 = vadd.f32 %v250_v6, %v244_v59  ;;  %v1932_v20 = vmul.f32 0.25, %v316_v60  ;;  %v1646_v23 = vpop.eup %1645 }
  0x2f   :  { %v186_v24 = vmax.f32 %v185_v4, 0.0  ;;  %v188_v29 = vadd.f32 %v178_v1, %v1863_v26  ;;  %v253_v31 = vsub.f32 %v249_v8, %v248_v7  ;;  %v256_v34 = vmin.f32 %v249_v8, %v1836_v62  ;;  %v1939_v16 = vpop.eup %1647 }
  0x30   :  { %v254_v36 = vsub.f32 %v252_v19, %v251_v18  ;;  %v257_v37 = vmax.f32 %v248_v7, %v1834_v61  ;;  %v260_v42 = vmin.f32 %v252_v19, %v1840_v3  ;;  %v261_v5 = vmax.f32 %v251_v18, %v1838_v2  ;;  %v1947_v48 = vpop.eup %1649 }
  0x31   :  { %v1941_v45 = vmul.f32 %v186_v24, %v182_v17  ;;  %v1943_v6 = vmul.f32 0.25, %v318_v63  ;;  %v321_v46 = vadd.f32 1e-14, %v1932_v20  ;;  %v394_v47 = vadd.f32 %v1644_v13, %v1874_v38  ;;  %v1950_v54 = vpop.eup %1651 }
  0x32   :  { %v255_v50 = vmul.f32 %v254_v36, %v253_v31  ;;  %v258_v51 = vsub.f32 %v256_v34, %v257_v37  ;;  %v262_v52 = vsub.f32 %v260_v42, %v261_v5  ;;  %v396_v53 = vadd.f32 %v1646_v23, %v1871_v32 }
  0x33   :  { %v189_v56 = vsub.f32 %v188_v29, %v1941_v45  ;;  %v322_v59 = vadd.f32 1e-14, %v1943_v6  ;;  %v326_v60 = vsub.f32 %v321_v46, %v1901_v11  ;;  %v327_v63 = vadd.f32 %v1901_v11, %v321_v46 }
  0x34   :  { %v1654_v1 = vpop.eup %1653  ;;  %v259_v4 = vmax.f32 %v258_v51, 0.0  ;;  %v263_v7 = vmax.f32 %v262_v52, 0.0  ;;  %v265_v8 = vadd.f32 %v255_v50, %v1863_v26  ;;  %v1957_v13 = vmul.f32 0.25, %v394_v47 }
  0x35   :  { %1657 = vrcp.f32 %v189_v56  ;;  %v329_v17 = vsub.f32 %v322_v59, %v1907_v15  ;;  %v330_v18 = vadd.f32 %v1907_v15, %v322_v59  ;;  %v331_v19 = vsub.f32 %v327_v63, %v326_v60 }
  0x36   :  { %v1656_v23 = vpop.eup %1655  ;;  %v1961_v24 = vmul.f32 %v263_v7, %v259_v4  ;;  %v334_v29 = vmin.f32 %v327_v63, %v1836_v62  ;;  %v335_v11 = vmax.f32 %v326_v60, %v1834_v61  ;;  %v1965_v31 = vmul.f32 0.25, %v396_v53 }
  0x37   :  { %v332_v34 = vsub.f32 %v330_v18, %v329_v17  ;;  %v338_v36 = vmin.f32 %v330_v18, %v1840_v3  ;;  %v339_v37 = vmax.f32 %v329_v17, %v1838_v2  ;;  %v399_v42 = vadd.f32 1e-14, %v1957_v13 }
  0x38   :  { %v266_v5 = vsub.f32 %v265_v8, %v1961_v24  ;;  %v336_v15 = vsub.f32 %v334_v29, %v335_v11  ;;  %v400_v46 = vadd.f32 1e-14, %v1965_v31  ;;  %v1972_v47 = vmul.f32 0.21245356, %v1640_v55 }
  0x39   :  { %v333_v50 = vmul.f32 %v332_v34, %v331_v19  ;;  %v340_v51 = vsub.f32 %v338_v36, %v339_v37  ;;  %v404_v52 = vsub.f32 %v399_v42, %v1913_v33  ;;  %v405_v53 = vadd.f32 %v1913_v33, %v399_v42 }
  0x3a   :  { %1659 = vrcp.f32 %v266_v5  ;;  %v337_v56 = vmax.f32 %v336_v15, 0.0  ;;  %v407_v59 = vsub.f32 %v400_v46, %v1916_v41  ;;  %v408_v60 = vadd.f32 %v1916_v41, %v400_v46 }
  0x3b   :  { %v341_v63 = vmax.f32 %v340_v51, 0.0  ;;  %v343_v4 = vadd.f32 %v333_v50, %v1863_v26  ;;  %v409_v7 = vsub.f32 %v405_v53, %v404_v52  ;;  %v412_v8 = vmin.f32 %v405_v53, %v1836_v62 }
  0x3c   :  { %v410_v55 = vsub.f32 %v408_v60, %v407_v59  ;;  %v413_v17 = vmax.f32 %v404_v52, %v1834_v61  ;;  %v416_v18 = vmin.f32 %v408_v60, %v1840_v3  ;;  %v417_v19 = vmax.f32 %v407_v59, %v1838_v2 }
  0x3d   :  { %v1983_v33 = vmul.f32 %v341_v63, %v337_v56  ;;  %v1986_v29 = vmul.f32 0.34329957, %v1930_v0  ;;  %v472_v41 = vadd.f32 %v1654_v1, %v1874_v38  ;;  %v474_v11 = vadd.f32 %v1656_v23, %v1871_v32 }
  0x3e   :  { %v411_v34 = vmul.f32 %v410_v55, %v409_v7  ;;  %v414_v36 = vsub.f32 %v412_v8, %v413_v17  ;;  %v418_v37 = vsub.f32 %v416_v18, %v417_v19  ;;  %v479_v42 = vadd.f32 1e-14, %v1972_v47 }
  0x3f   :  { %v344_v5 = vsub.f32 %v343_v4, %v1983_v33  ;;  %v1992_v15 = vmul.f32 0.25, %v472_v41  ;;  %v1994_v46 = vmul.f32 0.25, %v474_v11  ;;  %v480_v50 = vadd.f32 1e-14, %v1986_v29 }
  0x40   :  { %v415_v51 = vmax.f32 %v414_v36, 0.0  ;;  %v419_v0 = vmax.f32 %v418_v37, 0.0  ;;  %v421_v52 = vadd.f32 %v411_v34, %v1863_v26  ;;  %v481_v38 = vmul.f32 0.5, %v479_v42 }
  0x41   :  { %1661 = vrcp.f32 %v344_v5  ;;  %v477_v32 = vadd.f32 1e-14, %v1992_v15  ;;  %v478_v1 = vadd.f32 1e-14, %v1994_v46  ;;  %v484_v23 = vmul.f32 0.5, %v480_v50 }
  0x42   :  { %v1658_v53 = vpop.eup %1657  ;;  %v420_v56 = vmul.f32 %v419_v0, %v415_v51  ;;  %1663 = vpow2.f32 %v1894_v58  ;;  %v2009_v58 = vmax.f32 %v1789_v25, 0.0  ;;  %v148_v5 = vadd.f32 1.0, %v1939_v16 }
  0x43   :  { %v482_v59 = vsub.f32 %v477_v32, %v481_v38  ;;  %v483_v60 = vadd.f32 %v481_v38, %v477_v32  ;;  %v485_v63 = vsub.f32 %v478_v1, %v484_v23  ;;  %v486_v7 = vadd.f32 %v484_v23, %v478_v1 }
  0x44   :  { %v422_v4 = vsub.f32 %v421_v52, %v420_v56  ;;  %v2002_v8 = vmul.f32 %v1658_v53, %v1941_v45  ;;  %v1451_v45 = vld [vmem:[%s2924_s0 + $0x340] sm:$0xff]  ;;  %v301_v16 = vadd.f32 1.0, %v1950_v54  ;;  %vm518_vm5 = vcmp.eq.f32.partialorder %v2009_v58, inf }
  0x45   :  { %v487_v55 = vsub.f32 %v483_v60, %v482_v59  ;;  %v490_v17 = vmin.f32 %v483_v60, %v1836_v62  ;;  %v491_v18 = vmax.f32 %v482_v59, %v1834_v61  ;;  %v488_v41 = vsub.f32 %v486_v7, %v485_v63  ;;  %v2041_v54 = vld [vmem:[%s2925_s1 + $0x20] sm:$0xff] }
  0x46   :  { %1665 = vrcp.f32 %v422_v4  ;;  %v494_v34 = vmin.f32 %v486_v7, %v1840_v3  ;;  %v495_v36 = vmax.f32 %v485_v63, %v1838_v2  ;;  %vm192_vm0 = vcmp.gt.f32.partialorder %v2002_v8, -inf }
  0x47   :  { %v1660_v19 = vpop.eup %1659  ;;  %v492_v11 = vsub.f32 %v490_v17, %v491_v18  ;;  %v489_v62 = vmul.f32 %v488_v41, %v487_v55  ;;  %v2016_v61 = vmax.f32 %v1797_v30, 0.0  ;;  %v223_v2 = vadd.f32 1.0, %v1947_v48 }
  0x48   :  { %v496_v37 = vsub.f32 %v494_v34, %v495_v36  ;;  %v268_v3 = vmul.f32 %v1660_v19, %v1961_v24  ;;  %v1452_v25 = vmul.f32 -1.442695, %v1451_v45  ;;  %v193_v50 = vsel %vm192_vm0, %v2002_v8, -inf }
  0x49   :  { %v493_v42 = vmax.f32 %v492_v11, 0.0  ;;  %v499_v0 = vadd.f32 %v489_v62, %v1863_v26  ;;  %1667 = vrsqrt.f32 %v2009_v58  ;;  %v195_v59 = vsel %vm192_vm0, %v1905_v14, 0.0 }
  0x4a   :  { %v497_v51 = vmax.f32 %v496_v37, 0.0  ;;  %1669 = vrsqrt.f32 %v2016_v61  ;;  %vm2030_vm1 = vcmp.gt.f32.partialorder %v268_v3, %v193_v50  ;;  %vm111_vm3 = vcmp.eq.f32.partialorder %v2041_v54, 1.0 }
  0x4b   :  { %1671 = vrcp.f32 %v148_v5  ;;  %v270_v32 = vsel %vm2030_vm1, %v268_v3, %v193_v50  ;;  %v196_v4 = vsel %vm192_vm0, %v1859_v21, 0.0  ;;  %v197_v7 = vsel %vm192_vm0, %v1861_v22, 0.0  ;;  %vm2074_vm7 = vmxor %vm111_vm3, %vm1732_vm6 }
  0x4c   :  { %v2027_v52 = vmul.f32 %v497_v51, %v493_v42  ;;  %1673 = vrcp.f32 %v223_v2  ;;  %v1731_v55 = vmov 0.0   ;;  %v274_v19 = vsel %vm2030_vm1, %v1867_v28, %v197_v7  ;;  %vm2093_vm9 = vmand %vm97_vm4, %vm111_vm3  ;;  %v1465_v7 = vld [vmem:[%s2924_s0 + $0x38] sm:$0xff] }
  0x4d   :  { %1675 = vpow2.f32 %v1452_v25  ;;  %v276_v17 = vsel %vm2030_vm1, 1.0, %v1731_v55  ;;  %v521_v41 = vand.u32 2147483648, %v2009_v58  ;;  %vm526_vm10 = vcmp.eq.f32.partialorder %v2016_v61, inf  ;;  %vm2115_vm11 = vmand %vm97_vm4, %vm2074_vm7 }
  0x4e   :  { %v1662_v30 = vpop.eup %1661  ;;  %v500_v38 = vsub.f32 %v499_v0, %v2027_v52  ;;  %1677 = vrcp.f32 %v301_v16  ;;  %v529_v42 = vand.u32 2147483648, %v2016_v61  ;;  %v1576_v16 = vsel %vm2115_vm11, 1.0, %v1731_v55 }
  0x4f   :  { %v1664_v24 = vpop.eup %1663  ;;  %v346_v26 = vmul.f32 %v1662_v30, %v1983_v33  ;;  %v194_v33 = vsel %vm192_vm0, %v1899_v9, 0.0  ;;  %vm520_vm12 = vcmp.eq.f32.partialorder %v2009_v58, 0.0  ;;  %vm528_vm13 = vcmp.eq.f32.partialorder %v2016_v61, 0.0  ;;  %1588 = vst [vmem:[%s2926_s2 + $0x30] sm:$0xff] %v1576_v16 }
  0x50   :  { %1679 = vrcp.f32 %v500_v38  ;;  %v379_v23 = vadd.f32 1.0, %v1664_v24  ;;  %v271_v14 = vsel %vm2030_vm1, %v1918_v44, %v194_v33  ;;  %v1455_v33 = vld [vmem:[%s2924_s0 + $0x28] sm:$0xff] }
  0x51   :  { %vm2043_vm2 = vcmp.gt.f32.partialorder %v346_v26, %v270_v32  ;;  %v1463_v44 = vld [vmem:[%s2924_s0 + $0x288] sm:$0xff] }
  0x52   :  { %1681 = vrcp.f32 %v379_v23  ;;  %v348_v63 = vsel %vm2043_vm2, %v346_v26, %v270_v32  ;;  %v349_v36 = vsel %vm2043_vm2, %v1932_v20, %v271_v14  ;;  %v354_v28 = vsel %vm2043_vm2, 2.0, %v276_v17  ;;  %v1470_v17 = vld [vmem:[%s2924_s0 + $0x40] sm:$0xff]  ;;  %v1487_v38 = vld [vmem:[%s2924_s0 + $0x1e8] sm:$0xff] }
  0x53   :  { %v1666_v1 = vpop.eup %1665  ;;  %v352_v8 = vsel %vm2043_vm2, %v1886_v35, %v274_v19  ;;  %v1575_v35 = vsel %vm2093_vm9, 1.0, %v1731_v55  ;;  %v1466_v55 = vld [vmem:[%s2924_s0 + $0x100] sm:$0xff] }
  0x54   :  { %v424_v60 = vmul.f32 %v1666_v1, %v420_v56  ;;  %v272_v56 = vsel %vm2030_vm1, %v1922_v49, %v195_v59  ;;  %v273_v49 = vsel %vm2030_vm1, %v1865_v27, %v196_v4  ;;  %1586 = vst [vmem:[%s2926_s2 + $0x28] sm:$0xff] %v1575_v35  ;;  %v1461_v4 = vld [vmem:[%s2924_s0 + $0xf8] sm:$0xff] }
  0x55   :  { %v350_v27 = vsel %vm2043_vm2, %v1943_v6, %v272_v56  ;;  %v351_v3 = vsel %vm2043_vm2, %v1876_v40, %v273_v49  ;;  %v1467_v49 = vld [vmem:[%s2924_s0 + $0x1c8] sm:$0xff] }
  0x56   :  { %v1668_v9 = vpop.eup %1667  ;;  %vm2078_vm8 = vcmp.gt.f32.partialorder %v424_v60, %v348_v63 }
  0x57   :  { %v1670_v21 = vpop.eup %1669  ;;  %v517_v62 = vmul.f32 %v1668_v9, %v2009_v58  ;;  %v426_v6 = vsel %vm2078_vm8, %v424_v60, %v348_v63  ;;  %v427_v10 = vsel %vm2078_vm8, %v1957_v13, %v349_v36  ;;  %v428_v50 = vsel %vm2078_vm8, %v1965_v31, %v350_v27  ;;  %v1457_v63 = vld [vmem:[%s2924_s0 + $0x1b8] sm:$0xff]  ;;  %v1464_v27 = vld [vmem:[%s2924_s0 + $0x350] sm:$0xff] }
  0x58   :  { %v1672_v18 = vpop.eup %1671  ;;  %v525_v37 = vmul.f32 %v1670_v21, %v2016_v61  ;;  %v432_v51 = vsel %vm2078_vm8, 3.0, %v354_v28  ;;  %v429_v31 = vsel %vm2078_vm8, %v1892_v57, %v351_v3  ;;  %v430_v57 = vsel %vm2078_vm8, %v1903_v12, %v352_v8  ;;  %v1471_v21 = vld [vmem:[%s2924_s0 + $0x108] sm:$0xff]  ;;  %v1468_v28 = vld [vmem:[%s2924_s0 + $0x290] sm:$0xff] }
  0x59   :  { %v1674_v11 = vpop.eup %1673  ;;  %v198_v5 = vsel %vm192_vm0, %v1672_v18, 0.0  ;;  %v519_v24 = vsel %vm518_vm5, %v2009_v58, %v517_v62  ;;  %v1475_v3 = vld [vmem:[%s2924_s0 + $0x48] sm:$0xff]  ;;  %v1476_v8 = vld [vmem:[%s2924_s0 + $0x110] sm:$0xff] }
  0x5a   :  { %v1676_v45 = vpop.eup %1675  ;;  %v242_v0 = vadd.f32 %v1674_v11, %v1672_v18  ;;  %v275_v40 = vsel %vm2030_vm1, %v1674_v11, %v198_v5  ;;  %v527_v48 = vsel %vm526_vm10, %v2016_v61, %v525_v37  ;;  %v1458_v61 = vld [vmem:[%s2924_s0 + $0x280] sm:$0xff]  ;;  %v1459_v18 = vld [vmem:[%s2924_s0 + $0x348] sm:$0xff] }
  0x5b   :  { %v457_v2 = vadd.f32 1.0, %v1676_v45  ;;  %v1678_v25 = vpop.eup %1677  ;;  %v2198_v60 = vsel %vm528_vm13, %v529_v42, %v527_v48  ;;  %v1469_v45 = vld [vmem:[%s2924_s0 + $0x358] sm:$0xff] }
  0x5c   :  { %v320_v26 = vadd.f32 %v1678_v25, %v242_v0  ;;  %v1474_v0 = vld [vmem:[%s2924_s0 + $0x360] sm:$0xff] }
  0x5d   :  { %v1680_v30 = vpop.eup %1679  ;;  %1683 = vrcp.f32 %v457_v2 }
  0x5e   :  { %v502_v13 = vmul.f32 %v1680_v30, %v2027_v52  ;;  %v2162_v52 = vsel %vm2043_vm2, %v1678_v25, %v275_v40  ;;  %v1477_v30 = vld [vmem:[%s2924_s0 + $0x1d8] sm:$0xff] }
  0x5f   :  { %v2170_v32 = vpop.eup %1681 }
  0x60   :  { %vm2153_vm14 = vcmp.gt.f32.partialorder %v502_v13, %v426_v6  ;;  %v431_v58 = vsel %vm2078_vm8, %v2170_v32, %v2162_v52  ;;  %v398_v56 = vadd.f32 %v2170_v32, %v320_v26  ;;  %v1472_v6 = vld [vmem:[%s2924_s0 + $0x1d0] sm:$0xff]  ;;  %v1478_v13 = vld [vmem:[%s2924_s0 + $0x2a0] sm:$0xff] }
  0x61   :  { %v504_v1 = vsel %vm2153_vm14, %v1992_v15, %v427_v10  ;;  %v505_v12 = vsel %vm2153_vm14, %v1994_v46, %v428_v50  ;;  %v2180_v23 = vsel %vm2153_vm14, 4.0, %v432_v51  ;;  %v2185_v53 = vsel %vm2153_vm14, %v1972_v47, %v429_v31  ;;  %v1456_v47 = vld [vmem:[%s2924_s0 + $0xf0] sm:$0xff]  ;;  %v1473_v51 = vld [vmem:[%s2924_s0 + $0x298] sm:$0xff]  ;;  %v1479_v31 = vld [vmem:[%s2924_s0 + $0x368] sm:$0xff] }
  0x62   :  { %v510_v59 = vsub.f32 %v504_v1, %v1814_v39  ;;  %v512_v15 = vsub.f32 %v505_v12, %v1821_v43  ;;  %v2194_v46 = vsel %vm520_vm12, %v521_v41, %v519_v24  ;;  %v1460_v39 = vld [vmem:[%s2924_s0 + $0x30] sm:$0xff]  ;;  %vm555_vm15 = vcmp.eq.f32.partialorder %v2180_v23, 1.0  ;;  %v1481_v1 = vld [vmem:[%s2924_s0 + $0x118] sm:$0xff] }
  0x63   :  { %v2213_v43 = vsel %vm2153_vm14, %v1986_v29, %v430_v57  ;;  %1685 = vrsqrt.f32 %v2185_v53  ;;  %v1462_v29 = vld [vmem:[%s2924_s0 + $0x1c0] sm:$0xff]  ;;  %vm556_vm0 = vcmp.eq.f32.partialorder %v2180_v23, 2.0  ;;  %vm557_vm1 = vcmp.eq.f32.partialorder %v2180_v23, 3.0  ;;  %v1480_v24 = vld [vmem:[%s2924_s0 + $0x50] sm:$0xff]  ;;  %v1485_v12 = vld [vmem:[%s2924_s0 + $0x58] sm:$0xff] }
  0x64   :  { %v511_v9 = vmul.f32 %v510_v59, %v510_v59  ;;  %v513_v14 = vmul.f32 %v512_v15, %v512_v15  ;;  %vm558_vm2 = vcmp.eq.f32.partialorder %v2180_v23, 4.0  ;;  %v536_v22 = vand.u32 2147483648, %v2185_v53 }
  0x65   :  { %1687 = vrsqrt.f32 %v2213_v43  ;;  %v545_v41 = vand.u32 2147483648, %v2213_v43  ;;  %v565_v11 = vsel %vm555_vm15, %v1456_v47, %v1455_v33  ;;  %v585_v36 = vsel %vm555_vm15, %v1461_v4, %v1460_v39  ;;  %v1486_v33 = vld [vmem:[%s2924_s0 + $0x120] sm:$0xff] }
  0x66   :  { %v514_v19 = vadd.f32 %v513_v14, %v511_v9  ;;  %v569_v62 = vsel %vm556_vm0, %v1457_v63, %v565_v11  ;;  %v589_v37 = vsel %vm556_vm0, %v1462_v29, %v585_v36  ;;  %v607_v42 = vsel %vm555_vm15, %v1466_v55, %v1465_v7  ;;  %v1482_v39 = vld [vmem:[%s2924_s0 + $0x1e0] sm:$0xff]  ;;  %v1488_v9 = vld [vmem:[%s2924_s0 + $0x2b0] sm:$0xff] }
  0x67   :  { %v629_v5 = vsel %vm555_vm15, %v1471_v21, %v1470_v17  ;;  %vm533_vm3 = vcmp.eq.f32.partialorder %v2185_v53, inf  ;;  %v573_v25 = vsel %vm557_vm1, %v1458_v61, %v569_v62  ;;  %v593_v10 = vsel %vm557_vm1, %v1463_v44, %v589_v37  ;;  %v1483_v61 = vld [vmem:[%s2924_s0 + $0x2a8] sm:$0xff]  ;;  %v1490_v14 = vld [vmem:[%s2924_s0 + $0x60] sm:$0xff] }
  0x68   :  { %v1201_v2 = vsel %vm2093_vm9, %v514_v19, 0.0  ;;  %v611_v50 = vsel %vm556_vm0, %v1467_v49, %v607_v42  ;;  %vm535_vm4 = vcmp.eq.f32.partialorder %v2185_v53, 0.0  ;;  %v2308_v40 = vsel %vm558_vm2, %v1459_v18, %v573_v25  ;;  %v1484_v18 = vld [vmem:[%s2924_s0 + $0x370] sm:$0xff]  ;;  %v1489_v49 = vld [vmem:[%s2924_s0 + $0x378] sm:$0xff]  ;;  %v1495_v62 = vld [vmem:[%s2924_s0 + $0x68] sm:$0xff] }
  0x69   :  { %v2312_v35 = vsel %vm558_vm2, %v1464_v27, %v593_v10  ;;  %v615_v16 = vsel %vm557_vm1, %v1468_v28, %v611_v50  ;;  %vm542_vm5 = vcmp.eq.f32.partialorder %v2213_v43, inf  ;;  %v633_v26 = vsel %vm556_vm0, %v1472_v6, %v629_v5  ;;  %1219 = vst [vmem:[%s2926_s2] sm:$0xff] %v1201_v2  ;;  %v1492_v28 = vld [vmem:[%s2924_s0 + $0x1f0] sm:$0xff] }
  0x6a   :  { %v1684_v48 = vpop.eup %1683  ;;  %v600_v57 = vmax.f32 %v2308_v40, %v2312_v35  ;;  %v2330_v52 = vsel %vm558_vm2, %v1469_v45, %v615_v16  ;;  %v651_v32 = vsel %vm555_vm15, %v1476_v8, %v1475_v3  ;;  %vm544_vm6 = vcmp.eq.f32.partialorder %v2213_v43, 0.0  ;;  %v1493_v45 = vld [vmem:[%s2924_s0 + $0x2b8] sm:$0xff]  ;;  %v1496_v3 = vld [vmem:[%s2924_s0 + $0x130] sm:$0xff] }
  0x6b   :  { %v508_v59 = vsel %vm2153_vm14, %v1684_v48, %v431_v58  ;;  %v476_v15 = vadd.f32 %v1684_v48, %v398_v56  ;;  %v637_v47 = vsel %vm557_vm1, %v1473_v51, %v633_v26  ;;  %v655_v63 = vsel %vm556_vm0, %v1477_v30, %v651_v32  ;;  %v1491_v56 = vld [vmem:[%s2924_s0 + $0x128] sm:$0xff]  ;;  %v1500_v8 = vld [vmem:[%s2924_s0 + $0x70] sm:$0xff] }
  0x6c   :  { %v550_v58 = vsub.f32 %v2041_v54, %v508_v59  ;;  %v622_v4 = vmax.f32 %v600_v57, %v2330_v52  ;;  %v2368_v29 = vsel %vm558_vm2, %v1474_v0, %v637_v47  ;;  %v659_v7 = vsel %vm557_vm1, %v1478_v13, %v655_v63  ;;  %v1494_v0 = vld [vmem:[%s2924_s0 + $0x380] sm:$0xff]  ;;  %v1499_v48 = vld [vmem:[%s2924_s0 + $0x388] sm:$0xff] }
  0x6d   :  { %v552_v55 = vmul.f32 0.2, %v476_v15  ;;  %v2383_v17 = vsel %vm558_vm2, %v1479_v31, %v659_v7  ;;  %v673_v21 = vsel %vm555_vm15, %v1481_v1, %v1480_v24  ;;  %v695_v44 = vsel %vm555_vm15, %v1486_v33, %v1485_v12  ;;  %v1497_v31 = vld [vmem:[%s2924_s0 + $0x1f8] sm:$0xff]  ;;  %v1498_v24 = vld [vmem:[%s2924_s0 + $0x2c0] sm:$0xff]  ;;  %v1503_v59 = vld [vmem:[%s2924_s0 + $0x2c8] sm:$0xff] }
  0x6e   :  { %v551_v19 = vmul.f32 %v550_v58, %v550_v58  ;;  %v644_v11 = vmax.f32 %v622_v4, %v2368_v29  ;;  %v677_v36 = vsel %vm556_vm0, %v1482_v39, %v673_v21  ;;  %v699_v27 = vsel %vm556_vm0, %v1487_v38, %v695_v44  ;;  %v1502_v33 = vld [vmem:[%s2924_s0 + $0x200] sm:$0xff]  ;;  %v1504_v15 = vld [vmem:[%s2924_s0 + $0x390] sm:$0xff]  ;;  %v1505_v38 = vld [vmem:[%s2924_s0 + $0x78] sm:$0xff] }
  0x6f   :  { %v553_v37 = vsub.f32 %v552_v55, %v2041_v54  ;;  %v681_v42 = vsel %vm557_vm1, %v1483_v61, %v677_v36  ;;  %v703_v5 = vsel %vm557_vm1, %v1488_v9, %v699_v27  ;;  %v717_v6 = vsel %vm555_vm15, %v1491_v56, %v1490_v14  ;;  %v1501_v54 = vld [vmem:[%s2924_s0 + $0x138] sm:$0xff]  ;;  %v1506_v58 = vld [vmem:[%s2924_s0 + $0x140] sm:$0xff]  ;;  %v1507_v4 = vld [vmem:[%s2924_s0 + $0x208] sm:$0xff] }
  0x70   :  { %v1686_v2 = vpop.eup %1685  ;;  %v1205_v25 = vsel %vm2093_vm9, %v551_v19, 0.0  ;;  %v666_v10 = vmax.f32 %v644_v11, %v2383_v17  ;;  %v2430_v50 = vsel %vm558_vm2, %v1484_v18, %v681_v42  ;;  %v2434_v51 = vsel %vm558_vm2, %v1489_v49, %v703_v5  ;;  %v1508_v14 = vld [vmem:[%s2924_s0 + $0x2d0] sm:$0xff]  ;;  %v1510_v56 = vld [vmem:[%s2924_s0 + $0x80] sm:$0xff]  ;;  %v1511_v55 = vld [vmem:[%s2924_s0 + $0x148] sm:$0xff] }
  0x71   :  { %v532_v30 = vmul.f32 %v1686_v2, %v2185_v53  ;;  %v554_v16 = vmul.f32 %v553_v37, %v553_v37  ;;  %v721_v13 = vsel %vm556_vm0, %v1492_v28, %v717_v6  ;;  %v739_v1 = vsel %vm555_vm15, %v1496_v3, %v1495_v62  ;;  %1580 = vst [vmem:[%s2926_s2 + $0x10] sm:$0xff] %v1205_v25  ;;  %v1509_v44 = vld [vmem:[%s2924_s0 + $0x398] sm:$0xff]  ;;  %v1512_v49 = vld [vmem:[%s2924_s0 + $0x210] sm:$0xff]  ;;  %v1518_v6 = vld [vmem:[%s2924_s0 + $0x2e0] sm:$0xff] }
  0x72   :  { %v1688_v57 = vpop.eup %1687  ;;  %v688_v26 = vmax.f32 %v666_v10, %v2430_v50  ;;  %v725_v32 = vsel %vm557_vm1, %v1493_v45, %v721_v13  ;;  %v761_v12 = vsel %vm555_vm15, %v1501_v54, %v1500_v8  ;;  %v743_v9 = vsel %vm556_vm0, %v1497_v31, %v739_v1  ;;  %v1516_v19 = vld [vmem:[%s2924_s0 + $0x150] sm:$0xff]  ;;  %v1513_v45 = vld [vmem:[%s2924_s0 + $0x2d8] sm:$0xff]  ;;  %v1519_v3 = vld [vmem:[%s2924_s0 + $0x3a8] sm:$0xff] }
  0x73   :  { %v534_v47 = vsel %vm533_vm3, %v2185_v53, %v532_v30  ;;  %v541_v63 = vmul.f32 %v1688_v57, %v2213_v43  ;;  %v1207_v39 = vsel %vm2115_vm11, %v554_v16, 0.0  ;;  %v2478_v61 = vsel %vm558_vm2, %v1494_v0, %v725_v32  ;;  %v1520_v8 = vld [vmem:[%s2924_s0 + $0x90] sm:$0xff]  ;;  %v1521_v10 = vld [vmem:[%s2924_s0 + $0x158] sm:$0xff]  ;;  %v1522_v0 = vld [vmem:[%s2924_s0 + $0x220] sm:$0xff] }
  0x74   :  { %v537_v20 = vsel %vm535_vm4, %v536_v22, %v534_v47  ;;  %v710_v7 = vmax.f32 %v688_v26, %v2434_v51  ;;  %v747_v21 = vsel %vm557_vm1, %v1498_v24, %v743_v9  ;;  %v765_v18 = vsel %vm556_vm0, %v1502_v33, %v761_v12  ;;  %1582 = vst [vmem:[%s2926_s2 + $0x18] sm:$0xff] %v1207_v39  ;;  %v1525_v30 = vld [vmem:[%s2924_s0 + $0x98] sm:$0xff]  ;;  %v1530_v57 = vld [vmem:[%s2924_s0 + $0xa0] sm:$0xff]  ;;  %v1531_v26 = vld [vmem:[%s2924_s0 + $0x168] sm:$0xff] }
  0x75   :  { %v538_v53 = vsub.f32 %v537_v20, %v2194_v46  ;;  %v543_v22 = vsel %vm542_vm5, %v2213_v43, %v541_v63  ;;  %v1515_v46 = vld [vmem:[%s2924_s0 + $0x88] sm:$0xff]  ;;  %v2535_v27 = vsel %vm558_vm2, %v1499_v48, %v747_v21  ;;  %v769_v28 = vsel %vm557_vm1, %v1503_v59, %v765_v18  ;;  %v1514_v43 = vld [vmem:[%s2924_s0 + $0x3a0] sm:$0xff]  ;;  %v1532_v47 = vld [vmem:[%s2924_s0 + $0x230] sm:$0xff] }
  0x76   :  { %v546_v11 = vsel %vm544_vm6, %v545_v41, %v543_v22  ;;  %v732_v36 = vmax.f32 %v710_v7, %v2478_v61  ;;  %v1517_v41 = vld [vmem:[%s2924_s0 + $0x218] sm:$0xff]  ;;  %v2551_v42 = vsel %vm558_vm2, %v1504_v15, %v769_v28  ;;  %v783_v5 = vsel %vm555_vm15, %v1506_v58, %v1505_v38  ;;  %v1526_v48 = vld [vmem:[%s2924_s0 + $0x160] sm:$0xff]  ;;  %v1523_v59 = vld [vmem:[%s2924_s0 + $0x2e8] sm:$0xff] }
  0x77   :  { %v539_v62 = vmul.f32 %v538_v53, %v538_v53  ;;  %v547_v37 = vsub.f32 %v546_v11, %v2198_v60  ;;  %v787_v54 = vsel %vm556_vm0, %v1507_v4, %v783_v5  ;;  %v805_v2 = vsel %vm555_vm15, %v1511_v55, %v1510_v56  ;;  %v1527_v15 = vld [vmem:[%s2924_s0 + $0x228] sm:$0xff]  ;;  %v1524_v4 = vld [vmem:[%s2924_s0 + $0x3b0] sm:$0xff]  ;;  %v1541_v21 = vld [vmem:[%s2924_s0 + $0x178] sm:$0xff] }
  0x78   :  { %v754_v60 = vmax.f32 %v732_v36, %v2535_v27  ;;  %v827_v25 = vsel %vm555_vm15, %v1516_v19, %v1515_v46  ;;  %v791_v13 = vsel %vm557_vm1, %v1508_v14, %v787_v54  ;;  %v809_v31 = vsel %vm556_vm0, %v1512_v49, %v805_v2  ;;  %v1528_v20 = vld [vmem:[%s2924_s0 + $0x2f0] sm:$0xff]  ;;  %v1535_v7 = vld [vmem:[%s2924_s0 + $0xa8] sm:$0xff]  ;;  %v1529_v46 = vld [vmem:[%s2924_s0 + $0x3b8] sm:$0xff] }
  0x79   :  { %v548_v16 = vmul.f32 %v547_v37, %v547_v37  ;;  %v831_v24 = vsel %vm556_vm0, %v1517_v41, %v827_v25  ;;  %v2598_v1 = vsel %vm558_vm2, %v1509_v44, %v791_v13  ;;  %v813_v12 = vsel %vm557_vm1, %v1513_v45, %v809_v31  ;;  %v1536_v53 = vld [vmem:[%s2924_s0 + $0x170] sm:$0xff]  ;;  %v1533_v11 = vld [vmem:[%s2924_s0 + $0x2f8] sm:$0xff]  ;;  %v1534_v25 = vld [vmem:[%s2924_s0 + $0x3c0] sm:$0xff] }
  0x7a   :  { %v776_v32 = vmax.f32 %v754_v60, %v2551_v42  ;;  %v835_v33 = vsel %vm557_vm1, %v1518_v6, %v831_v24  ;;  %v2615_v39 = vsel %vm558_vm2, %v1514_v43, %v813_v12  ;;  %v849_v58 = vsel %vm555_vm15, %v1521_v10, %v1520_v8  ;;  %v1540_v22 = vld [vmem:[%s2924_s0 + $0xb0] sm:$0xff]  ;;  %v1537_v36 = vld [vmem:[%s2924_s0 + $0x238] sm:$0xff]  ;;  %v1542_v43 = vld [vmem:[%s2924_s0 + $0x240] sm:$0xff] }
  0x7b   :  { %v549_v63 = vadd.f32 %v548_v16, %v539_v62  ;;  %v2619_v38 = vsel %vm558_vm2, %v1519_v3, %v835_v33  ;;  %v853_v14 = vsel %vm556_vm0, %v1522_v0, %v849_v58  ;;  %v871_v56 = vsel %vm555_vm15, %v1526_v48, %v1525_v30  ;;  %v1545_v41 = vld [vmem:[%s2924_s0 + $0xb8] sm:$0xff]  ;;  %v1546_v62 = vld [vmem:[%s2924_s0 + $0x180] sm:$0xff]  ;;  %v1551_v60 = vld [vmem:[%s2924_s0 + $0x188] sm:$0xff] }
  0x7c   :  { %v798_v9 = vmax.f32 %v776_v32, %v2598_v1  ;;  %v893_v55 = vsel %vm555_vm15, %v1531_v26, %v1530_v57  ;;  %v857_v44 = vsel %vm557_vm1, %v1523_v59, %v853_v14  ;;  %v875_v49 = vsel %vm556_vm0, %v1527_v15, %v871_v56  ;;  %v1538_v6 = vld [vmem:[%s2924_s0 + $0x300] sm:$0xff]  ;;  %v1547_v0 = vld [vmem:[%s2924_s0 + $0x248] sm:$0xff]  ;;  %v1552_v32 = vld [vmem:[%s2924_s0 + $0x250] sm:$0xff] }
  0x7d   :  { %v1203_v18 = vsel %vm2093_vm9, %v549_v63, 0.0  ;;  %v897_v19 = vsel %vm556_vm0, %v1532_v47, %v893_v55  ;;  %v879_v45 = vsel %vm557_vm1, %v1528_v20, %v875_v49  ;;  %v2679_v37 = vsel %vm558_vm2, %v1524_v4, %v857_v44  ;;  %v1550_v8 = vld [vmem:[%s2924_s0 + $0xc0] sm:$0xff]  ;;  %v1543_v13 = vld [vmem:[%s2924_s0 + $0x308] sm:$0xff]  ;;  %v1548_v59 = vld [vmem:[%s2924_s0 + $0x310] sm:$0xff] }
  0x7e   :  { %v820_v28 = vmax.f32 %v798_v9, %v2615_v39  ;;  %v915_v5 = vsel %vm555_vm15, %v1536_v53, %v1535_v7  ;;  %v937_v3 = vsel %vm555_vm15, %v1541_v21, %v1540_v22  ;;  %1578 = vst [vmem:[%s2926_s2 + $0x8] sm:$0xff] %v1203_v18  ;;  %v901_v2 = vsel %vm557_vm1, %v1533_v11, %v897_v19  ;;  %v1539_v57 = vld [vmem:[%s2924_s0 + $0x3c8] sm:$0xff]  ;;  %v1544_v63 = vld [vmem:[%s2924_s0 + $0x3d0] sm:$0xff]  ;;  %v1553_v20 = vld [vmem:[%s2924_s0 + $0x318] sm:$0xff] }
  0x7f   :  { %v919_v10 = vsel %vm556_vm0, %v1537_v36, %v915_v5  ;;  %v2710_v30 = vsel %vm558_vm2, %v1529_v46, %v879_v45  ;;  %v941_v16 = vsel %vm556_vm0, %v1542_v43, %v937_v3  ;;  %v959_v31 = vsel %vm555_vm15, %v1546_v62, %v1545_v41  ;;  %v1549_v14 = vld [vmem:[%s2924_s0 + $0x3d8] sm:$0xff]  ;;  %v1554_v22 = vld [vmem:[%s2924_s0 + $0x3e0] sm:$0xff]  ;;  %v1555_v21 = vld [vmem:[%s2925_s1 + $0x28] sm:$0xff] }
  0x80   :  { %v842_v54 = vmax.f32 %v820_v28, %v2619_v38  ;;  %v923_v48 = vsel %vm557_vm1, %v1538_v6, %v919_v10  ;;  %v981_v26 = vsel %vm555_vm15, %v1551_v60, %v1550_v8  ;;  %v2732_v12 = vsel %vm558_vm2, %v1534_v25, %v901_v2  ;;  %v1556_v18 = vld [vmem:[%s2925_s1 + $0x30] sm:$0xff]  ;;  %v1557_v36 = vld [vmem:[%s2925_s1 + $0x38] sm:$0xff]  ;;  %v1558_v5 = vld [vmem:[%s2925_s1 + $0x40] sm:$0xff] }
  0x81   :  { %v963_v33 = vsel %vm556_vm0, %v1547_v0, %v959_v31  ;;  %v945_v47 = vsel %vm557_vm1, %v1543_v13, %v941_v16  ;;  %v2747_v58 = vsel %vm558_vm2, %v1539_v57, %v923_v48  ;;  %v985_v4 = vsel %vm556_vm0, %v1552_v32, %v981_v26  ;;  %v1559_v0 = vld [vmem:[%s2925_s1 + $0x48] sm:$0xff] }
  0x82   :  { %v864_v24 = vmax.f32 %v842_v54, %v2679_v37  ;;  %v967_v9 = vsel %vm557_vm1, %v1548_v59, %v963_v33  ;;  %v2762_v56 = vsel %vm558_vm2, %v1544_v63, %v945_v47  ;;  %v989_v53 = vsel %vm557_vm1, %v1553_v20, %v985_v4  ;;  %v1561_v4 = vld [vmem:[%s2925_s1 + $0x58] sm:$0xff] }
  0x83   :  { %v2778_v44 = vsel %vm558_vm2, %v1549_v14, %v967_v9  ;;  %v2783_v46 = vsel %vm558_vm2, %v1554_v22, %v989_v53  ;;  %v1016_v19 = vadd.f32 %v1556_v18, %v1555_v21 }
  0x84   :  { %v886_v15 = vmax.f32 %v864_v24, %v2710_v30 }
  0x85   :  { %v1026_v45 = vadd.f32 %v1557_v36, %v1016_v19 }
  0x86   :  { %v908_v7 = vmax.f32 %v886_v15, %v2732_v12 }
  0x87   :  { %v1036_v10 = vadd.f32 %v1558_v5, %v1026_v45 }
  0x88   :  { %v930_v55 = vmax.f32 %v908_v7, %v2747_v58 }
  0x89   :  { %v1046_v26 = vadd.f32 %v1559_v0, %v1036_v10 }
  0x8a   :  { %v952_v49 = vmax.f32 %v930_v55, %v2762_v56 }
  0x8c   :  { %v974_v11 = vmax.f32 %v952_v49, %v2778_v44 }
  0x8e   :  { %v2790_v28 = vmax.f32 %v974_v11, %v2783_v46 }
  0x90   :  { %v998_v43 = vsub.f32 %v2308_v40, %v2790_v28  ;;  %v1008_v41 = vsub.f32 %v2312_v35, %v2790_v28  ;;  %v1018_v23 = vsub.f32 %v2330_v52, %v2790_v28  ;;  %v1028_v62 = vsub.f32 %v2368_v29, %v2790_v28 }
  0x91   :  { %v1038_v6 = vsub.f32 %v2383_v17, %v2790_v28  ;;  %v1048_v52 = vsub.f32 %v2430_v50, %v2790_v28  ;;  %v1058_v16 = vsub.f32 %v2434_v51, %v2790_v28  ;;  %v1560_v50 = vld [vmem:[%s2925_s1 + $0x50] sm:$0xff]  ;;  %v1068_v48 = vsub.f32 %v2478_v61, %v2790_v28 }
  0x92   :  { %v1001_v3 = vmul.f32 1.442695, %v998_v43  ;;  %v1004_v8 = vmul.f32 %v1555_v21, %v998_v43  ;;  %v1011_v60 = vmul.f32 1.442695, %v1008_v41  ;;  %v1014_v40 = vmul.f32 %v1556_v18, %v1008_v41 }
  0x93   :  { %v1021_v54 = vmul.f32 1.442695, %v1018_v23  ;;  %v1024_v2 = vmul.f32 %v1557_v36, %v1018_v23  ;;  %v1031_v35 = vmul.f32 1.442695, %v1028_v62  ;;  %v1034_v29 = vmul.f32 %v1558_v5, %v1028_v62  ;;  %v1563_v36 = vld [vmem:[%s2925_s1 + $0x68] sm:$0xff] }
  0x94   :  { %1689 = vpow2.f32 %v1001_v3  ;;  %v1015_v25 = vadd.f32 %v1014_v40, %v1004_v8  ;;  %v1041_v17 = vmul.f32 1.442695, %v1038_v6  ;;  %v1044_v31 = vmul.f32 %v1559_v0, %v1038_v6 }
  0x95   :  { %1691 = vpow2.f32 %v1011_v60  ;;  %v1051_v24 = vmul.f32 1.442695, %v1048_v52  ;;  %v1061_v32 = vmul.f32 1.442695, %v1058_v16  ;;  %v1078_v33 = vsub.f32 %v2535_v27, %v2790_v28 }
  0x96   :  { %1693 = vpow2.f32 %v1021_v54  ;;  %v1025_v13 = vadd.f32 %v1024_v2, %v1015_v25  ;;  %v1054_v51 = vmul.f32 %v1560_v50, %v1048_v52  ;;  %v1071_v15 = vmul.f32 1.442695, %v1068_v48 }
  0x97   :  { %1695 = vpow2.f32 %v1031_v35  ;;  %v1088_v47 = vsub.f32 %v2551_v42, %v2790_v28  ;;  %v1056_v63 = vadd.f32 %v1560_v50, %v1046_v26  ;;  %v1081_v61 = vmul.f32 1.442695, %v1078_v33  ;;  %v1562_v42 = vld [vmem:[%s2925_s1 + $0x60] sm:$0xff] }
  0x98   :  { %v1035_v57 = vadd.f32 %v1034_v29, %v1025_v13  ;;  %1697 = vpow2.f32 %v1041_v17  ;;  %v1098_v20 = vsub.f32 %v2598_v1, %v2790_v28  ;;  %v2828_v27 = vsub.f32 %v2615_v39, %v2790_v28  ;;  %v1565_v17 = vld [vmem:[%s2925_s1 + $0x78] sm:$0xff] }
  0x99   :  { %1699 = vpow2.f32 %v1051_v24  ;;  %v1064_v9 = vmul.f32 %v1561_v4, %v1058_v16  ;;  %v1091_v14 = vmul.f32 1.442695, %v1088_v47  ;;  %v1066_v55 = vadd.f32 %v1561_v4, %v1056_v63 }
  0x9a   :  { %v1045_v59 = vadd.f32 %v1044_v31, %v1035_v57  ;;  %1701 = vpow2.f32 %v1061_v32  ;;  %v1101_v22 = vmul.f32 1.442695, %v1098_v20  ;;  %v2835_v21 = vsub.f32 %v2619_v38, %v2790_v28 }
  0x9b   :  { %1703 = vpow2.f32 %v1071_v15  ;;  %v1074_v18 = vmul.f32 %v1562_v42, %v1068_v48  ;;  %v1111_v39 = vmul.f32 1.442695, %v2828_v27  ;;  %v2843_v45 = vsub.f32 %v2679_v37, %v2790_v28  ;;  %v1564_v37 = vld [vmem:[%s2925_s1 + $0x70] sm:$0xff] }
  0x9c   :  { %v1055_v7 = vadd.f32 %v1054_v51, %v1045_v59  ;;  %1705 = vpow2.f32 %v1081_v61  ;;  %v1076_v41 = vadd.f32 %v1562_v42, %v1066_v55  ;;  %v1121_v23 = vmul.f32 1.442695, %v2835_v21 }
  0x9d   :  { %1707 = vpow2.f32 %v1091_v14  ;;  %v2848_v62 = vsub.f32 %v2710_v30, %v2790_v28  ;;  %v1084_v6 = vmul.f32 %v1563_v36, %v1078_v33  ;;  %v2852_v3 = vsub.f32 %v2732_v12, %v2790_v28 }
  0x9e   :  { %v1065_v11 = vadd.f32 %v1064_v9, %v1055_v7  ;;  %1709 = vpow2.f32 %v1101_v22  ;;  %v1131_v40 = vmul.f32 1.442695, %v2843_v45  ;;  %v1086_v2 = vadd.f32 %v1563_v36, %v1076_v41  ;;  %v1569_v41 = vld [vmem:[%s2925_s1 + $0x98] sm:$0xff] }
  0x9f   :  { %1711 = vpow2.f32 %v1111_v39  ;;  %v1141_v30 = vmul.f32 1.442695, %v2848_v62  ;;  %v2861_v52 = vsub.f32 %v2747_v58, %v2790_v28  ;;  %v1094_v25 = vmul.f32 %v1564_v37, %v1088_v47 }
  0xa0   :  { %v1075_v60 = vadd.f32 %v1074_v18, %v1065_v11  ;;  %1713 = vpow2.f32 %v1121_v23  ;;  %v1151_v29 = vmul.f32 1.442695, %v2852_v3  ;;  %v2869_v16 = vsub.f32 %v2762_v56, %v2790_v28  ;;  %v1566_v56 = vld [vmem:[%s2925_s1 + $0x80] sm:$0xff] }
  0xa1   :  { %v1690_v53 = vpop.eup %1689  ;;  %1715 = vpow2.f32 %v1131_v40  ;;  %v1096_v31 = vadd.f32 %v1564_v37, %v1086_v2  ;;  %v1161_v58 = vmul.f32 1.442695, %v2861_v52  ;;  %v2874_v24 = vsub.f32 %v2778_v44, %v2790_v28  ;;  %v1570_v37 = vld [vmem:[%s2925_s1 + $0xa0] sm:$0xff] }
  0xa2   :  { %v1692_v1 = vpop.eup %1691  ;;  %v1085_v0 = vadd.f32 %v1084_v6, %v1075_v60  ;;  %1717 = vpow2.f32 %v1141_v30  ;;  %v1104_v57 = vmul.f32 %v1565_v17, %v1098_v20  ;;  %v1171_v33 = vmul.f32 1.442695, %v2869_v16 }
  0xa3   :  { %v1694_v49 = vpop.eup %1693  ;;  %v1013_v19 = vadd.f32 %v1692_v1, %v1690_v53  ;;  %1719 = vpow2.f32 %v1151_v29  ;;  %v2882_v51 = vsub.f32 %v2783_v46, %v2790_v28  ;;  %v1106_v47 = vadd.f32 %v1565_v17, %v1096_v31  ;;  %v1567_v46 = vld [vmem:[%s2925_s1 + $0x88] sm:$0xff]  ;;  %v1568_v1 = vld [vmem:[%s2925_s1 + $0x90] sm:$0xff] }
  0xa4   :  { %v1696_v43 = vpop.eup %1695  ;;  %v1095_v32 = vadd.f32 %v1094_v25, %v1085_v0  ;;  %1721 = vpow2.f32 %v1161_v58  ;;  %v1181_v44 = vmul.f32 1.442695, %v2874_v24  ;;  %v1114_v4 = vmul.f32 %v1566_v56, %v2828_v27  ;;  %v1571_v25 = vld [vmem:[%s2925_s1 + $0xa8] sm:$0xff]  ;;  %v1573_v58 = vld [vmem:[%s2925_s1 + $0xb8] sm:$0xff] }
  0xa5   :  { %v1023_v38 = vadd.f32 %v1694_v49, %v1013_v19  ;;  %v1698_v5 = vpop.eup %1697  ;;  %1723 = vpow2.f32 %v1171_v33  ;;  %v1191_v7 = vmul.f32 1.442695, %v2882_v51  ;;  %v1116_v42 = vadd.f32 %v1566_v56, %v1106_v47 }
  0xa6   :  { %v1700_v54 = vpop.eup %1699  ;;  %v1105_v20 = vadd.f32 %v1104_v57, %v1095_v32  ;;  %1725 = vpow2.f32 %v1181_v44  ;;  %v1124_v22 = vmul.f32 %v1567_v46, %v2835_v21  ;;  %v1144_v6 = vmul.f32 %v1569_v41, %v2848_v62 }
  0xa7   :  { %v1033_v8 = vadd.f32 %v1696_v43, %v1023_v38  ;;  %v1702_v12 = vpop.eup %1701  ;;  %1727 = vpow2.f32 %v1191_v7  ;;  %v1126_v39 = vadd.f32 %v1567_v46, %v1116_v42  ;;  %v1134_v43 = vmul.f32 %v1568_v1, %v2843_v45 }
  0xa8   :  { %v1704_v13 = vpop.eup %1703  ;;  %v1115_v53 = vadd.f32 %v1114_v4, %v1105_v20  ;;  %v1164_v0 = vmul.f32 %v1571_v25, %v2861_v52  ;;  %v1574_v52 = vld [vmem:[%s2925_s1 + $0xc0] sm:$0xff] }
  0xa9   :  { %v1043_v35 = vadd.f32 %v1698_v5, %v1033_v8  ;;  %v1706_v48 = vpop.eup %1705  ;;  %v1136_v38 = vadd.f32 %v1568_v1, %v1126_v39  ;;  %v1194_v33 = vmul.f32 %v1574_v52, %v2882_v51 }
  0xaa   :  { %v1708_v59 = vpop.eup %1707  ;;  %v1125_v11 = vadd.f32 %v1124_v22, %v1115_v53 }
  0xab   :  { %v1053_v10 = vadd.f32 %v1700_v54, %v1043_v35  ;;  %v1710_v63 = vpop.eup %1709  ;;  %v1146_v40 = vadd.f32 %v1569_v41, %v1136_v38  ;;  %v1154_v35 = vmul.f32 %v1570_v37, %v2852_v3 }
  0xac   :  { %v1712_v9 = vpop.eup %1711  ;;  %v1135_v5 = vadd.f32 %v1134_v43, %v1125_v11 }
  0xad   :  { %v1063_v50 = vadd.f32 %v1702_v12, %v1053_v10  ;;  %v1714_v14 = vpop.eup %1713  ;;  %v1156_v29 = vadd.f32 %v1570_v37, %v1146_v40 }
  0xae   :  { %v1716_v27 = vpop.eup %1715  ;;  %v1145_v45 = vadd.f32 %v1144_v6, %v1135_v5 }
  0xaf   :  { %v1073_v26 = vadd.f32 %v1704_v13, %v1063_v50  ;;  %v1718_v49 = vpop.eup %1717  ;;  %v1572_v13 = vld [vmem:[%s2925_s1 + $0xb0] sm:$0xff]  ;;  %v1166_v31 = vadd.f32 %v1571_v25, %v1156_v29 }
  0xb0   :  { %v1720_v19 = vpop.eup %1719  ;;  %v1155_v10 = vadd.f32 %v1154_v35, %v1145_v45  ;;  %v1174_v3 = vmul.f32 %v1572_v13, %v2869_v16 }
  0xb1   :  { %v1083_v15 = vadd.f32 %v1706_v48, %v1073_v26  ;;  %v1722_v23 = vpop.eup %1721  ;;  %v1176_v48 = vadd.f32 %v1572_v13, %v1166_v31  ;;  %v1184_v26 = vmul.f32 %v1573_v58, %v2874_v24 }
  0xb2   :  { %v1724_v60 = vpop.eup %1723  ;;  %v1165_v50 = vadd.f32 %v1164_v0, %v1155_v10 }
  0xb3   :  { %v1093_v61 = vadd.f32 %v1708_v59, %v1083_v15  ;;  %v1726_v2 = vpop.eup %1725  ;;  %v1186_v32 = vadd.f32 %v1573_v58, %v1176_v48 }
  0xb4   :  { %v1728_v12 = vpop.eup %1727  ;;  %v1175_v57 = vadd.f32 %v1174_v3, %v1165_v50 }
  0xb5   :  { %v1103_v28 = vadd.f32 %v1710_v63, %v1093_v61  ;;  %v1196_v59 = vadd.f32 %v1574_v52, %v1186_v32 }
  0xb6   :  { %v1185_v56 = vadd.f32 %v1184_v26, %v1175_v57 }
  0xb7   :  { %v1113_v55 = vadd.f32 %v1712_v9, %v1103_v28 }
  0xb8   :  { %v1195_v47 = vadd.f32 %v1194_v33, %v1185_v56 }
  0xb9   :  { %v1123_v18 = vadd.f32 %v1714_v14, %v1113_v55 }
  0xbb   :  { %v1133_v36 = vadd.f32 %v1716_v27, %v1123_v18 }
  0xbd   :  { %v1143_v21 = vadd.f32 %v1718_v49, %v1133_v36 }
  0xbf   :  { %v1153_v8 = vadd.f32 %v1720_v19, %v1143_v21 }
  0xc1   :  { %v1163_v54 = vadd.f32 %v1722_v23, %v1153_v8 }
  0xc3   :  { %v1173_v30 = vadd.f32 %v1724_v60, %v1163_v54 }
  0xc5   :  { %v1183_v62 = vadd.f32 %v1726_v2, %v1173_v30 }
  0xc7   :  { %v1193_v17 = vadd.f32 %v1728_v12, %v1183_v62 }
  0xc9   :  { %1729 = vlog2.f32 %v1193_v17 }
  0xd6   :  { %v1730_v15 = vpop.eup %1729 }
  0xd7   :  { %v1198_v16 = vmul.f32 0.6931472, %v1730_v15 }
  0xd9   :  { %v1199_v44 = vmul.f32 %v1198_v16, %v1196_v59 }
  0xdb   :  { %v1200_v63 = vsub.f32 %v1199_v44, %v1195_v47 }
  0xdd   :  { %v1209_v4 = vsel %vm2093_vm9, %v1200_v63, 0.0 }
  0xde   :  { %1584 = vst [vmem:[%s2926_s2 + $0x20] sm:$0xff] %v1209_v4 }

</bundles_post_ra>
